<compile_context>
chip_gen: v7x
topology: tpu7x:2x2x1
jax: 0.10.0
libtpu: 0.0.40
codegen_flags: <defaults>
</compile_context>

<pallas_src>
import functools
import numpy as np
import jax
import jax.numpy as jnp
from jax.experimental import pallas as pl
from jax.experimental.pallas import tpu as pltpu

BN_EPS = 1e-5
BN_SCALE = float(1.0 / np.sqrt(1.0 + BN_EPS))


def _rup(x, m):
    return ((x + m - 1) // m) * m


# ----------------------------------------------------------------------------
# host-side resampling operator matrices (trace-time constants)
# ----------------------------------------------------------------------------
def adaptive_pool_matrix(out_size, in_size):
    """Per-axis averaging matrix matching nn.AdaptiveAvgPool2d binning."""
    A = np.zeros((out_size, in_size), np.float32)
    for i in range(out_size):
        s = (i * in_size) // out_size
        e = -((-(i + 1) * in_size) // out_size)  # ceil
        A[i, s:e] = 1.0 / (e - s)
    return A


def bilinear_matrix(out_size, in_size):
    """Per-axis matrix for F.interpolate(mode='bilinear', align_corners=True)."""
    A = np.zeros((out_size, in_size), np.float32)
    if in_size == 1:
        A[:, 0] = 1.0
        return A
    if out_size == 1:
        A[0, 0] = 1.0
        return A
    scale = (in_size - 1) / (out_size - 1)
    for i in range(out_size):
        src = i * scale
        i0 = min(int(np.floor(src)), in_size - 1)
        i1 = min(i0 + 1, in_size - 1)
        f = src - i0
        A[i, i0] += 1.0 - f
        A[i, i1] += f
    return A


# ----------------------------------------------------------------------------
# Kernel 1: fused pyramid branches (one launch, grid over batch)
#   pooled = P_all @ x                       (all pool sizes stacked on the row axis)
#   z      = mask * relu(pooled @ W1_wide)   (block-diag mask == channel concat)
#   up     = U_cat @ z                       (bilinear upsample back to H*W)
# ----------------------------------------------------------------------------
def _pyramid_branch_kernel(p_ref, x_ref, w_ref, m_ref, u_ref, o_ref):
    x = x_ref[0]                                                         # (HW, Cin_p) bf16
    pooled = jnp.dot(p_ref[...], x, preferred_element_type=jnp.float32)  # (Pp, Cin_p) f32
    z = jnp.dot(pooled.astype(jnp.bfloat16), w_ref[...],
                preferred_element_type=jnp.float32)                      # (Pp, N4p) f32
    z = jnp.maximum(z, 0.0) * m_ref[...]                                 # ReLU + concat mask
    up = jnp.dot(u_ref[...], z.astype(jnp.bfloat16),
                 preferred_element_type=jnp.float32)                     # (HW, N4p) f32
    o_ref[0] = up.astype(o_ref.dtype)


def pyramid_branches(p_all, x_flat, w1_wide, mask, u_cat):
    B, HW, Cin_p = x_flat.shape
    Pp_p = p_all.shape[0]
    N4p = w1_wide.shape[1]
    cost = pl.CostEstimate(
        flops=2 * B * (Pp_p * HW * Cin_p + Pp_p * Cin_p * N4p + HW * Pp_p * N4p),
        transcendentals=0,
        bytes_accessed=(p_all.size + x_flat.size + w1_wide.size + u_cat.size) * 2
                       + mask.size * 4 + B * HW * N4p * 2)
    return pl.pallas_call(
        _pyramid_branch_kernel,
        out_shape=jax.ShapeDtypeStruct((B, HW, N4p), jnp.bfloat16),
        grid_spec=pltpu.PrefetchScalarGridSpec(
            num_scalar_prefetch=0,
            grid=(B,),
            in_specs=[
                pl.BlockSpec((Pp_p, HW), lambda b: (0, 0)),
                pl.BlockSpec((1, HW, Cin_p), lambda b: (b, 0, 0)),
                pl.BlockSpec((Cin_p, N4p), lambda b: (0, 0)),
                pl.BlockSpec((Pp_p, N4p), lambda b: (0, 0)),
                pl.BlockSpec((HW, Pp_p), lambda b: (0, 0)),
            ],
            out_specs=pl.BlockSpec((1, HW, N4p), lambda b: (b, 0, 0))),
        compiler_params=pltpu.CompilerParams(
            dimension_semantics=("parallel",),
            vmem_limit_bytes=32 * 1024 * 1024),
        cost_estimate=cost,
    )(p_all, x_flat, w1_wide, mask, u_cat)


# ----------------------------------------------------------------------------
# Kernel 2: 3x3 / stride 1 / pad 1 conv + folded BN + fused ReLU (implicit GEMM).
# The padded activation is flattened to rows r = h*(W+2)+w and kept in VMEM; tap
# (di, dj) is the contiguous row-slice starting at di*(W+2)+dj.  We compute
# H*(W+2) output rows (the two extra columns per row are garbage, discarded on
# the host) so each tap is a plain sublane-offset load -> bf16 MXU matmul.
# ----------------------------------------------------------------------------
def _bottleneck3x3_kernel(x_ref, w_ref, o_ref, *, W):
    _, m_out, tn = o_ref.shape
    acc = jnp.zeros((m_out, tn), jnp.float32)
    for t in range(9):                                   # static unroll over the taps
        di, dj = divmod(t, 3)
        off = di * (W + 2) + dj                          # static slice start
        lhs = x_ref[0, pl.ds(off, m_out), :]             # (m_out, Cin_p) bf16
        acc = acc + jnp.dot(lhs, w_ref[t], preferred_element_type=jnp.float32)
    o_ref[0] = jnp.maximum(acc, 0.0)                     # fused ReLU (BN folded into w)


def bottleneck_conv3x3(x_flat_pad, w_taps, *, B, H, W):
    _, Lp, Cp = x_flat_pad.shape
    Co = w_taps.shape[-1]
    m_out = H * (W + 2)
    TN = 256 if Co % 256 == 0 else 128                   # 256-wide lane-dense N tiles
    cost = pl.CostEstimate(
        flops=2 * B * m_out * 9 * Cp * Co, transcendentals=0,
        bytes_accessed=B * Lp * Cp * 2 + w_taps.size * 2 + B * m_out * Co * 4)
    return pl.pallas_call(
        functools.partial(_bottleneck3x3_kernel, W=W),
        out_shape=jax.ShapeDtypeStruct((B, m_out, Co), jnp.float32),
        grid_spec=pltpu.PrefetchScalarGridSpec(
            num_scalar_prefetch=0,
            grid=(B, Co // TN),
            in_specs=[pl.BlockSpec((1, Lp, Cp), lambda b, j: (b, 0, 0)),
                      pl.BlockSpec((9, Cp, TN), lambda b, j: (0, 0, j))],
            out_specs=pl.BlockSpec((1, m_out, TN), lambda b, j: (b, 0, j))),
        compiler_params=pltpu.CompilerParams(
            dimension_semantics=("parallel", "parallel"),
            vmem_limit_bytes=32 * 1024 * 1024),
        cost_estimate=cost,
    )(x_flat_pad, w_taps)


# ----------------------------------------------------------------------------
# Parameters (deterministic synthetic He init; convs are bias-free as in the module)
# ----------------------------------------------------------------------------
def init_params(in_channels, pool_sizes, seed=0):
    key = jax.random.PRNGKey(seed)
    n = len(pool_sizes)
    c_out = in_channels // n
    c_tot = in_channels + n * c_out
    keys = jax.random.split(key, n + 1)
    branch_w = [jax.random.normal(keys[j], (in_channels, c_out), jnp.float32)
                * float(np.sqrt(2.0 / in_channels)) for j in range(n)]
    bottleneck_w = (jax.random.normal(keys[n], (3, 3, c_tot, 512), jnp.float32)
                    * float(np.sqrt(2.0 / (9 * c_tot))))
    return {'branch_w': branch_w, 'bottleneck_w': bottleneck_w}


# ----------------------------------------------------------------------------
# Forward pass (NCHW in / NCHW out, matches the PyTorch module in eval mode)
# ----------------------------------------------------------------------------
def pyramid_pooling_forward(params, x_nchw, *, pool_sizes):
    B, C_in, H, W = x_nchw.shape
    n_pool = len(pool_sizes)
    C_out = C_in // n_pool
    HW = H * W

    x_nhwc = jnp.transpose(x_nchw, (0, 2, 3, 1)).astype(jnp.float32)
    x_flat = x_nhwc.reshape(B, HW, C_in)

    # fold pool / upsample operators into kron matrices (host-side constants)
    p_blocks, u_blocks, row_off = [], [], []
    off = 0
    for ps in pool_sizes:
        p_blocks.append(np.kron(adaptive_pool_matrix(ps, H), adaptive_pool_matrix(ps, W)))
        u_blocks.append(np.kron(bilinear_matrix(H, ps), bilinear_matrix(W, ps)))
        row_off.append(off)
        off += ps * ps
    Pp, Pp_p = off, _rup(off, 128)
    Cin_p = _rup(C_in, 128)
    N4, N4p = n_pool * C_out, _rup(n_pool * C_out, 128)

    P_all = np.zeros((Pp_p, HW), np.float32)
    P_all[:Pp] = np.concatenate(p_blocks, axis=0)
    U_cat = np.zeros((HW, Pp_p), np.float32)
    U_cat[:, :Pp] = np.concatenate(u_blocks, axis=1)
    mask = np.zeros((Pp_p, N4p), np.float32)
    for j, ps in enumerate(pool_sizes):
        mask[row_off[j]:row_off[j] + ps * ps, j * C_out:(j + 1) * C_out] = 1.0

    w1 = jnp.concatenate(params['branch_w'], axis=1) * BN_SCALE             # (C_in, N4)
    w1_wide = jnp.pad(w1, ((0, Cin_p - C_in), (0, N4p - N4))).astype(jnp.bfloat16)
    x_flat_p = jnp.pad(x_flat, ((0, 0), (0, 0), (0, Cin_p - C_in))).astype(jnp.bfloat16)

    up = pyramid_branches(jnp.asarray(P_all, jnp.bfloat16), x_flat_p, w1_wide,
                          jnp.asarray(mask, jnp.float32),
                          jnp.asarray(U_cat, jnp.bfloat16))
    up = up[:, :, :N4]                                          # (B, HW, n_pool*C_out)

    # concat [x | branches], pad channels, flatten padded spatial for the 3x3 conv
    Ct = C_in + N4
    Ct_p = _rup(Ct, 128)
    feats = jnp.concatenate([x_flat.astype(jnp.bfloat16), up], axis=-1)
    feats = jnp.pad(feats, ((0, 0), (0, 0), (0, Ct_p - Ct)))
    feats = feats.reshape(B, H, W, Ct_p)
    feats = jnp.pad(feats, ((0, 0), (1, 1), (1, 1), (0, 0)))    # conv padding = 1
    L = (H + 2) * (W + 2)
    Lp = _rup(L + 2, 8)                  # two extra zero rows keep every tap in-bounds
    feats = feats.reshape(B, L, Ct_p)
    feats = jnp.pad(feats, ((0, 0), (0, Lp - L), (0, 0)))

    wb = jnp.pad(params['bottleneck_w'], ((0, 0), (0, 0), (0, Ct_p - Ct), (0, 0)))
    wb = (wb * BN_SCALE).reshape(9, Ct_p, 512).astype(jnp.bfloat16)

    out = bottleneck_conv3x3(feats, wb, B=B, H=H, W=W)          # (B, H*(W+2), 512) f32
    out = out.reshape(B, H, W + 2, 512)[:, :, :W, :]            # drop over-computed cols
    # TODO(synk): Dropout2d(0.1) treated as identity (eval mode).
    return jnp.transpose(out, (0, 3, 1, 2))


# ----------------------------------------------------------------------------
# Pure-XLA reference (f32) used to sanity check the fused kernels
# ----------------------------------------------------------------------------
def reference_forward(params, x_nchw, *, pool_sizes):
    x = jnp.transpose(x_nchw, (0, 2, 3, 1)).astype(jnp.float32)
    B, H, W, C_in = x.shape
    feats = [x]
    for j, ps in enumerate(pool_sizes):
        Ph, Pw = adaptive_pool_matrix(ps, H), adaptive_pool_matrix(ps, W)
        pooled = jnp.einsum('ph,qw,bhwc->bpqc', Ph, Pw, x)
        z = jnp.maximum(jnp.einsum('bpqc,cd->bpqd', pooled,
                                   params['branch_w'][j]) * BN_SCALE, 0.0)
        Uh, Uw = bilinear_matrix(H, ps), bilinear_matrix(W, ps)
        feats.append(jnp.einsum('hp,wq,bpqd->bhwd', Uh, Uw, z))
    f = jnp.concatenate(feats, axis=-1)
    y = jax.lax.conv_general_dilated(
        f, params['bottleneck_w'] * BN_SCALE, window_strides=(1, 1), padding='SAME',
        dimension_numbers=('NHWC', 'HWIO', 'NHWC'))
    y = jnp.maximum(y, 0.0)
    return jnp.transpose(y, (0, 3, 1, 2))


if __name__ == "__main__":
    pool_sizes = (1, 2, 3, 6)
    B, C_in, H, W = 2, 64, 16, 16
    params = init_params(C_in, pool_sizes, seed=0)
    x = jax.random.normal(jax.random.PRNGKey(0), (B, C_in, H, W), jnp.float32)

    fwd = jax.jit(functools.partial(pyramid_pooling_forward, pool_sizes=pool_sizes))
    out = fwd(params, x)
    jax.block_until_ready(out)

    assert out.shape == (B, 512, H, W), out.shape
    assert bool(jnp.all(jnp.isfinite(out)))

    ref = jax.jit(functools.partial(reference_forward, pool_sizes=pool_sizes))(params, x)
    np.testing.assert_allclose(np.asarray(out, np.float32),
                               np.asarray(ref, np.float32), rtol=0.1, atol=0.1)
    print("KERNEL_OK")
</pallas_src>

<mosaic_0001>
module attributes {stable_mosaic.version = 11 : i64} {
  func.func @_pyramid_branch_kernel(%arg0: i32, %arg1: memref<128x256xbf16, #tpu.memory_space<vmem>>, %arg2: memref<1x256x128xbf16, #tpu.memory_space<vmem>>, %arg3: memref<128x128xbf16, #tpu.memory_space<vmem>>, %arg4: memref<128x128xf32, #tpu.memory_space<vmem>>, %arg5: memref<256x128xbf16, #tpu.memory_space<vmem>>, %arg6: memref<1x256x128xbf16, #tpu.memory_space<vmem>>) attributes {dimension_semantics = [#tpu.dimension_semantics<parallel>], iteration_bounds = array<i64: 2>, scalar_prefetch = 0 : i64, scratch_operands = 0 : i64, tpu.core_type = #tpu.core_type<tc>, window_params = [{pipeline_mode = #tpu.pipeline_mode<synchronous>, transform_indices = @transform_0, window_bounds = array<i64: 128, 256>}, {transform_indices = @transform_1, window_bounds = array<i64: 1, 256, 128>}, {pipeline_mode = #tpu.pipeline_mode<synchronous>, transform_indices = @transform_2, window_bounds = array<i64: 128, 128>}, {pipeline_mode = #tpu.pipeline_mode<synchronous>, transform_indices = @transform_3, window_bounds = array<i64: 128, 128>}, {pipeline_mode = #tpu.pipeline_mode<synchronous>, transform_indices = @transform_4, window_bounds = array<i64: 256, 128>}, {transform_indices = @transform_5, window_bounds = array<i64: 1, 256, 128>}]} {
    %c0 = arith.constant 0 : index
    %c0_0 = arith.constant 0 : index
    %c0_1 = arith.constant 0 : index
    %0 = vector.load %arg2[%c0, %c0_0, %c0_1] : memref<1x256x128xbf16, #tpu.memory_space<vmem>>, vector<1x256x128xbf16>
    %1 = vector.shape_cast %0 : vector<1x256x128xbf16> to vector<256x128xbf16>
    %c0_2 = arith.constant 0 : index
    %c0_3 = arith.constant 0 : index
    %2 = vector.load %arg1[%c0_2, %c0_3] : memref<128x256xbf16, #tpu.memory_space<vmem>>, vector<128x256xbf16>
    %cst = arith.constant dense<0.000000e+00> : vector<128x128xf32>
    %3 = tpu.matmul %2, %1, %cst {dimension_numbers = #tpu.dot_dimension_numbers<[1], [0], [0], [1], [0, 0, 1, 1], [], []>} : vector<128x256xbf16>, vector<256x128xbf16>, vector<128x128xf32> -> vector<128x128xf32>
    %4 = arith.truncf %3 : vector<128x128xf32> to vector<128x128xbf16>
    %c0_4 = arith.constant 0 : index
    %c0_5 = arith.constant 0 : index
    %5 = vector.load %arg3[%c0_4, %c0_5] : memref<128x128xbf16, #tpu.memory_space<vmem>>, vector<128x128xbf16>
    %cst_6 = arith.constant dense<0.000000e+00> : vector<128x128xf32>
    %6 = tpu.matmul %4, %5, %cst_6 {dimension_numbers = #tpu.dot_dimension_numbers<[1], [0], [0], [1], [0, 0, 1, 1], [], []>} : vector<128x128xbf16>, vector<128x128xbf16>, vector<128x128xf32> -> vector<128x128xf32>
    %cst_7 = arith.constant 0.000000e+00 : f32
    %7 = vector.broadcast %cst_7 : f32 to vector<128x128xf32>
    %8 = arith.maximumf %6, %7 : vector<128x128xf32>
    %c0_8 = arith.constant 0 : index
    %c0_9 = arith.constant 0 : index
    %9 = vector.load %arg4[%c0_8, %c0_9] : memref<128x128xf32, #tpu.memory_space<vmem>>, vector<128x128xf32>
    %10 = arith.mulf %8, %9 : vector<128x128xf32>
    %c0_10 = arith.constant 0 : index
    %c0_11 = arith.constant 0 : index
    %11 = vector.load %arg5[%c0_10, %c0_11] : memref<256x128xbf16, #tpu.memory_space<vmem>>, vector<256x128xbf16>
    %12 = arith.truncf %10 : vector<128x128xf32> to vector<128x128xbf16>
    %cst_12 = arith.constant dense<0.000000e+00> : vector<256x128xf32>
    %13 = tpu.matmul %11, %12, %cst_12 {dimension_numbers = #tpu.dot_dimension_numbers<[1], [0], [0], [1], [0, 0, 1, 1], [], []>} : vector<256x128xbf16>, vector<128x128xbf16>, vector<256x128xf32> -> vector<256x128xf32>
    %14 = arith.truncf %13 : vector<256x128xf32> to vector<256x128xbf16>
    %c0_13 = arith.constant 0 : index
    %c0_14 = arith.constant 0 : index
    %c0_15 = arith.constant 0 : index
    %15 = vector.load %arg6[%c0_13, %c0_14, %c0_15] : memref<1x256x128xbf16, #tpu.memory_space<vmem>>, vector<1x256x128xbf16>
    %16 = vector.shape_cast %15 : vector<1x256x128xbf16> to vector<256x128xbf16>
    %17 = vector.shape_cast %14 : vector<256x128xbf16> to vector<1x256x128xbf16>
    tpu.vector_store %arg6[%c0_13, %c0_14, %c0_15], %17 {strides = array<i32>} : memref<1x256x128xbf16, #tpu.memory_space<vmem>>, vector<1x256x128xbf16>,
    return
  }
  func.func @transform_0(%arg0: i32) -> (i32, i32) {
    %c0_i32 = arith.constant 0 : i32
    %c0_i32_0 = arith.constant 0 : i32
    %c0_i32_1 = arith.constant 0 : i32
    return %c0_i32, %c0_i32_0 : i32, i32
  }
  func.func @transform_1(%arg0: i32) -> (i32, i32, i32) {
    %c0_i32 = arith.constant 0 : i32
    %c0_i32_0 = arith.constant 0 : i32
    %c0_i32_1 = arith.constant 0 : i32
    return %arg0, %c0_i32, %c0_i32_0 : i32, i32, i32
  }
  func.func @transform_2(%arg0: i32) -> (i32, i32) {
    %c0_i32 = arith.constant 0 : i32
    %c0_i32_0 = arith.constant 0 : i32
    %c0_i32_1 = arith.constant 0 : i32
    return %c0_i32, %c0_i32_0 : i32, i32
  }
  func.func @transform_3(%arg0: i32) -> (i32, i32) {
    %c0_i32 = arith.constant 0 : i32
    %c0_i32_0 = arith.constant 0 : i32
    %c0_i32_1 = arith.constant 0 : i32
    return %c0_i32, %c0_i32_0 : i32, i32
  }
  func.func @transform_4(%arg0: i32) -> (i32, i32) {
    %c0_i32 = arith.constant 0 : i32
    %c0_i32_0 = arith.constant 0 : i32
    %c0_i32_1 = arith.constant 0 : i32
    return %c0_i32, %c0_i32_0 : i32, i32
  }
  func.func @transform_5(%arg0: i32) -> (i32, i32, i32) {
    %c0_i32 = arith.constant 0 : i32
    %c0_i32_0 = arith.constant 0 : i32
    %c0_i32_1 = arith.constant 0 : i32
    return %arg0, %c0_i32, %c0_i32_0 : i32, i32, i32
  }
}

module attributes {stable_mosaic.version = 11 : i64} {
  func.func @_bottleneck3x3_kernel(%arg0: i32, %arg1: i32, %arg2: memref<1x328x128xbf16, #tpu.memory_space<vmem>>, %arg3: memref<9x128x256xbf16, #tpu.memory_space<vmem>>, %arg4: memref<1x288x256xf32, #tpu.memory_space<vmem>>) attributes {dimension_semantics = [#tpu.dimension_semantics<parallel>, #tpu.dimension_semantics<parallel>], iteration_bounds = array<i64: 2, 2>, scalar_prefetch = 0 : i64, scratch_operands = 0 : i64, tpu.core_type = #tpu.core_type<tc>, window_params = [{transform_indices = @transform_0, window_bounds = array<i64: 1, 328, 128>}, {transform_indices = @transform_1, window_bounds = array<i64: 9, 128, 256>}, {transform_indices = @transform_2, window_bounds = array<i64: 1, 288, 256>}]} {
    %cst = arith.constant 0.000000e+00 : f32
    %0 = vector.broadcast %cst : f32 to vector<288x256xf32>
    %c0 = arith.constant 0 : index
    %c0_0 = arith.constant 0 : index
    %c0_1 = arith.constant 0 : index
    %1 = vector.load %arg2[%c0, %c0_0, %c0_1] : memref<1x328x128xbf16, #tpu.memory_space<vmem>>, vector<1x288x128xbf16>
    %2 = vector.shape_cast %1 : vector<1x288x128xbf16> to vector<288x128xbf16>
    %c0_2 = arith.constant 0 : index
    %c0_3 = arith.constant 0 : index
    %c0_4 = arith.constant 0 : index
    %3 = vector.load %arg3[%c0_2, %c0_3, %c0_4] : memref<9x128x256xbf16, #tpu.memory_space<vmem>>, vector<1x128x256xbf16>
    %4 = vector.shape_cast %3 : vector<1x128x256xbf16> to vector<128x256xbf16>
    %cst_5 = arith.constant dense<0.000000e+00> : vector<288x256xf32>
    %5 = tpu.matmul %2, %4, %cst_5 {dimension_numbers = #tpu.dot_dimension_numbers<[1], [0], [0], [1], [0, 0, 1, 1], [], []>} : vector<288x128xbf16>, vector<128x256xbf16>, vector<288x256xf32> -> vector<288x256xf32>
    %6 = arith.addf %0, %5 : vector<288x256xf32>
    %c0_6 = arith.constant 0 : index
    %c1 = arith.constant 1 : index
    %c0_7 = arith.constant 0 : index
    %7 = vector.load %arg2[%c0_6, %c1, %c0_7] : memref<1x328x128xbf16, #tpu.memory_space<vmem>>, vector<1x288x128xbf16>
    %8 = vector.shape_cast %7 : vector<1x288x128xbf16> to vector<288x128xbf16>
    %c1_8 = arith.constant 1 : index
    %c0_9 = arith.constant 0 : index
    %c0_10 = arith.constant 0 : index
    %9 = vector.load %arg3[%c1_8, %c0_9, %c0_10] : memref<9x128x256xbf16, #tpu.memory_space<vmem>>, vector<1x128x256xbf16>
    %10 = vector.shape_cast %9 : vector<1x128x256xbf16> to vector<128x256xbf16>
    %cst_11 = arith.constant dense<0.000000e+00> : vector<288x256xf32>
    %11 = tpu.matmul %8, %10, %cst_11 {dimension_numbers = #tpu.dot_dimension_numbers<[1], [0], [0], [1], [0, 0, 1, 1], [], []>} : vector<288x128xbf16>, vector<128x256xbf16>, vector<288x256xf32> -> vector<288x256xf32>
    %12 = arith.addf %6, %11 : vector<288x256xf32>
    %c0_12 = arith.constant 0 : index
    %c2 = arith.constant 2 : index
    %c0_13 = arith.constant 0 : index
    %13 = vector.load %arg2[%c0_12, %c2, %c0_13] : memref<1x328x128xbf16, #tpu.memory_space<vmem>>, vector<1x288x128xbf16>
    %14 = vector.shape_cast %13 : vector<1x288x128xbf16> to vector<288x128xbf16>
    %c2_14 = arith.constant 2 : index
    %c0_15 = arith.constant 0 : index
    %c0_16 = arith.constant 0 : index
    %15 = vector.load %arg3[%c2_14, %c0_15, %c0_16] : memref<9x128x256xbf16, #tpu.memory_space<vmem>>, vector<1x128x256xbf16>
    %16 = vector.shape_cast %15 : vector<1x128x256xbf16> to vector<128x256xbf16>
    %cst_17 = arith.constant dense<0.000000e+00> : vector<288x256xf32>
    %17 = tpu.matmul %14, %16, %cst_17 {dimension_numbers = #tpu.dot_dimension_numbers<[1], [0], [0], [1], [0, 0, 1, 1], [], []>} : vector<288x128xbf16>, vector<128x256xbf16>, vector<288x256xf32> -> vector<288x256xf32>
    %18 = arith.addf %12, %17 : vector<288x256xf32>
    %c0_18 = arith.constant 0 : index
    %c18 = arith.constant 18 : index
    %c0_19 = arith.constant 0 : index
    %19 = vector.load %arg2[%c0_18, %c18, %c0_19] : memref<1x328x128xbf16, #tpu.memory_space<vmem>>, vector<1x288x128xbf16>
    %20 = vector.shape_cast %19 : vector<1x288x128xbf16> to vector<288x128xbf16>
    %c3 = arith.constant 3 : index
    %c0_20 = arith.constant 0 : index
    %c0_21 = arith.constant 0 : index
    %21 = vector.load %arg3[%c3, %c0_20, %c0_21] : memref<9x128x256xbf16, #tpu.memory_space<vmem>>, vector<1x128x256xbf16>
    %22 = vector.shape_cast %21 : vector<1x128x256xbf16> to vector<128x256xbf16>
    %cst_22 = arith.constant dense<0.000000e+00> : vector<288x256xf32>
    %23 = tpu.matmul %20, %22, %cst_22 {dimension_numbers = #tpu.dot_dimension_numbers<[1], [0], [0], [1], [0, 0, 1, 1], [], []>} : vector<288x128xbf16>, vector<128x256xbf16>, vector<288x256xf32> -> vector<288x256xf32>
    %24 = arith.addf %18, %23 : vector<288x256xf32>
    %c0_23 = arith.constant 0 : index
    %c19 = arith.constant 19 : index
    %c0_24 = arith.constant 0 : index
    %25 = vector.load %arg2[%c0_23, %c19, %c0_24] : memref<1x328x128xbf16, #tpu.memory_space<vmem>>, vector<1x288x128xbf16>
    %26 = vector.shape_cast %25 : vector<1x288x128xbf16> to vector<288x128xbf16>
    %c4 = arith.constant 4 : index
    %c0_25 = arith.constant 0 : index
    %c0_26 = arith.constant 0 : index
    %27 = vector.load %arg3[%c4, %c0_25, %c0_26] : memref<9x128x256xbf16, #tpu.memory_space<vmem>>, vector<1x128x256xbf16>
    %28 = vector.shape_cast %27 : vector<1x128x256xbf16> to vector<128x256xbf16>
    %cst_27 = arith.constant dense<0.000000e+00> : vector<288x256xf32>
    %29 = tpu.matmul %26, %28, %cst_27 {dimension_numbers = #tpu.dot_dimension_numbers<[1], [0], [0], [1], [0, 0, 1, 1], [], []>} : vector<288x128xbf16>, vector<128x256xbf16>, vector<288x256xf32> -> vector<288x256xf32>
    %30 = arith.addf %24, %29 : vector<288x256xf32>
    %c0_28 = arith.constant 0 : index
    %c20 = arith.constant 20 : index
    %c0_29 = arith.constant 0 : index
    %31 = vector.load %arg2[%c0_28, %c20, %c0_29] : memref<1x328x128xbf16, #tpu.memory_space<vmem>>, vector<1x288x128xbf16>
    %32 = vector.shape_cast %31 : vector<1x288x128xbf16> to vector<288x128xbf16>
    %c5 = arith.constant 5 : index
    %c0_30 = arith.constant 0 : index
    %c0_31 = arith.constant 0 : index
    %33 = vector.load %arg3[%c5, %c0_30, %c0_31] : memref<9x128x256xbf16, #tpu.memory_space<vmem>>, vector<1x128x256xbf16>
    %34 = vector.shape_cast %33 : vector<1x128x256xbf16> to vector<128x256xbf16>
    %cst_32 = arith.constant dense<0.000000e+00> : vector<288x256xf32>
    %35 = tpu.matmul %32, %34, %cst_32 {dimension_numbers = #tpu.dot_dimension_numbers<[1], [0], [0], [1], [0, 0, 1, 1], [], []>} : vector<288x128xbf16>, vector<128x256xbf16>, vector<288x256xf32> -> vector<288x256xf32>
    %36 = arith.addf %30, %35 : vector<288x256xf32>
    %c0_33 = arith.constant 0 : index
    %c36 = arith.constant 36 : index
    %c0_34 = arith.constant 0 : index
    %37 = vector.load %arg2[%c0_33, %c36, %c0_34] : memref<1x328x128xbf16, #tpu.memory_space<vmem>>, vector<1x288x128xbf16>
    %38 = vector.shape_cast %37 : vector<1x288x128xbf16> to vector<288x128xbf16>
    %c6 = arith.constant 6 : index
    %c0_35 = arith.constant 0 : index
    %c0_36 = arith.constant 0 : index
    %39 = vector.load %arg3[%c6, %c0_35, %c0_36] : memref<9x128x256xbf16, #tpu.memory_space<vmem>>, vector<1x128x256xbf16>
    %40 = vector.shape_cast %39 : vector<1x128x256xbf16> to vector<128x256xbf16>
    %cst_37 = arith.constant dense<0.000000e+00> : vector<288x256xf32>
    %41 = tpu.matmul %38, %40, %cst_37 {dimension_numbers = #tpu.dot_dimension_numbers<[1], [0], [0], [1], [0, 0, 1, 1], [], []>} : vector<288x128xbf16>, vector<128x256xbf16>, vector<288x256xf32> -> vector<288x256xf32>
    %42 = arith.addf %36, %41 : vector<288x256xf32>
    %c0_38 = arith.constant 0 : index
    %c37 = arith.constant 37 : index
    %c0_39 = arith.constant 0 : index
    %43 = vector.load %arg2[%c0_38, %c37, %c0_39] : memref<1x328x128xbf16, #tpu.memory_space<vmem>>, vector<1x288x128xbf16>
    %44 = vector.shape_cast %43 : vector<1x288x128xbf16> to vector<288x128xbf16>
    %c7 = arith.constant 7 : index
    %c0_40 = arith.constant 0 : index
    %c0_41 = arith.constant 0 : index
    %45 = vector.load %arg3[%c7, %c0_40, %c0_41] : memref<9x128x256xbf16, #tpu.memory_space<vmem>>, vector<1x128x256xbf16>
    %46 = vector.shape_cast %45 : vector<1x128x256xbf16> to vector<128x256xbf16>
    %cst_42 = arith.constant dense<0.000000e+00> : vector<288x256xf32>
    %47 = tpu.matmul %44, %46, %cst_42 {dimension_numbers = #tpu.dot_dimension_numbers<[1], [0], [0], [1], [0, 0, 1, 1], [], []>} : vector<288x128xbf16>, vector<128x256xbf16>, vector<288x256xf32> -> vector<288x256xf32>
    %48 = arith.addf %42, %47 : vector<288x256xf32>
    %c0_43 = arith.constant 0 : index
    %c38 = arith.constant 38 : index
    %c0_44 = arith.constant 0 : index
    %49 = vector.load %arg2[%c0_43, %c38, %c0_44] : memref<1x328x128xbf16, #tpu.memory_space<vmem>>, vector<1x288x128xbf16>
    %50 = vector.shape_cast %49 : vector<1x288x128xbf16> to vector<288x128xbf16>
    %c8 = arith.constant 8 : index
    %c0_45 = arith.constant 0 : index
    %c0_46 = arith.constant 0 : index
    %51 = vector.load %arg3[%c8, %c0_45, %c0_46] : memref<9x128x256xbf16, #tpu.memory_space<vmem>>, vector<1x128x256xbf16>
    %52 = vector.shape_cast %51 : vector<1x128x256xbf16> to vector<128x256xbf16>
    %cst_47 = arith.constant dense<0.000000e+00> : vector<288x256xf32>
    %53 = tpu.matmul %50, %52, %cst_47 {dimension_numbers = #tpu.dot_dimension_numbers<[1], [0], [0], [1], [0, 0, 1, 1], [], []>} : vector<288x128xbf16>, vector<128x256xbf16>, vector<288x256xf32> -> vector<288x256xf32>
    %54 = arith.addf %48, %53 : vector<288x256xf32>
    %cst_48 = arith.constant 0.000000e+00 : f32
    %55 = vector.broadcast %cst_48 : f32 to vector<288x256xf32>
    %56 = arith.maximumf %54, %55 : vector<288x256xf32>
    %c0_49 = arith.constant 0 : index
    %c0_50 = arith.constant 0 : index
    %c0_51 = arith.constant 0 : index
    %57 = vector.load %arg4[%c0_49, %c0_50, %c0_51] : memref<1x288x256xf32, #tpu.memory_space<vmem>>, vector<1x288x256xf32>
    %58 = vector.shape_cast %57 : vector<1x288x256xf32> to vector<288x256xf32>
    %59 = vector.shape_cast %56 : vector<288x256xf32> to vector<1x288x256xf32>
    tpu.vector_store %arg4[%c0_49, %c0_50, %c0_51], %59 {strides = array<i32>} : memref<1x288x256xf32, #tpu.memory_space<vmem>>, vector<1x288x256xf32>,
    return
  }
  func.func @transform_0(%arg0: i32, %arg1: i32) -> (i32, i32, i32) {
    %c0_i32 = arith.constant 0 : i32
    %c0_i32_0 = arith.constant 0 : i32
    %c0_i32_1 = arith.constant 0 : i32
    return %arg0, %c0_i32, %c0_i32_0 : i32, i32, i32
  }
  func.func @transform_1(%arg0: i32, %arg1: i32) -> (i32, i32, i32) {
    %c0_i32 = arith.constant 0 : i32
    %c0_i32_0 = arith.constant 0 : i32
    %c0_i32_1 = arith.constant 0 : i32
    return %c0_i32, %c0_i32_0, %arg1 : i32, i32, i32
  }
  func.func @transform_2(%arg0: i32, %arg1: i32) -> (i32, i32, i32) {
    %c0_i32 = arith.constant 0 : i32
    %c0_i32_0 = arith.constant 0 : i32
    return %arg0, %c0_i32, %arg1 : i32, i32, i32
  }
}

</mosaic_0001>

<bundles_post_ra>
// kernel: pyramid_pooling_forward.2
= control target key start
LH: loop header
LB: loop body
LE: loop exit
PB: predicated region body
PF: predicated region fallthrough
CT: control target
= control target key end

     0   :  { %s1814_s18 = smov 0   ;;  %s2042_s0 = inlined_call_operand.vmem [shape: bf16[128,256], index: 0, kind: input, shape index: {}]   ;;  %s2043_s1 = inlined_call_operand.vmem [shape: bf16[2,256,128], index: 1, kind: input, shape index: {}]   ;;  %s2044_s2 = inlined_call_operand.vmem [shape: bf16[128,128], index: 2, kind: input, shape index: {}]   ;;  %s2045_s3 = inlined_call_operand.vmem [shape: f32[128,128], index: 3, kind: input, shape index: {}]   ;;  %s2046_s4 = inlined_call_operand.vmem [shape: bf16[256,128], index: 4, kind: input, shape index: {}]   ;;  %s2047_s5 = inlined_call_operand.vmem [shape: bf16[2,256,128], index: 5, kind: output, shape index: {}]  }
   0x1 LB: > { %s1276_s19 = sadd.s32 4294967295, %s1782_s18   ;;  %p1280_p0 = scmp.ge.s32.totalorder %s1782_s18, 1  ;;  %s1782_s18 = sphi %s1814_s18, %s15_s18  }
   0x2   : > { %p187_p1 = scmp.lt.s32.totalorder %s1782_s18, 3 }
   0x4   : > { %p188_p2 = pnand %p1280_p0, %p187_p1 }
   0x5   : > { %p215_p3 = scmp.lt.s32.totalorder (!%p188_p2), %s1276_s19, 1  ;;  %v1730_v0 = vld [vmem:[%s2042_s0 + $0x4] ss:$8 sps:$4 sm:$0xff] (!%p188_p2)   ;;  %v1754_v18 = vld [vmem:[%s2044_s2 + $0x10] sm:$0xff] (!%p188_p2)   ;;  %v1755_v20 = vld [vmem:[%s2044_s2 + $0x18] sm:$0xff] (!%p188_p2)  }
   0x6   : > { %191 = sbr.rel (%p188_p2) target bundleno = 811 (0x32b), region = 40  ;;  %482 = vmatprep.mubr.bf16.mxu0 (!%p188_p2), %v1730_v0  ;;  %v1752_v15 = vld [vmem:[%s2044_s2] sm:$0xff] (!%p188_p2)   ;;  %v1753_v16 = vld [vmem:[%s2044_s2 + $0x8] sm:$0xff] (!%p188_p2)   ;;  %v1731_v22 = vld [vmem:[%s2042_s0 + $0x14] ss:$8 sps:$4 sm:$0xff] (!%p188_p2)  }
   0x7   : > { %1608 = vmatprep.subr.bf16.mxu1 (!%p188_p2), %v1752_v15  ;;  %v1728_v21 = vld [vmem:[%s2042_s0] ss:$8 sps:$4 sm:$0xff] (!%p188_p2)   ;;  %v1733_v23 = vld [vmem:[%s2042_s0 + $0x10] ss:$8 sps:$4 sm:$0xff] (!%p188_p2)   ;;  %v1734_v24 = vld [vmem:[%s2042_s0 + $0x24] ss:$8 sps:$4 sm:$0xff] (!%p188_p2)  }
   0x8   : > { %1609 = vmatpush3.bf16.msra.mxu1 (!%p188_p2), %v1752_v15  ;;  %v1736_v25 = vld [vmem:[%s2042_s0 + $0x20] ss:$8 sps:$4 sm:$0xff] (!%p188_p2)   ;;  %v1737_v26 = vld [vmem:[%s2042_s0 + $0x34] ss:$8 sps:$4 sm:$0xff] (!%p188_p2)   ;;  %v1739_v27 = vld [vmem:[%s2042_s0 + $0x30] ss:$8 sps:$4 sm:$0xff] (!%p188_p2)  }
   0x9   : > { %1610 = vmatprep.subr.bf16.mxu1 (!%p188_p2), %v1753_v16  ;;  %v1740_v28 = vld [vmem:[%s2042_s0 + $0x44] ss:$8 sps:$4 sm:$0xff] (!%p188_p2)   ;;  %v1742_v29 = vld [vmem:[%s2042_s0 + $0x40] ss:$8 sps:$4 sm:$0xff] (!%p188_p2)   ;;  %v1743_v30 = vld [vmem:[%s2042_s0 + $0x54] ss:$8 sps:$4 sm:$0xff] (!%p188_p2)  }
   0xa   : > { %v1745_v31 = vld [vmem:[%s2042_s0 + $0x50] ss:$8 sps:$4 sm:$0xff] (!%p188_p2)   ;;  %v1746_v32 = vld [vmem:[%s2042_s0 + $0x64] ss:$8 sps:$4 sm:$0xff] (!%p188_p2)   ;;  %v1748_v33 = vld [vmem:[%s2042_s0 + $0x60] ss:$8 sps:$4 sm:$0xff] (!%p188_p2)  }
   0xb   : > { %v1749_v34 = vld [vmem:[%s2042_s0 + $0x74] ss:$8 sps:$4 sm:$0xff] (!%p188_p2)   ;;  %v1751_v35 = vld [vmem:[%s2042_s0 + $0x70] ss:$8 sps:$4 sm:$0xff] (!%p188_p2)   ;;  %v1756_v36 = vld [vmem:[%s2044_s2 + $0x20] sm:$0xff] (!%p188_p2)  }
   0xc   : > { %1611 = vmatpush3.bf16.msra.mxu1 (!%p188_p2), %v1753_v16  ;;  %v1757_v37 = vld [vmem:[%s2044_s2 + $0x28] sm:$0xff] (!%p188_p2)   ;;  %v1758_v38 = vld [vmem:[%s2044_s2 + $0x30] sm:$0xff] (!%p188_p2)   ;;  %v1759_v39 = vld [vmem:[%s2044_s2 + $0x38] sm:$0xff] (!%p188_p2)  }
   0xd   : > { %s2049_s19 = smov (!%p215_p3, %s1276_s19), 1  ;;  %1612 = vmatprep.subr.bf16.mxu1 %v1754_v18 }
   0xe   : > { %s1375_s22 = sshll.u32 %s2049_s19, 7 }
   0xf   : > { %s1833_s25 = scalar_lea.vmem %s2043_s1, %s1375_s22  ;;  %s2021_s28 = scalar_lea.vmem %s2047_s5, %s1375_s22 }
  0x10   : > { %v1712_v1 = vld [vmem:[%s1833_s25 + $0x40] sm:$0xff]   ;;  %v1714_v3 = vld [vmem:[%s1833_s25 + $0x48] sm:$0xff]   ;;  %v1716_v5 = vld [vmem:[%s1833_s25 + $0x50] sm:$0xff]   ;;  %1613 = vmatpush3.bf16.msra.mxu1 %v1754_v18 }
  0x11   : > { %v1713_v2 = vld [vmem:[%s1833_s25] sm:$0xff]   ;;  %1504 = vmatprep.subr.bf16.mxu0 %v1712_v1  ;;  %v1715_v4 = vld [vmem:[%s1833_s25 + $0x8] sm:$0xff]   ;;  %v1717_v6 = vld [vmem:[%s1833_s25 + $0x10] sm:$0xff]   ;;  %1614 = vmatprep.subr.bf16.mxu1 %v1755_v20 }
  0x12   : > { %1505 = vmatpush3.bf16.msra.mxu0 %v1713_v2  ;;  %v1718_v7 = vld [vmem:[%s1833_s25 + $0x58] sm:$0xff]   ;;  %v1720_v9 = vld [vmem:[%s1833_s25 + $0x60] sm:$0xff]   ;;  %v1722_v11 = vld [vmem:[%s1833_s25 + $0x68] sm:$0xff]  }
  0x13   : > { %1506 = vmatprep.subr.bf16.mxu0 %v1714_v3  ;;  %v1719_v8 = vld [vmem:[%s1833_s25 + $0x18] sm:$0xff]   ;;  %v1721_v10 = vld [vmem:[%s1833_s25 + $0x20] sm:$0xff]   ;;  %v1723_v12 = vld [vmem:[%s1833_s25 + $0x28] sm:$0xff]  }
  0x14   : > { %v1724_v13 = vld [vmem:[%s1833_s25 + $0x70] sm:$0xff]   ;;  %v1726_v17 = vld [vmem:[%s1833_s25 + $0x78] sm:$0xff]   ;;  %1615 = vmatpush3.bf16.msra.mxu1 %v1755_v20 }
  0x15   : > { %v1725_v14 = vld [vmem:[%s1833_s25 + $0x30] sm:$0xff]   ;;  %v1727_v19 = vld [vmem:[%s1833_s25 + $0x38] sm:$0xff]   ;;  %1616 = vmatprep.subr.bf16.mxu1 %v1756_v36 }
  0x16   : > { %1507 = vmatpush3.bf16.msra.mxu0 %v1715_v4 }
  0x17   : > { %1508 = vmatprep.subr.bf16.mxu0 %v1716_v5 }
  0x18   : > { %1617 = vmatpush3.bf16.msra.mxu1 %v1756_v36 }
  0x19   : > { %1618 = vmatprep.subr.bf16.mxu1 %v1757_v37 }
  0x1a   : > { %1509 = vmatpush3.bf16.msra.mxu0 %v1717_v6 }
  0x1b   : > { %1510 = vmatprep.subr.bf16.mxu0 %v1718_v7 }
  0x1c   : > { %1619 = vmatpush3.bf16.msra.mxu1 %v1757_v37  ;;  %v734_v37 = vld [vmem:[%s2045_s3 + $0x10] sm:$0xff] }
  0x1d   : > { %1620 = vmatprep.subr.bf16.mxu1 %v1758_v38 }
  0x1e   : > { %1511 = vmatpush3.bf16.msra.mxu0 %v1719_v8 }
  0x1f   : > { %1512 = vmatprep.subr.bf16.mxu0 %v1720_v9 }
  0x20   : > { %1621 = vmatpush3.bf16.msra.mxu1 %v1758_v38 }
  0x21   : > { %1622 = vmatprep.subr.bf16.mxu1 %v1759_v39 }
  0x22   : > { %1513 = vmatpush3.bf16.msra.mxu0 %v1721_v10 }
  0x23   : > { %1514 = vmatprep.subr.bf16.mxu0 %v1722_v11 }
  0x24   : > { %1623 = vmatpush3.bf16.msra.mxu1 %v1759_v39 }
  0x26   : > { %1515 = vmatpush3.bf16.msra.mxu0 %v1723_v12 }
  0x27   : > { %1516 = vmatprep.subr.bf16.mxu0 %v1724_v13 }
  0x2a   : > { %1517 = vmatpush3.bf16.msra.mxu0 %v1725_v14 }
  0x2b   : > { %1518 = vmatprep.subr.bf16.mxu0 %v1726_v17 }
  0x2e   : > { %1519 = vmatpush3.bf16.msra.mxu0 %v1727_v19 }
  0x31   : > { %483 = vmatmul.mubr.bf16.vlgmr.msra.gmra.mrb[0].mxu0 %v1728_v21 }
  0x32   : > { %490 = vmatprep.mubr.bf16.mxu0 %v1731_v22 }
  0x39   : > { %491 = vmatmul.mubr.bf16.gmra.mrb[4].mxu0 %v1733_v23 }
  0x3a   : > { %498 = vmatprep.mubr.bf16.mxu0 %v1734_v24 }
  0x41   : > { %499 = vmatmul.mubr.bf16.gmra.mrb[8].mxu0 %v1736_v25 }
  0x42   : > { %506 = vmatprep.mubr.bf16.mxu0 %v1737_v26 }
  0x49   : > { %507 = vmatmul.mubr.bf16.gmra.mrb[12].mxu0 %v1739_v27 }
  0x4a   : > { %514 = vmatprep.mubr.bf16.mxu0 %v1740_v28 }
  0x51   : > { %515 = vmatmul.mubr.bf16.gmra.mrb[16].mxu0 %v1742_v29 }
  0x52   : > { %522 = vmatprep.mubr.bf16.mxu0 %v1743_v30 }
  0x59   : > { %523 = vmatmul.mubr.bf16.gmra.mrb[20].mxu0 %v1745_v31 }
  0x5a   : > { %530 = vmatprep.mubr.bf16.mxu0 %v1746_v32  ;;  %v1760_v32 = vld [vmem:[%s2046_s4 + $0x20] sm:$0xff]  }
  0x61   : > { %531 = vmatmul.mubr.bf16.gmra.mrb[24].mxu0 %v1748_v33  ;;  %v1768_v33 = vld [vmem:[%s2046_s4] sm:$0xff]  }
  0x62   : > { %538 = vmatprep.mubr.bf16.mxu0 %v1749_v34 }
  0x69   : > { %539 = vmatmul.mubr.bf16.gmra.mrb[28].mxu0 %v1751_v35 }
  0x6a   : > { %1656 = vmatprep.mubr.bf16.mxu0 %v1768_v33 }
 0x104   : > { %v1520_v40 = vpop.f32.mrb[0].mxu0 }
 0x105   : > { %v1521_v41 = vpop.f32.mrb[1].mxu0 }
 0x106   : > { %v1522_v42 = vadd.f32 %v1521_v41, %v1520_v40  ;;  %v1523_v43 = vpop.f32.mrb[2].mxu0  ;;  %v735_v40 = vld [vmem:[%s2045_s3 + $0x18] sm:$0xff]  ;;  %v732_v41 = vld [vmem:[%s2045_s3] sm:$0xff] }
 0x107   : > { %v1524_v44 = vpop.f32.mrb[3].mxu0 }
 0x108   : > { %v1525_v45 = vadd.f32 %v1524_v44, %v1523_v43  ;;  %v733_v44 = vld [vmem:[%s2045_s3 + $0x8] sm:$0xff] }
 0x10a   : > { %v547_v46 = vpack.c.bf16 %v1525_v45, %v1522_v42 }
 0x10c   : > { %v1526_v47 = vpop.f32.mrb[4].mxu0  ;;  %1624 = vmatprep.mubr.bf16.mxu1 %v547_v46 }
 0x10d   : > { %v1527_v48 = vpop.f32.mrb[5].mxu0 }
 0x10e   : > { %v1528_v49 = vadd.f32 %v1527_v48, %v1526_v47  ;;  %v1529_v50 = vpop.f32.mrb[6].mxu0 }
 0x10f   : > { %v1530_v51 = vpop.f32.mrb[7].mxu0 }
 0x110   : > { %v1531_v52 = vadd.f32 %v1530_v51, %v1529_v50 }
 0x112   : > { %v548_v53 = vpack.c.bf16 %v1531_v52, %v1528_v49 }
 0x114   : > { %v1532_v54 = vpop.f32.mrb[8].mxu0  ;;  %1625 = vmatmul.mubr.bf16.vlgmr.msra.gmra.mrb[0].mxu1 %v548_v53 }
 0x115   : > { %v1533_v55 = vpop.f32.mrb[9].mxu0 }
 0x116   : > { %v1534_v56 = vadd.f32 %v1533_v55, %v1532_v54  ;;  %v1535_v57 = vpop.f32.mrb[10].mxu0  ;;  %v738_v55 = vld [vmem:[%s2045_s3 + $0x30] sm:$0xff] }
 0x117   : > { %v1536_v58 = vpop.f32.mrb[11].mxu0 }
 0x118   : > { %v1537_v59 = vadd.f32 %v1536_v58, %v1535_v57  ;;  %v739_v58 = vld [vmem:[%s2045_s3 + $0x38] sm:$0xff] }
 0x11a   : > { %v549_v60 = vpack.c.bf16 %v1537_v59, %v1534_v56  ;;  %v736_v59 = vld [vmem:[%s2045_s3 + $0x20] sm:$0xff] }
 0x11c   : > { %v1538_v61 = vpop.f32.mrb[12].mxu0  ;;  %1628 = vmatprep.mubr.bf16.mxu1 %v549_v60 }
 0x11d   : > { %v1539_v62 = vpop.f32.mrb[13].mxu0 }
 0x11e   : > { %v1540_v63 = vadd.f32 %v1539_v62, %v1538_v61  ;;  %v1541_v0 = vpop.f32.mrb[14].mxu0  ;;  %v737_v62 = vld [vmem:[%s2045_s3 + $0x28] sm:$0xff] }
 0x11f   : > { %v1542_v1 = vpop.f32.mrb[15].mxu0 }
 0x120   : > { %v1543_v2 = vadd.f32 %v1542_v1, %v1541_v0 }
 0x122   : > { %v550_v3 = vpack.c.bf16 %v1543_v2, %v1540_v63 }
 0x124   : > { %v1544_v4 = vpop.f32.mrb[16].mxu0  ;;  %1629 = vmatmul.mubr.bf16.gmra.mrb[4].mxu1 %v550_v3 }
 0x125   : > { %v1545_v5 = vpop.f32.mrb[17].mxu0 }
 0x126   : > { %v1546_v6 = vadd.f32 %v1545_v5, %v1544_v4  ;;  %v1547_v7 = vpop.f32.mrb[18].mxu0 }
 0x127   : > { %v1548_v8 = vpop.f32.mrb[19].mxu0 }
 0x128   : > { %v1549_v9 = vadd.f32 %v1548_v8, %v1547_v7 }
 0x12a   : > { %v551_v10 = vpack.c.bf16 %v1549_v9, %v1546_v6  ;;  %v742_v9 = vld [vmem:[%s2045_s3 + $0x50] sm:$0xff] }
 0x12c   : > { %v1550_v11 = vpop.f32.mrb[20].mxu0  ;;  %1632 = vmatprep.mubr.bf16.mxu1 %v551_v10 }
 0x12d   : > { %v1551_v12 = vpop.f32.mrb[21].mxu0 }
 0x12e   : > { %v1552_v13 = vadd.f32 %v1551_v12, %v1550_v11  ;;  %v1553_v14 = vpop.f32.mrb[22].mxu0  ;;  %v743_v12 = vld [vmem:[%s2045_s3 + $0x58] sm:$0xff] }
 0x12f   : > { %v1554_v15 = vpop.f32.mrb[23].mxu0 }
 0x130   : > { %v1555_v16 = vadd.f32 %v1554_v15, %v1553_v14 }
 0x132   : > { %v552_v17 = vpack.c.bf16 %v1555_v16, %v1552_v13  ;;  %v740_v13 = vld [vmem:[%s2045_s3 + $0x40] sm:$0xff]  ;;  %v741_v16 = vld [vmem:[%s2045_s3 + $0x48] sm:$0xff] }
 0x134   : > { %v1556_v18 = vpop.f32.mrb[24].mxu0  ;;  %1633 = vmatmul.mubr.bf16.gmra.mrb[8].mxu1 %v552_v17 }
 0x135   : > { %v1557_v19 = vpop.f32.mrb[25].mxu0 }
 0x136   : > { %v1558_v20 = vadd.f32 %v1557_v19, %v1556_v18  ;;  %v1559_v21 = vpop.f32.mrb[26].mxu0 }
 0x137   : > { %v1560_v22 = vpop.f32.mrb[27].mxu0 }
 0x138   : > { %v1561_v23 = vadd.f32 %v1560_v22, %v1559_v21 }
 0x13a   : > { %v553_v24 = vpack.c.bf16 %v1561_v23, %v1558_v20 }
 0x13c   : > { %v1562_v25 = vpop.f32.mrb[28].mxu0  ;;  %1636 = vmatprep.mubr.bf16.mxu1 %v553_v24 }
 0x13d   : > { %v1563_v26 = vpop.f32.mrb[29].mxu0 }
 0x13e   : > { %v1564_v27 = vadd.f32 %v1563_v26, %v1562_v25  ;;  %v1565_v28 = vpop.f32.mrb[30].mxu0 }
 0x13f   : > { %v1566_v29 = vpop.f32.mrb[31].mxu0 }
 0x140   : > { %v1567_v30 = vadd.f32 %v1566_v29, %v1565_v28 }
 0x142   : > { %v554_v31 = vpack.c.bf16 %v1567_v30, %v1564_v27  ;;  %v746_v27 = vld [vmem:[%s2045_s3 + $0x70] sm:$0xff]  ;;  %v747_v30 = vld [vmem:[%s2045_s3 + $0x78] sm:$0xff] }
 0x144   : > { %1637 = vmatmul.mubr.bf16.gmra.mrb[12].mxu1 %v554_v31  ;;  %v744_v31 = vld [vmem:[%s2045_s3 + $0x60] sm:$0xff] }
 0x145   : > { %1664 = vmatprep.mubr.bf16.mxu1 %v1760_v32 }
 0x1e7   : > { %v1626_v34 = vpop.f32.mrb[0].mxu1 }
 0x1e8   : > { %v718_v35 = vmax.f32 %v1626_v34, 0.0  ;;  %v653_v36 = vpop.f32.mrb[1].mxu1  ;;  %v745_v34 = vld [vmem:[%s2045_s3 + $0x68] sm:$0xff] }
 0x1e9   : > { %v716_v38 = vmax.f32 %v653_v36, 0.0  ;;  %v1627_v39 = vpop.f32.mrb[2].mxu1 }
 0x1ea   : > { %v719_v42 = vmax.f32 %v1627_v39, 0.0  ;;  %v656_v43 = vpop.f32.mrb[3].mxu1  ;;  %v750_v46 = vmul.f32 %v734_v37, %v718_v35 }
 0x1eb   : > { %v717_v45 = vmax.f32 %v656_v43, 0.0  ;;  %v748_v48 = vmul.f32 %v732_v41, %v716_v38  ;;  %v1769_v43 = vld [vmem:[%s2046_s4 + $0x8] sm:$0xff]  }
 0x1ec   : > { %v751_v47 = vmul.f32 %v735_v40, %v719_v42  ;;  %v1761_v42 = vld [vmem:[%s2046_s4 + $0x28] sm:$0xff]  }
 0x1ed   : > { %v749_v49 = vmul.f32 %v733_v44, %v717_v45  ;;  %v1762_v44 = vld [vmem:[%s2046_s4 + $0x30] sm:$0xff]  }
 0x1ee   : > { %v797_v50 = vpack.c.bf16 %v751_v47, %v750_v46  ;;  %v1772_v45 = vld [vmem:[%s2046_s4 + $0x10] sm:$0xff]   ;;  %v1763_v46 = vld [vmem:[%s2046_s4 + $0x38] sm:$0xff]  }
 0x1ef   : > { %v796_v51 = vpack.c.bf16 %v749_v49, %v748_v48  ;;  %v1773_v47 = vld [vmem:[%s2046_s4 + $0x18] sm:$0xff]   ;;  %v1764_v48 = vld [vmem:[%s2046_s4 + $0x40] sm:$0xff]   ;;  %v1765_v49 = vld [vmem:[%s2046_s4 + $0x48] sm:$0xff]  }
 0x1f1   : > { %1640 = vmatprep.subr.bf16.mxu0 %v796_v51  ;;  %1688 = vmatprep.subr.bf16.mxu1 %v796_v51 }
 0x1f2   : > { %1641 = vmatpush3.bf16.msra.mxu0 %v796_v51  ;;  %1696 = vmatpush3.bf16.msra.mxu1 %v796_v51  ;;  %v1767_v51 = vld [vmem:[%s2046_s4 + $0x58] sm:$0xff]  }
 0x1f3   : > { %1642 = vmatprep.subr.bf16.mxu0 %v797_v50  ;;  %1689 = vmatprep.subr.bf16.mxu1 %v797_v50 }
 0x1f6   : > { %1643 = vmatpush3.bf16.msra.mxu0 %v797_v50  ;;  %1697 = vmatpush3.bf16.msra.mxu1 %v797_v50  ;;  %v1766_v50 = vld [vmem:[%s2046_s4 + $0x50] sm:$0xff]  }
 0x1f7   : > { %v1630_v52 = vpop.f32.mrb[4].mxu1 }
 0x1f8   : > { %v722_v53 = vmax.f32 %v1630_v52, 0.0  ;;  %v669_v54 = vpop.f32.mrb[5].mxu1  ;;  %v1770_v52 = vld [vmem:[%s2046_s4 + $0x60] sm:$0xff]  }
 0x1f9   : > { %v720_v56 = vmax.f32 %v669_v54, 0.0  ;;  %v1631_v57 = vpop.f32.mrb[6].mxu1  ;;  %v1774_v54 = vld [vmem:[%s2046_s4 + $0x70] sm:$0xff]  }
 0x1fa   : > { %v723_v60 = vmax.f32 %v1631_v57, 0.0  ;;  %v672_v61 = vpop.f32.mrb[7].mxu1  ;;  %v754_v0 = vmul.f32 %v738_v55, %v722_v53  ;;  %v1771_v53 = vld [vmem:[%s2046_s4 + $0x68] sm:$0xff]   ;;  %v1775_v55 = vld [vmem:[%s2046_s4 + $0x78] sm:$0xff]  }
 0x1fb   : > { %v721_v63 = vmax.f32 %v672_v61, 0.0  ;;  %v752_v2 = vmul.f32 %v736_v59, %v720_v56 }
 0x1fc   : > { %v755_v1 = vmul.f32 %v739_v58, %v723_v60 }
 0x1fd   : > { %v753_v3 = vmul.f32 %v737_v62, %v721_v63 }
 0x1fe   : > { %v799_v4 = vpack.c.bf16 %v755_v1, %v754_v0 }
 0x1ff   : > { %v798_v5 = vpack.c.bf16 %v753_v3, %v752_v2 }
 0x201   : > { %1644 = vmatprep.subr.bf16.mxu0 %v798_v5  ;;  %1690 = vmatprep.subr.bf16.mxu1 %v798_v5 }
 0x202   : > { %1645 = vmatpush3.bf16.msra.mxu0 %v798_v5  ;;  %1698 = vmatpush3.bf16.msra.mxu1 %v798_v5 }
 0x203   : > { %1646 = vmatprep.subr.bf16.mxu0 %v799_v4  ;;  %1691 = vmatprep.subr.bf16.mxu1 %v799_v4 }
 0x206   : > { %1647 = vmatpush3.bf16.msra.mxu0 %v799_v4  ;;  %1699 = vmatpush3.bf16.msra.mxu1 %v799_v4 }
 0x207   : > { %v1634_v6 = vpop.f32.mrb[8].mxu1 }
 0x208   : > { %v726_v7 = vmax.f32 %v1634_v6, 0.0  ;;  %v685_v8 = vpop.f32.mrb[9].mxu1 }
 0x209   : > { %v724_v10 = vmax.f32 %v685_v8, 0.0  ;;  %v1635_v11 = vpop.f32.mrb[10].mxu1 }
 0x20a   : > { %v727_v14 = vmax.f32 %v1635_v11, 0.0  ;;  %v688_v15 = vpop.f32.mrb[11].mxu1  ;;  %v758_v18 = vmul.f32 %v742_v9, %v726_v7 }
 0x20b   : > { %v725_v17 = vmax.f32 %v688_v15, 0.0  ;;  %v756_v20 = vmul.f32 %v740_v13, %v724_v10 }
 0x20c   : > { %v759_v19 = vmul.f32 %v743_v12, %v727_v14 }
 0x20d   : > { %v757_v21 = vmul.f32 %v741_v16, %v725_v17 }
 0x20e   : > { %v801_v22 = vpack.c.bf16 %v759_v19, %v758_v18 }
 0x20f   : > { %v800_v23 = vpack.c.bf16 %v757_v21, %v756_v20 }
 0x211   : > { %1648 = vmatprep.subr.bf16.mxu0 %v800_v23  ;;  %1692 = vmatprep.subr.bf16.mxu1 %v800_v23 }
 0x212   : > { %1649 = vmatpush3.bf16.msra.mxu0 %v800_v23  ;;  %1700 = vmatpush3.bf16.msra.mxu1 %v800_v23 }
 0x213   : > { %1650 = vmatprep.subr.bf16.mxu0 %v801_v22  ;;  %1693 = vmatprep.subr.bf16.mxu1 %v801_v22 }
 0x216   : > { %1651 = vmatpush3.bf16.msra.mxu0 %v801_v22  ;;  %1701 = vmatpush3.bf16.msra.mxu1 %v801_v22 }
 0x217   : > { %v1638_v24 = vpop.f32.mrb[12].mxu1 }
 0x218   : > { %v730_v25 = vmax.f32 %v1638_v24, 0.0  ;;  %v701_v26 = vpop.f32.mrb[13].mxu1 }
 0x219   : > { %v728_v28 = vmax.f32 %v701_v26, 0.0  ;;  %v1639_v29 = vpop.f32.mrb[14].mxu1 }
 0x21a   : > { %v731_v32 = vmax.f32 %v1639_v29, 0.0  ;;  %v704_v33 = vpop.f32.mrb[15].mxu1  ;;  %v762_v36 = vmul.f32 %v746_v27, %v730_v25 }
 0x21b   : > { %v729_v35 = vmax.f32 %v704_v33, 0.0  ;;  %v760_v38 = vmul.f32 %v744_v31, %v728_v28 }
 0x21c   : > { %v763_v37 = vmul.f32 %v747_v30, %v731_v32 }
 0x21d   : > { %v761_v39 = vmul.f32 %v745_v34, %v729_v35 }
 0x21e   : > { %v803_v40 = vpack.c.bf16 %v763_v37, %v762_v36 }
 0x21f   : > { %v802_v41 = vpack.c.bf16 %v761_v39, %v760_v38 }
 0x221   : > { %1652 = vmatprep.subr.bf16.mxu0 %v802_v41  ;;  %1694 = vmatprep.subr.bf16.mxu1 %v802_v41 }
 0x222   : > { %1653 = vmatpush3.bf16.msra.mxu0 %v802_v41  ;;  %1702 = vmatpush3.bf16.msra.mxu1 %v802_v41 }
 0x223   : > { %1654 = vmatprep.subr.bf16.mxu0 %v803_v40  ;;  %1695 = vmatprep.subr.bf16.mxu1 %v803_v40 }
 0x226   : > { %1655 = vmatpush3.bf16.msra.mxu0 %v803_v40  ;;  %1703 = vmatpush3.bf16.msra.mxu1 %v803_v40 }
 0x229   : > { %1665 = vmatmul.mubr.bf16.vlgmr.msra.gmra.mrb[16].mxu1 %v1761_v42  ;;  %1657 = vmatmul.mubr.bf16.vlgmr.msra.gmra.mrb[32].mxu0 %v1769_v43 }
 0x22a   : > { %1668 = vmatprep.mubr.bf16.mxu1 %v1762_v44  ;;  %1660 = vmatprep.mubr.bf16.mxu0 %v1772_v45 }
 0x231   : > { %1669 = vmatmul.mubr.bf16.gmra.mrb[20].mxu1 %v1763_v46  ;;  %1661 = vmatmul.mubr.bf16.gmra.mrb[36].mxu0 %v1773_v47 }
 0x232   : > { %1672 = vmatprep.mubr.bf16.mxu1 %v1764_v48 }
 0x239   : > { %1673 = vmatmul.mubr.bf16.gmra.mrb[24].mxu1 %v1765_v49 }
 0x23a   : > { %1676 = vmatprep.mubr.bf16.mxu1 %v1766_v50 }
 0x241   : > { %1677 = vmatmul.mubr.bf16.gmra.mrb[28].mxu1 %v1767_v51 }
 0x242   : > { %1680 = vmatprep.mubr.bf16.mxu1 %v1770_v52 }
 0x249   : > { %1681 = vmatmul.mubr.bf16.gmra.mrb[32].mxu1 %v1771_v53 }
 0x24a   : > { %1684 = vmatprep.mubr.bf16.mxu1 %v1774_v54 }
 0x251   : > { %1685 = vmatmul.mubr.bf16.gmra.mrb[36].mxu1 %v1775_v55 }
 0x2fc   : > { %v1666_v56 = vpop.f32.mrb[16].mxu1  ;;  %v1658_v57 = vpop.f32.mrb[32].mxu0 }
 0x2fd   : > { %v966_v58 = vpop.f32.mrb[17].mxu1  ;;  %v934_v59 = vpop.f32.mrb[33].mxu0 }
 0x2fe   : > { %v1667_v60 = vpop.f32.mrb[18].mxu1  ;;  %v1659_v61 = vpop.f32.mrb[34].mxu0 }
 0x2ff   : > { %v1437_v62 = vpack.c.bf16 %v1667_v60, %v1666_v56  ;;  %v969_v63 = vpop.f32.mrb[19].mxu1  ;;  %v1417_v0 = vpack.c.bf16 %v1659_v61, %v1658_v57  ;;  %v937_v1 = vpop.f32.mrb[35].mxu0 }
 0x300   : > { %v1432_v2 = vpack.c.bf16 %v969_v63, %v966_v58  ;;  %v1412_v3 = vpack.c.bf16 %v937_v1, %v934_v59 }
 0x301   : > { %1493 = vst [vmem:[%s2021_s28 + $0x28] sm:$0xff] %v1437_v62   ;;  %1489 = vst [vmem:[%s2021_s28 + $0x8] sm:$0xff] %v1417_v0  }
 0x302   : > { %1492 = vst [vmem:[%s2021_s28 + $0x20] sm:$0xff] %v1432_v2   ;;  %1413 = vst [vmem:[%s2021_s28] sm:$0xff] %v1412_v3  }
 0x304   : > { %v1670_v4 = vpop.f32.mrb[20].mxu1  ;;  %v1662_v5 = vpop.f32.mrb[36].mxu0 }
 0x305   : > { %v982_v6 = vpop.f32.mrb[21].mxu1  ;;  %v950_v7 = vpop.f32.mrb[37].mxu0 }
 0x306   : > { %v1671_v8 = vpop.f32.mrb[22].mxu1  ;;  %v1663_v9 = vpop.f32.mrb[38].mxu0 }
 0x307   : > { %v1447_v10 = vpack.c.bf16 %v1671_v8, %v1670_v4  ;;  %v985_v11 = vpop.f32.mrb[23].mxu1  ;;  %v1427_v12 = vpack.c.bf16 %v1663_v9, %v1662_v5  ;;  %v953_v13 = vpop.f32.mrb[39].mxu0 }
 0x308   : > { %v1442_v14 = vpack.c.bf16 %v985_v11, %v982_v6  ;;  %v1422_v15 = vpack.c.bf16 %v953_v13, %v950_v7 }
 0x309   : > { %1495 = vst [vmem:[%s2021_s28 + $0x38] sm:$0xff] %v1447_v10   ;;  %1491 = vst [vmem:[%s2021_s28 + $0x18] sm:$0xff] %v1427_v12  }
 0x30a   : > { %1494 = vst [vmem:[%s2021_s28 + $0x30] sm:$0xff] %v1442_v14   ;;  %1490 = vst [vmem:[%s2021_s28 + $0x10] sm:$0xff] %v1422_v15  }
 0x30c   : > { %v1674_v16 = vpop.f32.mrb[24].mxu1 }
 0x30d   : > { %v998_v17 = vpop.f32.mrb[25].mxu1 }
 0x30e   : > { %v1675_v18 = vpop.f32.mrb[26].mxu1 }
 0x30f   : > { %v1457_v19 = vpack.c.bf16 %v1675_v18, %v1674_v16  ;;  %v1001_v20 = vpop.f32.mrb[27].mxu1 }
 0x310   : > { %v1452_v21 = vpack.c.bf16 %v1001_v20, %v998_v17 }
 0x311   : > { %1497 = vst [vmem:[%s2021_s28 + $0x48] sm:$0xff] %v1457_v19  }
 0x312   : > { %1496 = vst [vmem:[%s2021_s28 + $0x40] sm:$0xff] %v1452_v21  }
 0x314   : > { %v1678_v22 = vpop.f32.mrb[28].mxu1 }
 0x315   : > { %v1014_v23 = vpop.f32.mrb[29].mxu1 }
 0x316   : > { %v1679_v24 = vpop.f32.mrb[30].mxu1 }
 0x317   : > { %v1467_v25 = vpack.c.bf16 %v1679_v24, %v1678_v22  ;;  %v1017_v26 = vpop.f32.mrb[31].mxu1 }
 0x318   : > { %v1462_v27 = vpack.c.bf16 %v1017_v26, %v1014_v23 }
 0x319   : > { %1499 = vst [vmem:[%s2021_s28 + $0x58] sm:$0xff] %v1467_v25  }
 0x31a   : > { %1498 = vst [vmem:[%s2021_s28 + $0x50] sm:$0xff] %v1462_v27  }
 0x31c   : > { %v1682_v28 = vpop.f32.mrb[32].mxu1 }
 0x31d   : > { %v1030_v29 = vpop.f32.mrb[33].mxu1 }
 0x31e   : > { %v1683_v30 = vpop.f32.mrb[34].mxu1 }
 0x31f   : > { %v1477_v31 = vpack.c.bf16 %v1683_v30, %v1682_v28  ;;  %v1033_v32 = vpop.f32.mrb[35].mxu1 }
 0x320   : > { %v1472_v33 = vpack.c.bf16 %v1033_v32, %v1030_v29 }
 0x321   : > { %1501 = vst [vmem:[%s2021_s28 + $0x68] sm:$0xff] %v1477_v31  }
 0x322   : > { %1500 = vst [vmem:[%s2021_s28 + $0x60] sm:$0xff] %v1472_v33  }
 0x324   : > { %v1686_v34 = vpop.f32.mrb[36].mxu1 }
 0x325   : > { %v1046_v35 = vpop.f32.mrb[37].mxu1 }
 0x326   : > { %v1687_v36 = vpop.f32.mrb[38].mxu1 }
 0x327   : > { %v1487_v37 = vpack.c.bf16 %v1687_v36, %v1686_v34  ;;  %v1049_v38 = vpop.f32.mrb[39].mxu1 }
 0x328   : > { %v1482_v39 = vpack.c.bf16 %v1049_v38, %v1046_v35 }
 0x329   : > { %1503 = vst [vmem:[%s2021_s28 + $0x78] sm:$0xff] %v1487_v37  }
 0x32a   : > { %1502 = vst [vmem:[%s2021_s28 + $0x70] sm:$0xff] %v1482_v39  }
 0x32b PF: > { %s15_s18 = sadd.s32 1, %s1782_s18  }
 0x32c   : > { %p12_p4 = scmp.ge.s32.totalorder %s15_s18, 4  }
 0x32e   :  { %14 = sbr.rel (!%p12_p4) target bundleno = 1 (0x1), region = 70 }

// kernel: pyramid_pooling_forward.3
= control target key start
LH: loop header
LB: loop body
LE: loop exit
PB: predicated region body
PF: predicated region fallthrough
CT: control target
= control target key end

     0   :  { %s7156_s9 = smov 0   ;;  %s7158_s10 = smov 0   ;;  %s8765_s0 = inlined_call_operand.vmem [shape: bf16[2,328,128], index: 0, kind: input, shape index: {}]   ;;  %s8766_s1 = inlined_call_operand.vmem [shape: bf16[9,128,512], index: 1, kind: input, shape index: {}]   ;;  %s8767_s2 = inlined_call_operand.vmem [shape: f32[2,288,512], index: 2, kind: output, shape index: {}]  }
   0x1   :  { %s7160_s11 = smov 0   ;;  %s7162_s12 = smov 0  }
   0x2   :  { %s7164_s13 = smov 0   ;;  %s7166_s14 = smov 0  }
   0x3   :  { %s7168_s15 = smov 0   ;;  %s7170_s16 = smov 0  }
   0x4   :  { %s7172_s17 = smov 0  }
   0x5 LB: > { %s5724_s18 = sadd.s32 4294967295, %s7138_s17   ;;  %s21_s19 = sadd.s32 1, %s7130_s15  ;;  %s7138_s17 = sphi %s7172_s17, %s12_s17   ;;  %s7134_s16 = sphi %s7170_s16, %s8776_s16   ;;  %s7130_s15 = sphi %s7168_s15, %s8775_s15   ;;  %s7126_s14 = sphi %s7166_s14, %s8774_s14   ;;  %s7122_s13 = sphi %s7164_s13, %s8773_s13   ;;  %s7118_s12 = sphi %s7162_s12, %s8772_s12   ;;  %s7114_s11 = sphi %s7160_s11, %s8771_s11   ;;  %s7110_s10 = sphi %s7158_s10, %s8770_s10   ;;  %s7106_s9 = sphi %s7156_s9, %s8769_s9  }
   0x6   : > { %p22_p0 = scmp.ge.s32.totalorder %s21_s19, 2  ;;  %s24_s20 = sadd.s32 1, %s7134_s16 }
   0x7   : > { %s57_s21 = sadd.s32 1, %s7118_s12  ;;  %p64_p1 = scmp.ne.s32.totalorder %s7118_s12, %s7114_s11 }
   0x8   : > { %s8778_s19 = smov (%p22_p0, %s21_s19), 0  ;;  %s8780_s20 = smov (!%p22_p0, %s24_s20), %s7134_s16 }
   0x9   : > { %s54_s22 = ssub.s32 %s7130_s15, %s8778_s19  ;;  %p65_p2 = scmp.eq.s32.totalorder %s7138_s17, 0 }
   0xa   : > { %p26_p3 = scmp.ge.s32.totalorder %s8780_s20, 2  ;;  %p55_p4 = scmp.eq.s32.totalorder %s54_s22, 0 }
   0xb   : > { %p66_p5 = por %p65_p2, %p64_p1  ;;  %s85_s23 = sadd.s32 1, %s7110_s10 }
   0xc   : > { %s8782_s20 = smov (%p26_p3, %s8780_s20), 0  ;;  %p95_p6 = scmp.ne.s32.totalorder %s7110_s10, %s7106_s9 }
   0xd   : > { %s7217_s24 = scalar_select %p55_p4, %s7118_s12, %s57_s21  }
   0xe   : > { %s80_s25 = ssub.s32 %s7134_s16, %s8782_s20  ;;  %p96_p7 = scmp.eq.s32.totalorder %s5724_s18, 3 }
   0xf   : > { %s82_s26 = sor.u32 %s80_s25, %s54_s22  ;;  %p5727_p10 = scmp.ge.s32.totalorder %s7138_s17, 4 }
  0x10   : > { %p83_p8 = scmp.eq.s32.totalorder %s82_s26, 0  ;;  %p7223_p9 = por %p96_p7, %p95_p6 }
  0x11   : > { %118 = sbr.rel (%p5727_p10) target bundleno = 100 (0x64), region = 16 }
  0x12   : > { %s7228_s28 = scalar_select %p83_p8, %s7110_s10, %s85_s23  }
  0x18   : > { %129 = sbr.rel (!%p66_p5) target bundleno = 100 (0x64), region = 24  ;;  %s131_s29 = sand.u32 (%p66_p5), 1, %s7118_s12  }
  0x19   : > { %s6070_s30 = sshll.u32 (%p66_p5), %s7130_s15, 3  ;;  %s6663_s3 = smul.u32 (%p66_p5), 1152, %s131_s29 }
  0x1a   : > { %s7236_s6 = scalar_lea.vmem (%p66_p5), %s8766_s1, %s6070_s30 }
  0x1b   : > { %v450_v0 = vld [vmem:[%s7236_s6] sm:$0xff] (%p66_p5)  ;;  %v452_v1 = vld [vmem:[%s7236_s6 + $0x10] sm:$0xff] (%p66_p5)  ;;  %s7244_s7 = scalar_lea.vmem (%p66_p5), [#allocation2], %s6663_s3 }
  0x1c   : > { %v454_v2 = vld [vmem:[%s7236_s6 + $0x20] sm:$0xff] (%p66_p5)  ;;  %v456_v3 = vld [vmem:[%s7236_s6 + $0x30] sm:$0xff] (%p66_p5)  ;;  %451 = vst [vmem:[%s7244_s7] sm:$0xff] (%p66_p5), %v450_v0  ;;  %453 = vst [vmem:[%s7244_s7 + $0x8] sm:$0xff] (%p66_p5), %v452_v1 }
  0x1d   : > { %v458_v4 = vld [vmem:[%s7236_s6 + $0x40] sm:$0xff] (%p66_p5)  ;;  %v460_v5 = vld [vmem:[%s7236_s6 + $0x50] sm:$0xff] (%p66_p5)  ;;  %455 = vst [vmem:[%s7244_s7 + $0x10] sm:$0xff] (%p66_p5), %v454_v2  ;;  %457 = vst [vmem:[%s7244_s7 + $0x18] sm:$0xff] (%p66_p5), %v456_v3 }
  0x1e   : > { %459 = vst [vmem:[%s7244_s7 + $0x20] sm:$0xff] (%p66_p5), %v458_v4  ;;  %461 = vst [vmem:[%s7244_s7 + $0x28] sm:$0xff] (%p66_p5), %v460_v5  ;;  %v462_v6 = vld [vmem:[%s7236_s6 + $0x60] sm:$0xff] (%p66_p5)  ;;  %v464_v7 = vld [vmem:[%s7236_s6 + $0x70] sm:$0xff] (%p66_p5) }
  0x1f   : > { %v466_v8 = vld [vmem:[%s7236_s6 + $0x80] sm:$0xff]  ;;  %463 = vst [vmem:[%s7244_s7 + $0x30] sm:$0xff] %v462_v6  ;;  %465 = vst [vmem:[%s7244_s7 + $0x38] sm:$0xff] %v464_v7  ;;  %v468_v9 = vld [vmem:[%s7236_s6 + $0x90] sm:$0xff] }
  0x20   : > { %467 = vst [vmem:[%s7244_s7 + $0x40] sm:$0xff] %v466_v8  ;;  %v470_v10 = vld [vmem:[%s7236_s6 + $0xa0] sm:$0xff]  ;;  %v472_v11 = vld [vmem:[%s7236_s6 + $0xb0] sm:$0xff]  ;;  %469 = vst [vmem:[%s7244_s7 + $0x48] sm:$0xff] %v468_v9 }
  0x21   : > { %471 = vst [vmem:[%s7244_s7 + $0x50] sm:$0xff] %v470_v10  ;;  %473 = vst [vmem:[%s7244_s7 + $0x58] sm:$0xff] %v472_v11  ;;  %v474_v12 = vld [vmem:[%s7236_s6 + $0xc0] sm:$0xff]  ;;  %v476_v13 = vld [vmem:[%s7236_s6 + $0xd0] sm:$0xff] }
  0x22   : > { %v478_v14 = vld [vmem:[%s7236_s6 + $0xe0] sm:$0xff]  ;;  %475 = vst [vmem:[%s7244_s7 + $0x60] sm:$0xff] %v474_v12  ;;  %477 = vst [vmem:[%s7244_s7 + $0x68] sm:$0xff] %v476_v13  ;;  %v480_v15 = vld [vmem:[%s7236_s6 + $0xf0] sm:$0xff] }
  0x23   : > { %479 = vst [vmem:[%s7244_s7 + $0x70] sm:$0xff] %v478_v14  ;;  %v482_v16 = vld [vmem:[%s7236_s6 + $0x100] sm:$0xff]  ;;  %v484_v17 = vld [vmem:[%s7236_s6 + $0x110] sm:$0xff]  ;;  %481 = vst [vmem:[%s7244_s7 + $0x78] sm:$0xff] %v480_v15 }
  0x24   : > { %483 = vst [vmem:[%s7244_s7 + $0x80] sm:$0xff] %v482_v16  ;;  %485 = vst [vmem:[%s7244_s7 + $0x88] sm:$0xff] %v484_v17  ;;  %v486_v18 = vld [vmem:[%s7236_s6 + $0x120] sm:$0xff]  ;;  %v488_v19 = vld [vmem:[%s7236_s6 + $0x130] sm:$0xff] }
  0x25   : > { %v490_v20 = vld [vmem:[%s7236_s6 + $0x140] sm:$0xff]  ;;  %487 = vst [vmem:[%s7244_s7 + $0x90] sm:$0xff] %v486_v18  ;;  %489 = vst [vmem:[%s7244_s7 + $0x98] sm:$0xff] %v488_v19  ;;  %v492_v21 = vld [vmem:[%s7236_s6 + $0x150] sm:$0xff] }
  0x26   : > { %491 = vst [vmem:[%s7244_s7 + $0xa0] sm:$0xff] %v490_v20  ;;  %v494_v22 = vld [vmem:[%s7236_s6 + $0x160] sm:$0xff]  ;;  %v496_v23 = vld [vmem:[%s7236_s6 + $0x170] sm:$0xff]  ;;  %493 = vst [vmem:[%s7244_s7 + $0xa8] sm:$0xff] %v492_v21 }
  0x27   : > { %495 = vst [vmem:[%s7244_s7 + $0xb0] sm:$0xff] %v494_v22  ;;  %497 = vst [vmem:[%s7244_s7 + $0xb8] sm:$0xff] %v496_v23  ;;  %v498_v24 = vld [vmem:[%s7236_s6 + $0x180] sm:$0xff]  ;;  %v500_v25 = vld [vmem:[%s7236_s6 + $0x190] sm:$0xff] }
  0x28   : > { %v502_v26 = vld [vmem:[%s7236_s6 + $0x1a0] sm:$0xff]  ;;  %499 = vst [vmem:[%s7244_s7 + $0xc0] sm:$0xff] %v498_v24  ;;  %501 = vst [vmem:[%s7244_s7 + $0xc8] sm:$0xff] %v500_v25  ;;  %v504_v27 = vld [vmem:[%s7236_s6 + $0x1b0] sm:$0xff] }
  0x29   : > { %503 = vst [vmem:[%s7244_s7 + $0xd0] sm:$0xff] %v502_v26  ;;  %v506_v28 = vld [vmem:[%s7236_s6 + $0x1c0] sm:$0xff]  ;;  %v508_v29 = vld [vmem:[%s7236_s6 + $0x1d0] sm:$0xff]  ;;  %505 = vst [vmem:[%s7244_s7 + $0xd8] sm:$0xff] %v504_v27 }
  0x2a   : > { %507 = vst [vmem:[%s7244_s7 + $0xe0] sm:$0xff] %v506_v28  ;;  %509 = vst [vmem:[%s7244_s7 + $0xe8] sm:$0xff] %v508_v29  ;;  %v510_v30 = vld [vmem:[%s7236_s6 + $0x1e0] sm:$0xff]  ;;  %v512_v31 = vld [vmem:[%s7236_s6 + $0x1f0] sm:$0xff] }
  0x2b   : > { %v514_v32 = vld [vmem:[%s7236_s6 + $0x200] sm:$0xff]  ;;  %511 = vst [vmem:[%s7244_s7 + $0xf0] sm:$0xff] %v510_v30  ;;  %513 = vst [vmem:[%s7244_s7 + $0xf8] sm:$0xff] %v512_v31  ;;  %v516_v33 = vld [vmem:[%s7236_s6 + $0x210] sm:$0xff] }
  0x2c   : > { %515 = vst [vmem:[%s7244_s7 + $0x100] sm:$0xff] %v514_v32  ;;  %v518_v34 = vld [vmem:[%s7236_s6 + $0x220] sm:$0xff]  ;;  %v520_v35 = vld [vmem:[%s7236_s6 + $0x230] sm:$0xff]  ;;  %517 = vst [vmem:[%s7244_s7 + $0x108] sm:$0xff] %v516_v33 }
  0x2d   : > { %519 = vst [vmem:[%s7244_s7 + $0x110] sm:$0xff] %v518_v34  ;;  %521 = vst [vmem:[%s7244_s7 + $0x118] sm:$0xff] %v520_v35  ;;  %v522_v36 = vld [vmem:[%s7236_s6 + $0x240] sm:$0xff]  ;;  %v524_v37 = vld [vmem:[%s7236_s6 + $0x250] sm:$0xff] }
  0x2e   : > { %v526_v38 = vld [vmem:[%s7236_s6 + $0x260] sm:$0xff]  ;;  %523 = vst [vmem:[%s7244_s7 + $0x120] sm:$0xff] %v522_v36  ;;  %525 = vst [vmem:[%s7244_s7 + $0x128] sm:$0xff] %v524_v37  ;;  %v528_v39 = vld [vmem:[%s7236_s6 + $0x270] sm:$0xff] }
  0x2f   : > { %527 = vst [vmem:[%s7244_s7 + $0x130] sm:$0xff] %v526_v38  ;;  %v530_v40 = vld [vmem:[%s7236_s6 + $0x280] sm:$0xff]  ;;  %v532_v41 = vld [vmem:[%s7236_s6 + $0x290] sm:$0xff]  ;;  %529 = vst [vmem:[%s7244_s7 + $0x138] sm:$0xff] %v528_v39 }
  0x30   : > { %531 = vst [vmem:[%s7244_s7 + $0x140] sm:$0xff] %v530_v40  ;;  %533 = vst [vmem:[%s7244_s7 + $0x148] sm:$0xff] %v532_v41  ;;  %v534_v42 = vld [vmem:[%s7236_s6 + $0x2a0] sm:$0xff]  ;;  %v536_v43 = vld [vmem:[%s7236_s6 + $0x2b0] sm:$0xff] }
  0x31   : > { %v538_v44 = vld [vmem:[%s7236_s6 + $0x2c0] sm:$0xff]  ;;  %535 = vst [vmem:[%s7244_s7 + $0x150] sm:$0xff] %v534_v42  ;;  %537 = vst [vmem:[%s7244_s7 + $0x158] sm:$0xff] %v536_v43  ;;  %v540_v45 = vld [vmem:[%s7236_s6 + $0x2d0] sm:$0xff] }
  0x32   : > { %539 = vst [vmem:[%s7244_s7 + $0x160] sm:$0xff] %v538_v44  ;;  %v542_v46 = vld [vmem:[%s7236_s6 + $0x2e0] sm:$0xff]  ;;  %v544_v47 = vld [vmem:[%s7236_s6 + $0x2f0] sm:$0xff]  ;;  %541 = vst [vmem:[%s7244_s7 + $0x168] sm:$0xff] %v540_v45 }
  0x33   : > { %543 = vst [vmem:[%s7244_s7 + $0x170] sm:$0xff] %v542_v46  ;;  %545 = vst [vmem:[%s7244_s7 + $0x178] sm:$0xff] %v544_v47  ;;  %v546_v48 = vld [vmem:[%s7236_s6 + $0x300] sm:$0xff]  ;;  %v548_v49 = vld [vmem:[%s7236_s6 + $0x310] sm:$0xff] }
  0x34   : > { %v550_v50 = vld [vmem:[%s7236_s6 + $0x320] sm:$0xff]  ;;  %547 = vst [vmem:[%s7244_s7 + $0x180] sm:$0xff] %v546_v48  ;;  %549 = vst [vmem:[%s7244_s7 + $0x188] sm:$0xff] %v548_v49  ;;  %v552_v51 = vld [vmem:[%s7236_s6 + $0x330] sm:$0xff] }
  0x35   : > { %551 = vst [vmem:[%s7244_s7 + $0x190] sm:$0xff] %v550_v50  ;;  %v554_v52 = vld [vmem:[%s7236_s6 + $0x340] sm:$0xff]  ;;  %v556_v53 = vld [vmem:[%s7236_s6 + $0x350] sm:$0xff]  ;;  %553 = vst [vmem:[%s7244_s7 + $0x198] sm:$0xff] %v552_v51 }
  0x36   : > { %555 = vst [vmem:[%s7244_s7 + $0x1a0] sm:$0xff] %v554_v52  ;;  %557 = vst [vmem:[%s7244_s7 + $0x1a8] sm:$0xff] %v556_v53  ;;  %v558_v54 = vld [vmem:[%s7236_s6 + $0x360] sm:$0xff]  ;;  %v560_v55 = vld [vmem:[%s7236_s6 + $0x370] sm:$0xff] }
  0x37   : > { %v562_v56 = vld [vmem:[%s7236_s6 + $0x380] sm:$0xff]  ;;  %559 = vst [vmem:[%s7244_s7 + $0x1b0] sm:$0xff] %v558_v54  ;;  %561 = vst [vmem:[%s7244_s7 + $0x1b8] sm:$0xff] %v560_v55  ;;  %v564_v57 = vld [vmem:[%s7236_s6 + $0x390] sm:$0xff] }
  0x38   : > { %563 = vst [vmem:[%s7244_s7 + $0x1c0] sm:$0xff] %v562_v56  ;;  %v566_v58 = vld [vmem:[%s7236_s6 + $0x3a0] sm:$0xff]  ;;  %v568_v59 = vld [vmem:[%s7236_s6 + $0x3b0] sm:$0xff]  ;;  %565 = vst [vmem:[%s7244_s7 + $0x1c8] sm:$0xff] %v564_v57 }
  0x39   : > { %567 = vst [vmem:[%s7244_s7 + $0x1d0] sm:$0xff] %v566_v58  ;;  %569 = vst [vmem:[%s7244_s7 + $0x1d8] sm:$0xff] %v568_v59  ;;  %v570_v60 = vld [vmem:[%s7236_s6 + $0x3c0] sm:$0xff]  ;;  %v572_v61 = vld [vmem:[%s7236_s6 + $0x3d0] sm:$0xff] }
  0x3a   : > { %v574_v62 = vld [vmem:[%s7236_s6 + $0x3e0] sm:$0xff]  ;;  %571 = vst [vmem:[%s7244_s7 + $0x1e0] sm:$0xff] %v570_v60  ;;  %573 = vst [vmem:[%s7244_s7 + $0x1e8] sm:$0xff] %v572_v61  ;;  %v576_v63 = vld [vmem:[%s7236_s6 + $0x3f0] sm:$0xff] }
  0x3b   : > { %575 = vst [vmem:[%s7244_s7 + $0x1f0] sm:$0xff] %v574_v62  ;;  %v578_v0 = vld [vmem:[%s7236_s6 + $0x400] sm:$0xff]  ;;  %v580_v1 = vld [vmem:[%s7236_s6 + $0x410] sm:$0xff]  ;;  %577 = vst [vmem:[%s7244_s7 + $0x1f8] sm:$0xff] %v576_v63 }
  0x3c   : > { %579 = vst [vmem:[%s7244_s7 + $0x200] sm:$0xff] %v578_v0  ;;  %581 = vst [vmem:[%s7244_s7 + $0x208] sm:$0xff] %v580_v1  ;;  %v582_v2 = vld [vmem:[%s7236_s6 + $0x420] sm:$0xff]  ;;  %v584_v3 = vld [vmem:[%s7236_s6 + $0x430] sm:$0xff] }
  0x3d   : > { %v586_v4 = vld [vmem:[%s7236_s6 + $0x440] sm:$0xff]  ;;  %583 = vst [vmem:[%s7244_s7 + $0x210] sm:$0xff] %v582_v2  ;;  %585 = vst [vmem:[%s7244_s7 + $0x218] sm:$0xff] %v584_v3  ;;  %v588_v5 = vld [vmem:[%s7236_s6 + $0x450] sm:$0xff] }
  0x3e   : > { %587 = vst [vmem:[%s7244_s7 + $0x220] sm:$0xff] %v586_v4  ;;  %v590_v6 = vld [vmem:[%s7236_s6 + $0x460] sm:$0xff]  ;;  %v592_v7 = vld [vmem:[%s7236_s6 + $0x470] sm:$0xff]  ;;  %589 = vst [vmem:[%s7244_s7 + $0x228] sm:$0xff] %v588_v5 }
  0x3f   : > { %591 = vst [vmem:[%s7244_s7 + $0x230] sm:$0xff] %v590_v6  ;;  %593 = vst [vmem:[%s7244_s7 + $0x238] sm:$0xff] %v592_v7  ;;  %v594_v8 = vld [vmem:[%s7236_s6 + $0x480] sm:$0xff]  ;;  %v596_v9 = vld [vmem:[%s7236_s6 + $0x490] sm:$0xff] }
  0x40   : > { %v598_v10 = vld [vmem:[%s7236_s6 + $0x4a0] sm:$0xff]  ;;  %595 = vst [vmem:[%s7244_s7 + $0x240] sm:$0xff] %v594_v8  ;;  %597 = vst [vmem:[%s7244_s7 + $0x248] sm:$0xff] %v596_v9  ;;  %v600_v11 = vld [vmem:[%s7236_s6 + $0x4b0] sm:$0xff] }
  0x41   : > { %599 = vst [vmem:[%s7244_s7 + $0x250] sm:$0xff] %v598_v10  ;;  %v602_v12 = vld [vmem:[%s7236_s6 + $0x4c0] sm:$0xff]  ;;  %v604_v13 = vld [vmem:[%s7236_s6 + $0x4d0] sm:$0xff]  ;;  %601 = vst [vmem:[%s7244_s7 + $0x258] sm:$0xff] %v600_v11 }
  0x42   : > { %603 = vst [vmem:[%s7244_s7 + $0x260] sm:$0xff] %v602_v12  ;;  %605 = vst [vmem:[%s7244_s7 + $0x268] sm:$0xff] %v604_v13  ;;  %v606_v14 = vld [vmem:[%s7236_s6 + $0x4e0] sm:$0xff]  ;;  %v608_v15 = vld [vmem:[%s7236_s6 + $0x4f0] sm:$0xff] }
  0x43   : > { %v610_v16 = vld [vmem:[%s7236_s6 + $0x500] sm:$0xff]  ;;  %607 = vst [vmem:[%s7244_s7 + $0x270] sm:$0xff] %v606_v14  ;;  %609 = vst [vmem:[%s7244_s7 + $0x278] sm:$0xff] %v608_v15  ;;  %v612_v17 = vld [vmem:[%s7236_s6 + $0x510] sm:$0xff] }
  0x44   : > { %611 = vst [vmem:[%s7244_s7 + $0x280] sm:$0xff] %v610_v16  ;;  %v614_v18 = vld [vmem:[%s7236_s6 + $0x520] sm:$0xff]  ;;  %v616_v19 = vld [vmem:[%s7236_s6 + $0x530] sm:$0xff]  ;;  %613 = vst [vmem:[%s7244_s7 + $0x288] sm:$0xff] %v612_v17 }
  0x45   : > { %615 = vst [vmem:[%s7244_s7 + $0x290] sm:$0xff] %v614_v18  ;;  %617 = vst [vmem:[%s7244_s7 + $0x298] sm:$0xff] %v616_v19  ;;  %v618_v20 = vld [vmem:[%s7236_s6 + $0x540] sm:$0xff]  ;;  %v620_v21 = vld [vmem:[%s7236_s6 + $0x550] sm:$0xff] }
  0x46   : > { %v622_v22 = vld [vmem:[%s7236_s6 + $0x560] sm:$0xff]  ;;  %619 = vst [vmem:[%s7244_s7 + $0x2a0] sm:$0xff] %v618_v20  ;;  %621 = vst [vmem:[%s7244_s7 + $0x2a8] sm:$0xff] %v620_v21  ;;  %v624_v23 = vld [vmem:[%s7236_s6 + $0x570] sm:$0xff] }
  0x47   : > { %623 = vst [vmem:[%s7244_s7 + $0x2b0] sm:$0xff] %v622_v22  ;;  %v626_v24 = vld [vmem:[%s7236_s6 + $0x580] sm:$0xff]  ;;  %v628_v25 = vld [vmem:[%s7236_s6 + $0x590] sm:$0xff]  ;;  %625 = vst [vmem:[%s7244_s7 + $0x2b8] sm:$0xff] %v624_v23 }
  0x48   : > { %627 = vst [vmem:[%s7244_s7 + $0x2c0] sm:$0xff] %v626_v24  ;;  %629 = vst [vmem:[%s7244_s7 + $0x2c8] sm:$0xff] %v628_v25  ;;  %v630_v26 = vld [vmem:[%s7236_s6 + $0x5a0] sm:$0xff]  ;;  %v632_v27 = vld [vmem:[%s7236_s6 + $0x5b0] sm:$0xff] }
  0x49   : > { %v634_v28 = vld [vmem:[%s7236_s6 + $0x5c0] sm:$0xff]  ;;  %631 = vst [vmem:[%s7244_s7 + $0x2d0] sm:$0xff] %v630_v26  ;;  %633 = vst [vmem:[%s7244_s7 + $0x2d8] sm:$0xff] %v632_v27  ;;  %v636_v29 = vld [vmem:[%s7236_s6 + $0x5d0] sm:$0xff] }
  0x4a   : > { %635 = vst [vmem:[%s7244_s7 + $0x2e0] sm:$0xff] %v634_v28  ;;  %v638_v30 = vld [vmem:[%s7236_s6 + $0x5e0] sm:$0xff]  ;;  %v640_v31 = vld [vmem:[%s7236_s6 + $0x5f0] sm:$0xff]  ;;  %637 = vst [vmem:[%s7244_s7 + $0x2e8] sm:$0xff] %v636_v29 }
  0x4b   : > { %639 = vst [vmem:[%s7244_s7 + $0x2f0] sm:$0xff] %v638_v30  ;;  %641 = vst [vmem:[%s7244_s7 + $0x2f8] sm:$0xff] %v640_v31  ;;  %v642_v32 = vld [vmem:[%s7236_s6 + $0x600] sm:$0xff]  ;;  %v644_v33 = vld [vmem:[%s7236_s6 + $0x610] sm:$0xff] }
  0x4c   : > { %v646_v34 = vld [vmem:[%s7236_s6 + $0x620] sm:$0xff]  ;;  %643 = vst [vmem:[%s7244_s7 + $0x300] sm:$0xff] %v642_v32  ;;  %645 = vst [vmem:[%s7244_s7 + $0x308] sm:$0xff] %v644_v33  ;;  %v648_v35 = vld [vmem:[%s7236_s6 + $0x630] sm:$0xff] }
  0x4d   : > { %647 = vst [vmem:[%s7244_s7 + $0x310] sm:$0xff] %v646_v34  ;;  %v650_v36 = vld [vmem:[%s7236_s6 + $0x640] sm:$0xff]  ;;  %v652_v37 = vld [vmem:[%s7236_s6 + $0x650] sm:$0xff]  ;;  %649 = vst [vmem:[%s7244_s7 + $0x318] sm:$0xff] %v648_v35 }
  0x4e   : > { %651 = vst [vmem:[%s7244_s7 + $0x320] sm:$0xff] %v650_v36  ;;  %653 = vst [vmem:[%s7244_s7 + $0x328] sm:$0xff] %v652_v37  ;;  %v654_v38 = vld [vmem:[%s7236_s6 + $0x660] sm:$0xff]  ;;  %v656_v39 = vld [vmem:[%s7236_s6 + $0x670] sm:$0xff] }
  0x4f   : > { %v658_v40 = vld [vmem:[%s7236_s6 + $0x680] sm:$0xff]  ;;  %655 = vst [vmem:[%s7244_s7 + $0x330] sm:$0xff] %v654_v38  ;;  %657 = vst [vmem:[%s7244_s7 + $0x338] sm:$0xff] %v656_v39  ;;  %v660_v41 = vld [vmem:[%s7236_s6 + $0x690] sm:$0xff] }
  0x50   : > { %659 = vst [vmem:[%s7244_s7 + $0x340] sm:$0xff] %v658_v40  ;;  %v662_v42 = vld [vmem:[%s7236_s6 + $0x6a0] sm:$0xff]  ;;  %v664_v43 = vld [vmem:[%s7236_s6 + $0x6b0] sm:$0xff]  ;;  %661 = vst [vmem:[%s7244_s7 + $0x348] sm:$0xff] %v660_v41 }
  0x51   : > { %663 = vst [vmem:[%s7244_s7 + $0x350] sm:$0xff] %v662_v42  ;;  %665 = vst [vmem:[%s7244_s7 + $0x358] sm:$0xff] %v664_v43  ;;  %v666_v44 = vld [vmem:[%s7236_s6 + $0x6c0] sm:$0xff]  ;;  %v668_v45 = vld [vmem:[%s7236_s6 + $0x6d0] sm:$0xff] }
  0x52   : > { %v670_v46 = vld [vmem:[%s7236_s6 + $0x6e0] sm:$0xff]  ;;  %667 = vst [vmem:[%s7244_s7 + $0x360] sm:$0xff] %v666_v44  ;;  %669 = vst [vmem:[%s7244_s7 + $0x368] sm:$0xff] %v668_v45  ;;  %v672_v47 = vld [vmem:[%s7236_s6 + $0x6f0] sm:$0xff] }
  0x53   : > { %671 = vst [vmem:[%s7244_s7 + $0x370] sm:$0xff] %v670_v46  ;;  %v674_v48 = vld [vmem:[%s7236_s6 + $0x700] sm:$0xff]  ;;  %v676_v49 = vld [vmem:[%s7236_s6 + $0x710] sm:$0xff]  ;;  %673 = vst [vmem:[%s7244_s7 + $0x378] sm:$0xff] %v672_v47 }
  0x54   : > { %675 = vst [vmem:[%s7244_s7 + $0x380] sm:$0xff] %v674_v48  ;;  %677 = vst [vmem:[%s7244_s7 + $0x388] sm:$0xff] %v676_v49  ;;  %v678_v50 = vld [vmem:[%s7236_s6 + $0x720] sm:$0xff]  ;;  %v680_v51 = vld [vmem:[%s7236_s6 + $0x730] sm:$0xff] }
  0x55   : > { %v682_v52 = vld [vmem:[%s7236_s6 + $0x740] sm:$0xff]  ;;  %679 = vst [vmem:[%s7244_s7 + $0x390] sm:$0xff] %v678_v50  ;;  %681 = vst [vmem:[%s7244_s7 + $0x398] sm:$0xff] %v680_v51  ;;  %v684_v53 = vld [vmem:[%s7236_s6 + $0x750] sm:$0xff] }
  0x56   : > { %683 = vst [vmem:[%s7244_s7 + $0x3a0] sm:$0xff] %v682_v52  ;;  %v686_v54 = vld [vmem:[%s7236_s6 + $0x760] sm:$0xff]  ;;  %v688_v55 = vld [vmem:[%s7236_s6 + $0x770] sm:$0xff]  ;;  %685 = vst [vmem:[%s7244_s7 + $0x3a8] sm:$0xff] %v684_v53 }
  0x57   : > { %687 = vst [vmem:[%s7244_s7 + $0x3b0] sm:$0xff] %v686_v54  ;;  %689 = vst [vmem:[%s7244_s7 + $0x3b8] sm:$0xff] %v688_v55  ;;  %v690_v56 = vld [vmem:[%s7236_s6 + $0x780] sm:$0xff]  ;;  %v692_v57 = vld [vmem:[%s7236_s6 + $0x790] sm:$0xff] }
  0x58   : > { %v694_v58 = vld [vmem:[%s7236_s6 + $0x7a0] sm:$0xff]  ;;  %691 = vst [vmem:[%s7244_s7 + $0x3c0] sm:$0xff] %v690_v56  ;;  %693 = vst [vmem:[%s7244_s7 + $0x3c8] sm:$0xff] %v692_v57  ;;  %v696_v59 = vld [vmem:[%s7236_s6 + $0x7b0] sm:$0xff] }
  0x59   : > { %695 = vst [vmem:[%s7244_s7 + $0x3d0] sm:$0xff] %v694_v58  ;;  %v698_v60 = vld [vmem:[%s7236_s6 + $0x7c0] sm:$0xff]  ;;  %v700_v61 = vld [vmem:[%s7236_s6 + $0x7d0] sm:$0xff]  ;;  %697 = vst [vmem:[%s7244_s7 + $0x3d8] sm:$0xff] %v696_v59 }
  0x5a   : > { %699 = vst [vmem:[%s7244_s7 + $0x3e0] sm:$0xff] %v698_v60  ;;  %701 = vst [vmem:[%s7244_s7 + $0x3e8] sm:$0xff] %v700_v61  ;;  %v702_v62 = vld [vmem:[%s7236_s6 + $0x7e0] sm:$0xff]  ;;  %v704_v63 = vld [vmem:[%s7236_s6 + $0x7f0] sm:$0xff] }
  0x5b   : > { %v706_v0 = vld [vmem:[%s7236_s6 + $0x800] sm:$0xff]  ;;  %703 = vst [vmem:[%s7244_s7 + $0x3f0] sm:$0xff] %v702_v62  ;;  %705 = vst [vmem:[%s7244_s7 + $0x3f8] sm:$0xff] %v704_v63  ;;  %v708_v1 = vld [vmem:[%s7236_s6 + $0x810] sm:$0xff] }
  0x5c   : > { %707 = vst [vmem:[%s7244_s7 + $0x400] sm:$0xff] %v706_v0  ;;  %v710_v2 = vld [vmem:[%s7236_s6 + $0x820] sm:$0xff]  ;;  %v712_v3 = vld [vmem:[%s7236_s6 + $0x830] sm:$0xff]  ;;  %709 = vst [vmem:[%s7244_s7 + $0x408] sm:$0xff] %v708_v1 }
  0x5d   : > { %711 = vst [vmem:[%s7244_s7 + $0x410] sm:$0xff] %v710_v2  ;;  %713 = vst [vmem:[%s7244_s7 + $0x418] sm:$0xff] %v712_v3  ;;  %v714_v4 = vld [vmem:[%s7236_s6 + $0x840] sm:$0xff]  ;;  %v716_v5 = vld [vmem:[%s7236_s6 + $0x850] sm:$0xff] }
  0x5e   : > { %v718_v6 = vld [vmem:[%s7236_s6 + $0x860] sm:$0xff]  ;;  %715 = vst [vmem:[%s7244_s7 + $0x420] sm:$0xff] %v714_v4  ;;  %717 = vst [vmem:[%s7244_s7 + $0x428] sm:$0xff] %v716_v5  ;;  %v720_v7 = vld [vmem:[%s7236_s6 + $0x870] sm:$0xff] }
  0x5f   : > { %719 = vst [vmem:[%s7244_s7 + $0x430] sm:$0xff] %v718_v6  ;;  %v722_v8 = vld [vmem:[%s7236_s6 + $0x880] sm:$0xff]  ;;  %v724_v9 = vld [vmem:[%s7236_s6 + $0x890] sm:$0xff]  ;;  %721 = vst [vmem:[%s7244_s7 + $0x438] sm:$0xff] %v720_v7 }
  0x60   : > { %723 = vst [vmem:[%s7244_s7 + $0x440] sm:$0xff] %v722_v8  ;;  %725 = vst [vmem:[%s7244_s7 + $0x448] sm:$0xff] %v724_v9  ;;  %v726_v10 = vld [vmem:[%s7236_s6 + $0x8a0] sm:$0xff]  ;;  %v728_v11 = vld [vmem:[%s7236_s6 + $0x8b0] sm:$0xff] }
  0x61   : > { %v730_v12 = vld [vmem:[%s7236_s6 + $0x8c0] sm:$0xff]  ;;  %727 = vst [vmem:[%s7244_s7 + $0x450] sm:$0xff] %v726_v10  ;;  %729 = vst [vmem:[%s7244_s7 + $0x458] sm:$0xff] %v728_v11  ;;  %v732_v13 = vld [vmem:[%s7236_s6 + $0x8d0] sm:$0xff] }
  0x62   : > { %731 = vst [vmem:[%s7244_s7 + $0x460] sm:$0xff] %v730_v12  ;;  %v734_v14 = vld [vmem:[%s7236_s6 + $0x8e0] sm:$0xff]  ;;  %v736_v15 = vld [vmem:[%s7236_s6 + $0x8f0] sm:$0xff]  ;;  %733 = vst [vmem:[%s7244_s7 + $0x468] sm:$0xff] %v732_v13 }
  0x63   : > { %735 = vst [vmem:[%s7244_s7 + $0x470] sm:$0xff] %v734_v14  ;;  %737 = vst [vmem:[%s7244_s7 + $0x478] sm:$0xff] %v736_v15 }
  0x64 PF: > { %p5730_p11 = scmp.ge.s32.totalorder %s7138_s17, 1  ;;  %p742_p12 = scmp.lt.s32.totalorder %s7138_s17, 5 }
  0x66   : > { %p743_p13 = pnand %p5730_p11, %p742_p12 }
  0x67   : > { %s749_s8 = sand.u32 (!%p743_p13), 1, %s7114_s11   ;;  %v7140_v16 = vmov (!%p743_p13), 0   ;;  %p774_p0 = scmp.lt.s32.totalorder (!%p743_p13), %s7126_s14, 1  ;;  %vm945_vm0 = vsmask.f32 (!%p743_p13), 7424  ;;  %vm3321_vm2 = vcmask (!%p743_p13), 1045504  }
  0x68   : > { %746 = sbr.rel (%p743_p13) target bundleno = 1016 (0x3f8), region = 62  ;;  %1224 = vmatprep.mubr.bf16.mxu1 (!%p743_p13), %v7140_v16  ;;  %3047 = vmatprep.mubr.bf16.mxu0 (!%p743_p13), %v7140_v16  ;;  %vm2746_vm1 = vsmask.f32 (!%p743_p13), 6400  ;;  %vm1737_vm3 = vcmask (!%p743_p13), 1046528   ;;  %vm4330_vm4 = vsmask.f32 (!%p743_p13), 5376 }
  0x69   : > { %s6664_s18 = smul.u32 (!%p743_p13), 1152, %s749_s8  ;;  %vm4905_vm5 = vcmask (!%p743_p13), 1044480   ;;  %s771_s29 = sand.u32 (!%p743_p13), 1, %s7106_s9  }
  0x6a   : > { %s6665_s30 = smul.u32 (!%p743_p13), 576, %s771_s29 }
  0x6b   : > { %s7533_s21 = scalar_lea.vmem (!%p743_p13), [#allocation2], %s6664_s18 }
  0x6c   : > { %v6741_v17 = vld [vmem:[%s7533_s21 + $0x84] ss:$8 sps:$4 sm:$0xff] (!%p743_p13)   ;;  %v6745_v19 = vld [vmem:[%s7533_s21 + $0x80] ss:$8 sps:$4 sm:$0xff] (!%p743_p13)   ;;  %v6747_v21 = vld [vmem:[%s7533_s21 + $0x94] ss:$8 sps:$4 sm:$0xff] (!%p743_p13)  }
  0x6d   : > { %v6743_v18 = vld [vmem:[%s7533_s21 + $0x204] ss:$8 sps:$4 sm:$0xff] (!%p743_p13)   ;;  %1192 = vmatprep.subr.bf16.mxu1 (!%p743_p13), %v6741_v17  ;;  %v6746_v20 = vld [vmem:[%s7533_s21 + $0x200] ss:$8 sps:$4 sm:$0xff] (!%p743_p13)   ;;  %v6749_v22 = vld [vmem:[%s7533_s21 + $0x214] ss:$8 sps:$4 sm:$0xff] (!%p743_p13)  }
  0x6e   : > { %3015 = vmatprep.subr.bf16.mxu0 (!%p743_p13), %v6743_v18  ;;  %1193 = vmatpush1.bf16.msra.mxu1 (!%p743_p13), %v6745_v19  ;;  %v6751_v23 = vld [vmem:[%s7533_s21 + $0x90] ss:$8 sps:$4 sm:$0xff] (!%p743_p13)   ;;  %v6753_v25 = vld [vmem:[%s7533_s21 + $0xa4] ss:$8 sps:$4 sm:$0xff] (!%p743_p13)   ;;  %v6757_v27 = vld [vmem:[%s7533_s21 + $0xa0] ss:$8 sps:$4 sm:$0xff] (!%p743_p13)  }
  0x6f   : > { %3016 = vmatpush1.bf16.msra.mxu0 %v6746_v20  ;;  %1194 = vmatprep.subr.bf16.mxu1 %v6747_v21  ;;  %v6752_v24 = vld [vmem:[%s7533_s21 + $0x210] ss:$8 sps:$4 sm:$0xff]   ;;  %v6755_v26 = vld [vmem:[%s7533_s21 + $0x224] ss:$8 sps:$4 sm:$0xff]   ;;  %v6758_v28 = vld [vmem:[%s7533_s21 + $0x220] ss:$8 sps:$4 sm:$0xff]  }
  0x70   : > { %3017 = vmatprep.subr.bf16.mxu0 %v6749_v22  ;;  %v6759_v29 = vld [vmem:[%s7533_s21 + $0xb4] ss:$8 sps:$4 sm:$0xff]   ;;  %s775_s11 = scalar_select %p774_p0, %s7126_s14, 1  ;;  %v6763_v31 = vld [vmem:[%s7533_s21 + $0xb0] ss:$8 sps:$4 sm:$0xff]  }
  0x71   : > { %v6761_v30 = vld [vmem:[%s7533_s21 + $0x234] ss:$8 sps:$4 sm:$0xff]   ;;  %v6764_v32 = vld [vmem:[%s7533_s21 + $0x230] ss:$8 sps:$4 sm:$0xff]   ;;  %v6765_v33 = vld [vmem:[%s7533_s21 + $0xc4] ss:$8 sps:$4 sm:$0xff]  }
  0x72   : > { %1195 = vmatpush1.bf16.msra.mxu1 %v6751_v23  ;;  %v6767_v34 = vld [vmem:[%s7533_s21 + $0x244] ss:$8 sps:$4 sm:$0xff]   ;;  %s6666_s22 = smul.u32 164, %s775_s11  ;;  %v6769_v35 = vld [vmem:[%s7533_s21 + $0xc0] ss:$8 sps:$4 sm:$0xff]   ;;  %s8483_s3 = scalar_lea.vmem [#allocation3], %s6665_s30 }
  0x73   : > { %3018 = vmatpush1.bf16.msra.mxu0 %v6752_v24  ;;  %1196 = vmatprep.subr.bf16.mxu1 %v6753_v25  ;;  %v6770_v36 = vld [vmem:[%s7533_s21 + $0x240] ss:$8 sps:$4 sm:$0xff]   ;;  %v6771_v37 = vld [vmem:[%s7533_s21 + $0xd4] ss:$8 sps:$4 sm:$0xff]   ;;  %v6775_v39 = vld [vmem:[%s7533_s21 + $0xd0] ss:$8 sps:$4 sm:$0xff]  }
  0x74   : > { %3019 = vmatprep.subr.bf16.mxu0 %v6755_v26  ;;  %v6773_v38 = vld [vmem:[%s7533_s21 + $0x254] ss:$8 sps:$4 sm:$0xff]   ;;  %s7562_s26 = scalar_lea.vmem %s8765_s0, %s6666_s22  ;;  %v6776_v40 = vld [vmem:[%s7533_s21 + $0x250] ss:$8 sps:$4 sm:$0xff]   ;;  %v6777_v41 = vld [vmem:[%s7533_s21 + $0xe4] ss:$8 sps:$4 sm:$0xff]  }
  0x75   : > { %v6779_v42 = vld [vmem:[%s7533_s21 + $0x264] ss:$8 sps:$4 sm:$0xff]   ;;  %v782_v43 = vld [vmem:[%s7562_s26] sm:$0xf]  ;;  %v6783_v49 = vld [vmem:[%s7533_s21 + $0xf4] ss:$8 sps:$4 sm:$0xff]  }
  0x76   : > { %1197 = vmatpush1.bf16.msra.mxu1 %v6757_v27  ;;  %v783_v44 = vld [vmem:[%s7562_s26 + $0x4] sm:$0xf]  ;;  %v6781_v45 = vld [vmem:[%s7533_s21 + $0xe0] ss:$8 sps:$4 sm:$0xff]   ;;  %v6785_v50 = vld [vmem:[%s7533_s21 + $0x274] ss:$8 sps:$4 sm:$0xff]  }
  0x77   : > { %3020 = vmatpush1.bf16.msra.mxu0 %v6758_v28  ;;  %1198 = vmatprep.subr.bf16.mxu1 %v6759_v29  ;;  %v6782_v46 = vld [vmem:[%s7533_s21 + $0x260] ss:$8 sps:$4 sm:$0xff]   ;;  %v7572_v47 = vcombine.low %v782_v43, %v783_v44  ;;  %v7583_v54 = vld [vmem:[%s7562_s26 + $0x10] sm:$0xff]   ;;  %v7587_v56 = vld [vmem:[%s7562_s26 + $0xc] sm:$0xf]  ;;  %s6066_s9 = sshll.u32 (%p7223_p9), %s7122_s13, 1 }
  0x78   : > { %3021 = vmatprep.subr.bf16.mxu0 %v6761_v30  ;;  %v7575_v48 = vld [vmem:[%s7562_s26 + $0x8] sm:$0xff]   ;;  %v6787_v57 = vld [vmem:[%s7533_s21 + $0xf0] ss:$8 sps:$4 sm:$0xff]   ;;  %v2756_v61 = vshrl.u32 %v7583_v54, 16  ;;  %v2759_v0 = vshll.u32 %v7583_v54, 16  ;;  %v7619_v26 = vld [vmem:[%s7562_s26 + $0x20] sm:$0xff]  }
  0x79   : > { %v947_v51 = vshrl.u32 %v7572_v47, 16  ;;  %v949_v52 = vshll.u32 %v7572_v47, 16  ;;  %v954_v53 = vshll.u32 %v7575_v48, 16  ;;  %v2158_v55 = vld [vmem:[%s7562_s26 + $0x8] sm:$0xe]  ;;  %v7601_v6 = vld [vmem:[%s7562_s26 + $0x10] sm:$0xff]  }
  0x7a   : > { %1199 = vmatpush1.bf16.msra.mxu1 %v6763_v31  ;;  %v6788_v58 = vld [vmem:[%s7533_s21 + $0x270] ss:$8 sps:$4 sm:$0xff]   ;;  %v7592_v60 = vcombine.low %v2158_v55, %v7587_v56  ;;  %v6793_v63 = vld [vmem:[%s7533_s21 + $0x4] ss:$8 sps:$4 sm:$0xff]   ;;  %v2758_v5 = vrot.slane %v2756_v61, 1  ;;  %v2761_v7 = vrot.slane %v2759_v0, 2 }
  0x7b   : > { %3022 = vmatpush1.bf16.msra.mxu0 %v6764_v32  ;;  %1200 = vmatprep.subr.bf16.mxu1 %v6765_v33  ;;  %v951_v59 = vrot.slane %v949_v52, 1  ;;  %v956_v62 = vrot.slane %v954_v53, 1  ;;  %v6798_v1 = vld [vmem:[%s7533_s21 + $0x284] ss:$8 sps:$4 sm:$0xff]   ;;  %v6791_v8 = vld [vmem:[%s7533_s21] ss:$8 sps:$4 sm:$0xff]  }
  0x7c   : > { %3023 = vmatprep.subr.bf16.mxu0 %v6767_v34  ;;  %v2748_v3 = vshrl.u32 %v7592_v60, 16  ;;  %v2751_v4 = vshll.u32 %v7592_v60, 16  ;;  %v7605_v11 = vld [vmem:[%s7562_s26 + $0x18] sm:$0xff]   ;;  %v2762_v12 = vor.u32 %v2761_v7, %v2758_v5  ;;  %v6796_v13 = vld [vmem:[%s7533_s21 + $0x280] ss:$8 sps:$4 sm:$0xff]   ;;  %v958_v14 = vshrl.u32 %v7575_v48, 16 }
  0x7d   : > { %v952_v2 = vor.u32 %v951_v59, %v947_v51  ;;  %v962_v15 = vshll.u32 %v7601_v6, 16  ;;  %v2765_v19 = vshrl.u32 %v7605_v11, 16  ;;  %v2768_v20 = vshll.u32 %v7605_v11, 16  ;;  %v6803_v21 = vld [vmem:[%s7533_s21 + $0x294] ss:$8 sps:$4 sm:$0xff]   ;;  %s6667_s4 = smul.u32 (%p7223_p9), 144, %s7126_s14 }
  0x7e   : > { %1201 = vmatpush1.bf16.msra.mxu1 %v6769_v35  ;;  %v2750_v9 = vrot.slane %v2748_v3, 1  ;;  %v2753_v10 = vrot.slane %v2751_v4, 2  ;;  %v7615_v22 = vld [vmem:[%s7562_s26 + $0x18] sm:$0xff]   ;;  %v960_v30 = vor.u32 %v958_v14, %v956_v62  ;;  %v2774_v32 = vshrl.u32 %v7619_v26, 16  ;;  %v6811_v35 = vld [vmem:[%s7533_s21 + $0x2a4] ss:$8 sps:$4 sm:$0xff]  }
  0x7f   : > { %3024 = vmatpush1.bf16.msra.mxu0 %v6770_v36  ;;  %1202 = vmatprep.subr.bf16.mxu1 %v6771_v37  ;;  %v957_v17 = vsel %vm945_vm0, %v952_v2, %v956_v62  ;;  %v2767_v24 = vrot.slane %v2765_v19, 1  ;;  %v2770_v25 = vrot.slane %v2768_v20, 2  ;;  %v964_v27 = vrot.slane %v962_v15, 1  ;;  %v6801_v28 = vld [vmem:[%s7533_s21 + $0x290] ss:$8 sps:$4 sm:$0xff]   ;;  %v7631_v37 = vld [vmem:[%s7562_s26 + $0x28] sm:$0xff]   ;;  %s5479_s27 = sadd.s32 (%p7223_p9), %s6667_s4, %s6066_s9 }
  0x80   : > { %3025 = vmatprep.subr.bf16.mxu0 %v6773_v38  ;;  %v2754_v18 = vor.u32 %v2753_v10, %v2750_v9  ;;  %v6808_v29 = vld [vmem:[%s7533_s21 + $0x14] ss:$8 sps:$4 sm:$0xff]   ;;  %v2777_v33 = vshll.u32 %v7619_v26, 16  ;;  %v6806_v34 = vld [vmem:[%s7533_s21 + $0x10] ss:$8 sps:$4 sm:$0xff]   ;;  %v970_v36 = vshll.u32 %v7615_v22, 16 }
  0x81   : > { %v2771_v31 = vor.u32 %v2770_v25, %v2767_v24  ;;  %v966_v38 = vshrl.u32 %v7601_v6, 16  ;;  %v6809_v43 = vld [vmem:[%s7533_s21 + $0x2a0] ss:$8 sps:$4 sm:$0xff]   ;;  %v2783_v48 = vshrl.u32 %v7631_v37, 16  ;;  %v2786_v51 = vshll.u32 %v7631_v37, 16  ;;  %v7649_v61 = vld [vmem:[%s7562_s26 + $0x30] sm:$0xff]  }
  0x82   : > { %1203 = vmatpush1.bf16.msra.mxu1 %v6775_v39  ;;  %v2763_v23 = vsel %vm2746_vm1, %v2754_v18, %v2762_v12  ;;  %v965_v39 = vsel %vm945_vm0, %v960_v30, %v964_v27  ;;  %v972_v44 = vrot.slane %v970_v36, 1  ;;  %v6814_v52 = vld [vmem:[%s7533_s21 + $0x2b0] ss:$8 sps:$4 sm:$0xff]   ;;  %v6819_v53 = vld [vmem:[%s7533_s21 + $0x20] ss:$8 sps:$4 sm:$0xff]   ;;  %v2792_v6 = vshrl.u32 %v7649_v61, 16 }
  0x83   : > { %3026 = vmatpush1.bf16.msra.mxu0 %v6776_v40  ;;  %1204 = vmatprep.subr.bf16.mxu1 %v6777_v41  ;;  %v2772_v40 = vsel %vm2746_vm1, %v2762_v12, %v2771_v31  ;;  %v2776_v41 = vrot.slane %v2774_v32, 1  ;;  %v6821_v55 = vld [vmem:[%s7533_s21 + $0x24] ss:$8 sps:$4 sm:$0xff]   ;;  %v2785_v0 = vrot.slane %v2783_v48, 1  ;;  %v6822_v2 = vld [vmem:[%s7533_s21 + $0x2c0] ss:$8 sps:$4 sm:$0xff]  }
  0x84   : > { %3027 = vmatprep.subr.bf16.mxu0 %v6779_v42  ;;  %v2779_v42 = vrot.slane %v2777_v33, 2  ;;  %v7655_v3 = vld [vmem:[%s7562_s26 + $0x28] sm:$0xff]   ;;  %v6829_v4 = vld [vmem:[%s7533_s21 + $0x2d4] ss:$8 sps:$4 sm:$0xff]   ;;  %v2795_v9 = vshll.u32 %v7649_v61, 16  ;;  %s6067_s5 = sshll.u32 (%p7223_p9), %s5479_s27, 3 }
  0x85   : > { %v6827_v10 = vld [vmem:[%s7533_s21 + $0x2d0] ss:$8 sps:$4 sm:$0xff]   ;;  %v986_v15 = vshll.u32 %v7655_v3, 16  ;;  %v6837_v18 = vld [vmem:[%s7533_s21 + $0x2e4] ss:$8 sps:$4 sm:$0xff]   ;;  %s8604_s14 = scalar_lea.vmem (%p7223_p9), %s8767_s2, %s6067_s5 }
  0x86   : > { %1205 = vmatpush1.bf16.msra.mxu1 %v6781_v45  ;;  %v6812_v45 = vld [vmem:[%s7562_s26 + $0x20] sm:$0xff]   ;;  %v6832_v12 = vld [vmem:[%s7533_s21 + $0x30] ss:$8 sps:$4 sm:$0xff]  }
  0x87   : > { %3028 = vmatpush1.bf16.msra.mxu0 %v6782_v46  ;;  %1206 = vmatprep.subr.bf16.mxu1 %v6783_v49  ;;  %v6816_v46 = vld [vmem:[%s7533_s21 + $0x2b4] ss:$8 sps:$4 sm:$0xff]   ;;  %v968_v49 = vor.u32 %v966_v38, %v964_v27  ;;  %v978_v59 = vshll.u32 %v6812_v45, 16  ;;  %v982_v14 = vshrl.u32 %v6812_v45, 16  ;;  %v988_v25 = vrot.slane %v986_v15, 1 }
  0x88   : > { %3029 = vmatprep.subr.bf16.mxu0 %v6785_v50  ;;  %v2780_v50 = vor.u32 %v2779_v42, %v2776_v41  ;;  %v7674_v27 = vld [vmem:[%s7562_s26 + $0x30] sm:$0xff]   ;;  %v6848_v41 = vld [vmem:[%s7533_s21 + $0x44] ss:$8 sps:$4 sm:$0xff]   ;;  %v6846_v42 = vld [vmem:[%s7533_s21 + $0x40] ss:$8 sps:$4 sm:$0xff]  }
  0x89   : > { %v973_v62 = vsel %vm945_vm0, %v968_v49, %v972_v44  ;;  %v980_v5 = vrot.slane %v978_v59, 1  ;;  %v6840_v32 = vld [vmem:[%s7533_s21 + $0x2f0] ss:$8 sps:$4 sm:$0xff]   ;;  %v994_v38 = vshll.u32 %v7674_v27, 16 }
  0x8a   : > { %1207 = vmatpush1.bf16.msra.mxu1 %v6787_v57  ;;  %v974_v57 = vshrl.u32 %v7615_v22, 16  ;;  %v7670_v22 = vld [vmem:[%s7562_s26 + $0x38] sm:$0xff]  }
  0x8b   : > { %3030 = vmatpush1.bf16.msra.mxu0 %v6788_v58  ;;  %1503 = vmatprep.subr.bf16.mxu1 %v6793_v63  ;;  %v6824_v58 = vld [vmem:[%s7533_s21 + $0x2c4] ss:$8 sps:$4 sm:$0xff]   ;;  %v2781_v63 = vsel %vm2746_vm1, %v2771_v31, %v2780_v50  ;;  %v984_v24 = vor.u32 %v982_v14, %v980_v5  ;;  %v2801_v30 = vshrl.u32 %v7670_v22, 16  ;;  %v2804_v31 = vshll.u32 %v7670_v22, 16 }
  0x8c   : > { %3457 = vmatprep.subr.bf16.mxu0 %v6798_v1  ;;  %v2788_v1 = vrot.slane %v2786_v51, 2  ;;  %v976_v7 = vor.u32 %v974_v57, %v972_v44  ;;  %v7693_v44 = vld [vmem:[%s7562_s26 + $0x38] sm:$0xff]   ;;  %v996_v48 = vrot.slane %v994_v38, 1 }
  0x8d   : > { %1225 = vmatmul.mubr.bf16.vlgmr.msra.gmra.mrb[0].mxu1 %v957_v17  ;;  %v2794_v17 = vrot.slane %v2792_v6, 1  ;;  %v989_v33 = vsel %vm945_vm0, %v984_v24, %v988_v25  ;;  %v6855_v51 = vld [vmem:[%s7533_s21 + $0x50] ss:$8 sps:$4 sm:$0xff]  }
  0x8e   : > { %3048 = vmatmul.mubr.bf16.vlgmr.msra.gmra.mrb[0].mxu0 %v2763_v23  ;;  %1504 = vmatpush1.bf16.msra.mxu1 %v6791_v8  ;;  %v2789_v8 = vor.u32 %v2788_v1, %v2785_v0  ;;  %v981_v19 = vsel %vm945_vm0, %v976_v7, %v980_v5  ;;  %v6835_v23 = vld [vmem:[%s7533_s21 + $0x2e0] ss:$8 sps:$4 sm:$0xff]   ;;  %v6865_v1 = vld [vmem:[%s7533_s21 + $0x64] ss:$8 sps:$4 sm:$0xff]  }
  0x8f   : > { %3458 = vmatpush1.bf16.msra.mxu0 %v6796_v13  ;;  %1234 = vmatprep.mubr.bf16.mxu1 %v7140_v16  ;;  %v6834_v13 = vld [vmem:[%s7533_s21 + $0x34] ss:$8 sps:$4 sm:$0xff]   ;;  %v6863_v0 = vld [vmem:[%s7533_s21 + $0x60] ss:$8 sps:$4 sm:$0xff]  }
  0x90   : > { %3057 = vmatprep.mubr.bf16.mxu0 %v7140_v16  ;;  %3459 = vmatprep.subr.bf16.mxu0 %v6803_v21  ;;  %v2790_v20 = vsel %vm2746_vm1, %v2780_v50, %v2789_v8  ;;  %v2797_v21 = vrot.slane %v2795_v9, 2 }
  0x91   : > { %1505 = vmatprep.subr.bf16.mxu1 %v6808_v29 }
  0x92   : > { %1506 = vmatpush1.bf16.msra.mxu1 %v6806_v34  ;;  %v2798_v29 = vor.u32 %v2797_v21, %v2794_v17  ;;  %v990_v34 = vshrl.u32 %v7655_v3, 16  ;;  %v7711_v3 = vld [vmem:[%s7562_s26 + $0x40] sm:$0xff]  }
  0x93   : > { %3460 = vmatpush1.bf16.msra.mxu0 %v6801_v28  ;;  %1507 = vmatprep.subr.bf16.mxu1 %v6821_v55  ;;  %v6842_v28 = vld [vmem:[%s7533_s21 + $0x2f4] ss:$8 sps:$4 sm:$0xff]   ;;  %v1002_v55 = vshll.u32 %v7693_v44, 16  ;;  %v1010_v9 = vshll.u32 %v7711_v3, 16 }
  0x94   : > { %3461 = vmatprep.subr.bf16.mxu0 %v6811_v35  ;;  %v7685_v35 = vld [vmem:[%s7562_s26 + $0x40] sm:$0xff]   ;;  %v2799_v36 = vsel %vm2746_vm1, %v2789_v8, %v2798_v29  ;;  %v1006_v8 = vshrl.u32 %v7693_v44, 16 }
  0x95   : > { %1235 = vmatmul.mubr.bf16.gmra.mrb[4].mxu1 %v965_v39  ;;  %v2803_v39 = vrot.slane %v2801_v30, 1  ;;  %v2810_v45 = vshrl.u32 %v7685_v35, 16  ;;  %v2813_v50 = vshll.u32 %v7685_v35, 16 }
  0x96   : > { %3058 = vmatmul.mubr.bf16.gmra.mrb[4].mxu0 %v2772_v40  ;;  %1244 = vmatprep.mubr.bf16.mxu1 %v7140_v16  ;;  %v2806_v40 = vrot.slane %v2804_v31, 2 }
  0x97   : > { %3067 = vmatprep.mubr.bf16.mxu0 %v7140_v16  ;;  %3462 = vmatpush1.bf16.msra.mxu0 %v6809_v43  ;;  %v6852_v43 = vld [vmem:[%s7533_s21 + $0x304] ss:$8 sps:$4 sm:$0xff]   ;;  %v2812_v57 = vrot.slane %v2810_v45, 1 }
  0x98   : > { %3463 = vmatprep.subr.bf16.mxu0 %v6816_v46  ;;  %1508 = vmatpush1.bf16.msra.mxu1 %v6819_v53  ;;  %v992_v46 = vor.u32 %v990_v34, %v988_v25  ;;  %v2807_v49 = vor.u32 %v2806_v40, %v2803_v39  ;;  %v998_v53 = vshrl.u32 %v7674_v27, 16  ;;  %v7743_v40 = vld [vmem:[%s7562_s26 + $0x50] sm:$0xff]  }
  0x99   : > { %1509 = vmatprep.subr.bf16.mxu1 %v6834_v13 }
  0x9a   : > { %v2808_v59 = vsel %vm2746_vm1, %v2798_v29, %v2807_v49  ;;  %v1014_v29 = vshrl.u32 %v7711_v3, 16 }
  0x9b   : > { %3464 = vmatpush1.bf16.msra.mxu0 %v6814_v52  ;;  %v6857_v52 = vld [vmem:[%s7533_s21 + $0x54] ss:$8 sps:$4 sm:$0xff]  }
  0x9c   : > { %3465 = vmatprep.subr.bf16.mxu0 %v6824_v58  ;;  %1510 = vmatpush1.bf16.msra.mxu1 %v6832_v12  ;;  %v997_v58 = vsel %vm945_vm0, %v992_v46, %v996_v48  ;;  %v6873_v12 = vld [vmem:[%s7533_s21 + $0x74] ss:$8 sps:$4 sm:$0xff]   ;;  %v1026_v46 = vshll.u32 %v7743_v40, 16 }
  0x9d   : > { %1245 = vmatmul.mubr.bf16.gmra.mrb[8].mxu1 %v973_v62  ;;  %1511 = vmatprep.subr.bf16.mxu1 %v6848_v41  ;;  %v2815_v62 = vrot.slane %v2813_v50, 2  ;;  %v3300_v41 = vld [vmem:[%s7562_s26 + $0x8] sm:$0xc] }
  0x9e   : > { %3068 = vmatmul.mubr.bf16.gmra.mrb[8].mxu0 %v2781_v63  ;;  %1254 = vmatprep.mubr.bf16.mxu1 %v7140_v16  ;;  %v7706_v63 = vld [vmem:[%s7562_s26 + $0x48] sm:$0xff]   ;;  %v1028_v50 = vrot.slane %v1026_v46, 1  ;;  %v6907_v46 = vld [vmem:[%s7533_s21 + $0x370] ss:$8 sps:$4 sm:$0xff]  }
  0x9f   : > { %3077 = vmatprep.mubr.bf16.mxu0 %v7140_v16  ;;  %3466 = vmatpush1.bf16.msra.mxu0 %v6822_v2  ;;  %v1004_v2 = vrot.slane %v1002_v55, 1  ;;  %v2816_v5 = vor.u32 %v2815_v62, %v2812_v57  ;;  %v2819_v6 = vshrl.u32 %v7706_v63, 16  ;;  %v2822_v7 = vshll.u32 %v7706_v63, 16  ;;  %v6850_v55 = vld [vmem:[%s7533_s21 + $0x300] ss:$8 sps:$4 sm:$0xff]  }
  0xa0   : > { %3467 = vmatprep.subr.bf16.mxu0 %v6829_v4  ;;  %1512 = vmatpush1.bf16.msra.mxu1 %v6846_v42  ;;  %v1000_v4 = vor.u32 %v998_v53, %v996_v48  ;;  %v5932_v48 = vcombine.low %v3300_v41, %v7587_v56  ;;  %v7756_v53 = vld [vmem:[%s7562_s26 + $0x58] sm:$0xff]  }
  0xa1   : > { %1513 = vmatprep.subr.bf16.mxu1 %v6857_v52  ;;  %v2817_v14 = vsel %vm2746_vm1, %v2807_v49, %v2816_v5  ;;  %v2821_v15 = vrot.slane %v2819_v6, 1  ;;  %v2824_v17 = vrot.slane %v2822_v7, 2  ;;  %v1008_v21 = vor.u32 %v1006_v8, %v1004_v2  ;;  %v6860_v57 = vld [vmem:[%s7533_s21 + $0x314] ss:$8 sps:$4 sm:$0xff]   ;;  %v6866_v6 = vld [vmem:[%s7533_s21 + $0x320] ss:$8 sps:$4 sm:$0xff]  }
  0xa2   : > { %v1005_v13 = vsel %vm945_vm0, %v1000_v4, %v1004_v2  ;;  %v3323_v52 = vrot.slane %v7583_v54, 2  ;;  %v1034_v62 = vshll.u32 %v7756_v53, 16  ;;  %v3325_v54 = vrot.slane %v7605_v11, 2  ;;  %v6868_v2 = vld [vmem:[%s7533_s21 + $0x324] ss:$8 sps:$4 sm:$0xff]  }
  0xa3   : > { %3468 = vmatpush1.bf16.msra.mxu0 %v6827_v10  ;;  %v6871_v10 = vld [vmem:[%s7533_s21 + $0x70] ss:$8 sps:$4 sm:$0xff]  }
  0xa4   : > { %3469 = vmatprep.subr.bf16.mxu0 %v6837_v18  ;;  %1514 = vmatpush1.bf16.msra.mxu1 %v6855_v51  ;;  %v7724_v18 = vld [vmem:[%s7562_s26 + $0x50] sm:$0xff]   ;;  %v3322_v51 = vrot.slane %v5932_v48, 2  ;;  %v3326_v8 = vsel %vm3321_vm2, %v3323_v52, %v3325_v54 }
  0xa5   : > { %1255 = vmatmul.mubr.bf16.gmra.mrb[12].mxu1 %v981_v19  ;;  %1515 = vmatprep.subr.bf16.mxu1 %v6865_v1  ;;  %v1012_v19 = vrot.slane %v1010_v9, 1  ;;  %v2828_v24 = vshrl.u32 %v7724_v18, 16  ;;  %v2831_v25 = vshll.u32 %v7724_v18, 16  ;;  %v6858_v1 = vld [vmem:[%s7533_s21 + $0x310] ss:$8 sps:$4 sm:$0xff]   ;;  %v1038_v9 = vshrl.u32 %v7756_v53, 16 }
  0xa6   : > { %3078 = vmatmul.mubr.bf16.gmra.mrb[12].mxu0 %v2790_v20  ;;  %1264 = vmatprep.mubr.bf16.mxu1 %v7140_v16  ;;  %v7727_v20 = vld [vmem:[%s7562_s26 + $0x48] sm:$0xff]  }
  0xa7   : > { %3087 = vmatprep.mubr.bf16.mxu0 %v7140_v16  ;;  %3470 = vmatpush1.bf16.msra.mxu0 %v6835_v23  ;;  %v2825_v23 = vor.u32 %v2824_v17, %v2821_v15  ;;  %v1018_v30 = vshll.u32 %v7727_v20, 16  ;;  %v1013_v31 = vsel %vm945_vm0, %v1008_v21, %v1012_v19  ;;  %v2833_v34 = vrot.slane %v2831_v25, 2  ;;  %v6874_v17 = vld [vmem:[%s7533_s21 + $0x330] ss:$8 sps:$4 sm:$0xff]  }
  0xa8   : > { %3471 = vmatprep.subr.bf16.mxu0 %v6842_v28  ;;  %1516 = vmatpush1.bf16.msra.mxu1 %v6863_v0  ;;  %v6881_v28 = vld [vmem:[%s7533_s21 + $0x104] ss:$8 sps:$4 sm:$0xff]   ;;  %v1022_v42 = vshrl.u32 %v7727_v20, 16 }
  0xa9   : > { %1517 = vmatprep.subr.bf16.mxu1 %v6873_v12  ;;  %v1020_v38 = vrot.slane %v1018_v30, 1  ;;  %v7765_v0 = vld [vmem:[%s7562_s26 + $0x60] sm:$0xff]   ;;  %v7779_v12 = vld [vmem:[%s7562_s26 + $0x68] sm:$0xff]   ;;  %v3329_v30 = vrot.slane %v7631_v37, 2 }
  0xaa   : > { %v1042_v11 = vshll.u32 %v7765_v0, 16  ;;  %v1046_v21 = vshrl.u32 %v7765_v0, 16  ;;  %v1054_v37 = vshrl.u32 %v7779_v12, 16 }
  0xab   : > { %3472 = vmatpush1.bf16.msra.mxu0 %v6840_v32  ;;  %v2826_v32 = vsel %vm2746_vm1, %v2816_v5, %v2825_v23  ;;  %v1024_v49 = vor.u32 %v1022_v42, %v1020_v38  ;;  %v1036_v5 = vrot.slane %v1034_v62, 1  ;;  %v7822_v62 = vld [vmem:[%s7562_s26 + $0x80] sm:$0xff]  }
  0xac   : > { %4024 = vmatprep.subr.bf16.mxu0 %v6852_v43  ;;  %1518 = vmatpush1.bf16.msra.mxu1 %v6871_v10  ;;  %v6876_v10 = vld [vmem:[%s7533_s21 + $0x334] ss:$8 sps:$4 sm:$0xff]   ;;  %v1044_v15 = vrot.slane %v1042_v11, 1  ;;  %v1078_v11 = vshrl.u32 %v7822_v62, 16 }
  0xad   : > { %1265 = vmatmul.mubr.bf16.gmra.mrb[16].mxu1 %v989_v33  ;;  %1873 = vmatprep.subr.bf16.mxu1 %v6881_v28  ;;  %v2830_v33 = vrot.slane %v2828_v24, 1  ;;  %v1029_v56 = vsel %vm945_vm0, %v1024_v49, %v1028_v50  ;;  %v6883_v24 = vld [vmem:[%s7533_s21 + $0x340] ss:$8 sps:$4 sm:$0xff]   ;;  %v6893_v28 = vld [vmem:[%s7533_s21 + $0x354] ss:$8 sps:$4 sm:$0xff]  }
  0xae   : > { %3088 = vmatmul.mubr.bf16.gmra.mrb[16].mxu0 %v2799_v36  ;;  %1274 = vmatprep.mubr.bf16.mxu1 %v7140_v16  ;;  %v1016_v36 = vor.u32 %v1014_v29, %v1012_v19  ;;  %v6885_v19 = vld [vmem:[%s7533_s21 + $0x344] ss:$8 sps:$4 sm:$0xff]  }
  0xaf   : > { %3097 = vmatprep.mubr.bf16.mxu0 %v7140_v16  ;;  %v7740_v39 = vor.u32 %v2833_v34, %v2830_v33  ;;  %v6891_v33 = vld [vmem:[%s7533_s21 + $0x350] ss:$8 sps:$4 sm:$0xff]   ;;  %v6901_v34 = vld [vmem:[%s7533_s21 + $0x364] ss:$8 sps:$4 sm:$0xff]  }
  0xb0   : > { %v1021_v43 = vsel %vm945_vm0, %v1016_v36, %v1020_v38  ;;  %v6899_v36 = vld [vmem:[%s7533_s21 + $0x360] ss:$8 sps:$4 sm:$0xff]  }
  0xb1   : > { %v2835_v45 = vsel %vm2746_vm1, %v2825_v23, %v7740_v39  ;;  %v1050_v23 = vshll.u32 %v7779_v12, 16 }
  0xb3   : > { %v1052_v29 = vrot.slane %v1050_v23, 1 }
  0xb5   : > { %1275 = vmatmul.mubr.bf16.gmra.mrb[20].mxu1 %v997_v58  ;;  %v3324_v58 = vsel %vm3321_vm2, %v3322_v51, %v3323_v52  ;;  %v1056_v48 = vor.u32 %v1054_v37, %v1052_v29  ;;  %v6919_v51 = vld [vmem:[%s7533_s21 + $0x384] ss:$8 sps:$4 sm:$0xff]  }
  0xb6   : > { %3098 = vmatmul.mubr.bf16.gmra.mrb[20].mxu0 %v2808_v59  ;;  %1284 = vmatprep.mubr.bf16.mxu1 %v7140_v16  ;;  %v1030_v59 = vshrl.u32 %v7743_v40, 16 }
  0xb7   : > { %3107 = vmatprep.mubr.bf16.mxu0 %v7140_v16 }
  0xb8   : > { %v1032_v4 = vor.u32 %v1030_v59, %v1028_v50  ;;  %v3331_v50 = vrot.slane %v7649_v61, 2  ;;  %v3333_v59 = vrot.slane %v7670_v22, 2  ;;  %v3335_v22 = vrot.slane %v7685_v35, 2 }
  0xb9   : > { %v3337_v35 = vrot.slane %v7706_v63, 2 }
  0xba   : > { %v1037_v7 = vsel %vm945_vm0, %v1032_v4, %v1036_v5  ;;  %v1074_v4 = vshll.u32 %v7822_v62, 16 }
  0xbd   : > { %1285 = vmatmul.mubr.bf16.gmra.mrb[24].mxu1 %v1005_v13  ;;  %v3327_v13 = vrot.slane %v7619_v26, 2 }
  0xbe   : > { %3108 = vmatmul.mubr.bf16.gmra.mrb[24].mxu0 %v2817_v14  ;;  %1294 = vmatprep.mubr.bf16.mxu1 %v7140_v16  ;;  %v1040_v14 = vor.u32 %v1038_v9, %v1036_v5  ;;  %v3336_v9 = vsel %vm3321_vm2, %v3333_v59, %v3335_v22 }
  0xbf   : > { %3117 = vmatprep.mubr.bf16.mxu0 %v7140_v16  ;;  %v3328_v26 = vsel %vm3321_vm2, %v3325_v54, %v3327_v13  ;;  %v3330_v41 = vsel %vm3321_vm2, %v3327_v13, %v3329_v30  ;;  %v3334_v54 = vsel %vm3321_vm2, %v3331_v50, %v3333_v59  ;;  %v6932_v59 = vld [vmem:[%s7533_s21 + $0x164] ss:$8 sps:$4 sm:$0xff]  }
  0xc0   : > { %v1045_v25 = vsel %vm945_vm0, %v1040_v14, %v1044_v15 }
  0xc5   : > { %1295 = vmatmul.mubr.bf16.gmra.mrb[28].mxu1 %v1013_v31  ;;  %v7794_v31 = vld [vmem:[%s7562_s26 + $0x70] sm:$0xff]  }
  0xc6   : > { %3118 = vmatmul.mubr.bf16.gmra.mrb[28].mxu0 %v2826_v32  ;;  %1304 = vmatprep.mubr.bf16.mxu1 %v7140_v16  ;;  %v1048_v32 = vor.u32 %v1046_v21, %v1044_v15  ;;  %v1058_v42 = vshll.u32 %v7794_v31, 16  ;;  %v7842_v15 = vld [vmem:[%s7562_s26 + $0x90] ss:$0 sps:$4 sm:$0x11]  }
  0xc7   : > { %3127 = vmatprep.mubr.bf16.mxu0 %v7140_v16  ;;  %v1090_v23 = vshll.u32 %v7842_v15, 16 }
  0xc8   : > { %v1053_v38 = vsel %vm945_vm0, %v1048_v32, %v1052_v29  ;;  %v1060_v49 = vrot.slane %v1058_v42, 1  ;;  %v6882_v29 = vld [vmem:[%s7562_s26 + $0x58] sm:$0xff]   ;;  %v6879_v32 = vld [vmem:[%s7533_s21 + $0x100] ss:$8 sps:$4 sm:$0xff]  }
  0xc9   : > { %v6887_v42 = vld [vmem:[%s7562_s26 + $0x68] sm:$0xff]  }
  0xca   : > { %v1061_v52 = vsel %vm945_vm0, %v1056_v48, %v1060_v49  ;;  %v3345_v48 = vrot.slane %v6887_v42, 2 }
  0xcd   : > { %1305 = vmatmul.mubr.bf16.gmra.mrb[32].mxu1 %v1021_v43  ;;  %v6909_v43 = vld [vmem:[%s7533_s21 + $0x374] ss:$8 sps:$4 sm:$0xff]  }
  0xce   : > { %3128 = vmatmul.mubr.bf16.gmra.mrb[32].mxu0 %v2835_v45  ;;  %1314 = vmatprep.mubr.bf16.mxu1 %v7140_v16  ;;  %v7807_v45 = vld [vmem:[%s7562_s26 + $0x78] sm:$0xff]  }
  0xcf   : > { %3489 = vmatprep.mubr.bf16.mxu0 %v7140_v16 }
  0xd5   : > { %1315 = vmatmul.mubr.bf16.gmra.mrb[36].mxu1 %v1029_v56  ;;  %v1066_v56 = vshll.u32 %v7807_v45, 16 }
  0xd6   : > { %3490 = vmatmul.mubr.bf16.vlgmr.msra.gmra.mrb[0].mxu0 %v3324_v58  ;;  %1324 = vmatprep.mubr.bf16.mxu1 %v7140_v16 }
  0xd7   : > { %4025 = vmatpush1.bf16.msra.mxu0 %v6850_v55  ;;  %3499 = vmatprep.mubr.bf16.mxu0 %v7140_v16  ;;  %v3332_v55 = vsel %vm3321_vm2, %v3329_v30, %v3331_v50  ;;  %v1068_v58 = vrot.slane %v1066_v56, 1  ;;  %v3341_v30 = vrot.slane %v6882_v29, 2  ;;  %v6914_v50 = vld [vmem:[%s7533_s21 + $0x144] ss:$8 sps:$4 sm:$0xff]   ;;  %v7882_v56 = vld [vmem:[%s7562_s26 + $0x10] sm:$0xff]  }
  0xd8   : > { %4026 = vmatprep.subr.bf16.mxu0 %v6860_v57  ;;  %v1062_v57 = vshrl.u32 %v7794_v31, 16 }
  0xda   : > { %v1064_v61 = vor.u32 %v1062_v57, %v1060_v49  ;;  %v6904_v49 = vld [vmem:[%s7533_s21 + $0x130] ss:$8 sps:$4 sm:$0xff]   ;;  %v6924_v57 = vld [vmem:[%s7533_s21 + $0x154] ss:$8 sps:$4 sm:$0xff]  }
  0xdb   : > { %4027 = vmatpush1.bf16.msra.mxu0 %v6858_v1 }
  0xdc   : > { %4028 = vmatprep.subr.bf16.mxu0 %v6868_v2  ;;  %v1069_v1 = vsel %vm945_vm0, %v1064_v61, %v1068_v58  ;;  %v1070_v2 = vshrl.u32 %v7807_v45, 16 }
  0xdd   : > { %1325 = vmatmul.mubr.bf16.gmra.mrb[40].mxu1 %v1037_v7  ;;  %v7832_v7 = vld [vmem:[%s7562_s26 + $0x88] sm:$0xff]  }
  0xde   : > { %3500 = vmatmul.mubr.bf16.gmra.mrb[4].mxu0 %v3326_v8  ;;  %1334 = vmatprep.mubr.bf16.mxu1 %v7140_v16  ;;  %v1072_v5 = vor.u32 %v1070_v2, %v1068_v58  ;;  %v1086_v21 = vshrl.u32 %v7832_v7, 16  ;;  %v6922_v58 = vld [vmem:[%s7533_s21 + $0x150] ss:$8 sps:$4 sm:$0xff]   ;;  %v6930_v2 = vld [vmem:[%s7533_s21 + $0x160] ss:$8 sps:$4 sm:$0xff]  }
  0xdf   : > { %3509 = vmatprep.mubr.bf16.mxu0 %v7140_v16  ;;  %4029 = vmatpush1.bf16.msra.mxu0 %v6866_v6  ;;  %v1076_v6 = vrot.slane %v1074_v4, 1  ;;  %v6940_v4 = vld [vmem:[%s7533_s21 + $0x174] ss:$8 sps:$4 sm:$0xff]  }
  0xe0   : > { %4030 = vmatprep.subr.bf16.mxu0 %v6876_v10  ;;  %v1082_v10 = vshll.u32 %v7832_v7, 16 }
  0xe1   : > { %v1077_v8 = vsel %vm945_vm0, %v1072_v5, %v1076_v6  ;;  %v1080_v13 = vor.u32 %v1078_v11, %v1076_v6  ;;  %v7894_v5 = vld [vmem:[%s7562_s26 + $0x18] sm:$0xff]   ;;  %v6902_v11 = vld [vmem:[%s7562_s26 + $0x80] sm:$0xff]  }
  0xe2   : > { %v1084_v14 = vrot.slane %v1082_v10, 1  ;;  %v7904_v10 = vld [vmem:[%s7562_s26 + $0x20] sm:$0xff]  }
  0xe3   : > { %4031 = vmatpush1.bf16.msra.mxu0 %v6874_v17 }
  0xe4   : > { %4032 = vmatprep.subr.bf16.mxu0 %v6885_v19  ;;  %v1085_v17 = vsel %vm945_vm0, %v1080_v13, %v1084_v14  ;;  %v3338_v19 = vsel %vm3321_vm2, %v3335_v22, %v3337_v35  ;;  %v1088_v63 = vor.u32 %v1086_v21, %v1084_v14  ;;  %v6938_v22 = vld [vmem:[%s7533_s21 + $0x170] ss:$8 sps:$4 sm:$0xff]   ;;  %v3351_v13 = vrot.slane %v6902_v11, 2  ;;  %v8001_v11 = vld [vmem:[%s7562_s26 + $0x48] sm:$0xff]  }
  0xe5   : > { %1335 = vmatmul.mubr.bf16.gmra.mrb[44].mxu1 %v1045_v25  ;;  %v3339_v25 = vrot.slane %v7724_v18, 2  ;;  %v6886_v18 = vld [vmem:[%s7562_s26 + $0x60] sm:$0xff]  }
  0xe6   : > { %3510 = vmatmul.mubr.bf16.gmra.mrb[8].mxu0 %v3328_v26  ;;  %1344 = vmatprep.mubr.bf16.mxu1 %v7140_v16 }
  0xe7   : > { %3519 = vmatprep.mubr.bf16.mxu0 %v7140_v16  ;;  %4033 = vmatpush1.bf16.msra.mxu0 %v6883_v24  ;;  %v1092_v24 = vrot.slane %v1090_v23, 1  ;;  %v6910_v23 = vld [vmem:[%s7562_s26 + $0x90] sm:$0xff]  }
  0xe8   : > { %4034 = vmatprep.subr.bf16.mxu0 %v6893_v28  ;;  %v3340_v28 = vsel %vm3321_vm2, %v3337_v35, %v3339_v25  ;;  %v6903_v35 = vld [vmem:[%s7562_s26 + $0x88] sm:$0xff]  }
  0xe9   : > { %v1093_v26 = vsel %vm945_vm0, %v1088_v63, %v1092_v24  ;;  %v3355_v63 = vrot.slane %v6910_v23, 2  ;;  %v1716_v23 = vld [vmem:[%s7562_s26] sm:$0xe] }
  0xeb   : > { %4035 = vmatpush1.bf16.msra.mxu0 %v6891_v33  ;;  %v3342_v33 = vsel %vm3321_vm2, %v3339_v25, %v3341_v30  ;;  %v6911_v25 = vld [vmem:[%s7562_s26 + $0x98] ss:$0 sps:$4 sm:$0x33]  }
  0xec   : > { %4036 = vmatprep.subr.bf16.mxu0 %v6901_v34  ;;  %v6890_v34 = vld [vmem:[%s7533_s21 + $0x114] ss:$8 sps:$4 sm:$0xff]  }
  0xed   : > { %1345 = vmatmul.mubr.bf16.gmra.mrb[48].mxu1 %v1053_v38  ;;  %v6888_v38 = vld [vmem:[%s7533_s21 + $0x110] ss:$8 sps:$4 sm:$0xff]  }
  0xee   : > { %3520 = vmatmul.mubr.bf16.gmra.mrb[12].mxu0 %v3330_v41  ;;  %1354 = vmatprep.mubr.bf16.mxu1 %v7140_v16  ;;  %v6898_v41 = vld [vmem:[%s7533_s21 + $0x124] ss:$8 sps:$4 sm:$0xff]  }
  0xef   : > { %3529 = vmatprep.mubr.bf16.mxu0 %v7140_v16  ;;  %4037 = vmatpush1.bf16.msra.mxu0 %v6899_v36  ;;  %v3343_v36 = vrot.slane %v6886_v18, 2 }
  0xf0   : > { %4038 = vmatprep.subr.bf16.mxu0 %v6909_v43  ;;  %v6896_v43 = vld [vmem:[%s7533_s21 + $0x120] ss:$8 sps:$4 sm:$0xff]  }
  0xf1   : > { %v3344_v37 = vsel %vm3321_vm2, %v3341_v30, %v3343_v36 }
  0xf3   : > { %4039 = vmatpush1.bf16.msra.mxu0 %v6907_v46  ;;  %v7870_v46 = vld [vmem:[%s7562_s26 + $0x8] sm:$0xff]  }
  0xf4   : > { %4599 = vmatprep.subr.bf16.mxu0 %v6919_v51  ;;  %v3346_v51 = vsel %vm3321_vm2, %v3343_v36, %v3345_v48  ;;  %v7946_v36 = vld [vmem:[%s7562_s26 + $0x20] sm:$0xff]  }
  0xf5   : > { %1355 = vmatmul.mubr.bf16.gmra.mrb[52].mxu1 %v1061_v52  ;;  %v6894_v52 = vld [vmem:[%s7562_s26 + $0x70] sm:$0xff]  }
  0xf6   : > { %3530 = vmatmul.mubr.bf16.gmra.mrb[16].mxu0 %v3332_v55  ;;  %1364 = vmatprep.mubr.bf16.mxu1 %v7140_v16  ;;  %v6912_v55 = vld [vmem:[%s7533_s21 + $0x140] ss:$8 sps:$4 sm:$0xff]   ;;  %v3347_v61 = vrot.slane %v6894_v52, 2  ;;  %v7969_v52 = vld [vmem:[%s7562_s26 + $0x30] sm:$0xff]  }
  0xf7   : > { %3539 = vmatprep.mubr.bf16.mxu0 %v7140_v16 }
  0xfd   : > { %1365 = vmatmul.mubr.bf16.gmra.mrb[56].mxu1 %v1069_v1  ;;  %v3348_v1 = vsel %vm3321_vm2, %v3345_v48, %v3347_v61 }
  0xfe   : > { %3540 = vmatmul.mubr.bf16.gmra.mrb[20].mxu0 %v3334_v54  ;;  %1374 = vmatprep.mubr.bf16.mxu1 %v7140_v16  ;;  %v6895_v54 = vld [vmem:[%s7562_s26 + $0x78] sm:$0xff]  }
  0xff   : > { %3549 = vmatprep.mubr.bf16.mxu0 %v7140_v16  ;;  %v3349_v6 = vrot.slane %v6895_v54, 2  ;;  %v6977_v54 = vld [vmem:[%s7533_s21 + $0x3f4] ss:$8 sps:$4 sm:$0xff]  }
 0x101   : > { %v3352_v14 = vsel %vm3321_vm2, %v3349_v6, %v3351_v13 }
 0x105   : > { %1375 = vmatmul.mubr.bf16.gmra.mrb[60].mxu1 %v1077_v8  ;;  %v6949_v8 = vld [vmem:[%s7533_s21 + $0x184] ss:$8 sps:$4 sm:$0xff]  }
 0x106   : > { %3550 = vmatmul.mubr.bf16.gmra.mrb[24].mxu0 %v3336_v9  ;;  %1384 = vmatprep.mubr.bf16.mxu1 %v7140_v16  ;;  %v3350_v9 = vsel %vm3321_vm2, %v3347_v61, %v3349_v6  ;;  %v6959_v61 = vld [vmem:[%s7533_s21 + $0x3d0] ss:$8 sps:$4 sm:$0xff]   ;;  %v6985_v6 = vld [vmem:[%s7533_s21 + $0x404] ss:$8 sps:$4 sm:$0xff]  }
 0x107   : > { %3559 = vmatprep.mubr.bf16.mxu0 %v7140_v16 }
 0x10d   : > { %1385 = vmatmul.mubr.bf16.gmra.mrb[64].mxu1 %v1085_v17  ;;  %v7912_v17 = vld [vmem:[%s7562_s26 + $0x28] sm:$0xff]  }
 0x10e   : > { %3560 = vmatmul.mubr.bf16.gmra.mrb[28].mxu0 %v3338_v19  ;;  %1394 = vmatprep.mubr.bf16.mxu1 %v7140_v16  ;;  %v3353_v19 = vrot.slane %v6903_v35, 2 }
 0x10f   : > { %3569 = vmatprep.mubr.bf16.mxu0 %v7140_v16 }
 0x110   : > { %v3354_v21 = vsel %vm3321_vm2, %v3351_v13, %v3353_v19  ;;  %v3356_v24 = vsel %vm3321_vm2, %v3353_v19, %v3355_v63  ;;  %v8017_v19 = vld [vmem:[%s7562_s26 + $0x58] sm:$0xff]  }
 0x115   : > { %1395 = vmatmul.mubr.bf16.gmra.mrb[68].mxu1 %v1093_v26  ;;  %v3742_v26 = vld [vmem:[%s7562_s26 + $0x10] sm:$0xc] }
 0x116   : > { %3570 = vmatmul.mubr.bf16.gmra.mrb[32].mxu0 %v3340_v28  ;;  %1535 = vmatprep.mubr.bf16.mxu1 %v7140_v16  ;;  %v7929_v28 = vld [vmem:[%s7562_s26 + $0x14] sm:$0xf] }
 0x117   : > { %3579 = vmatprep.mubr.bf16.mxu0 %v7140_v16  ;;  %v7933_v30 = vcombine.low %v3742_v26, %v7929_v28 }
 0x11d   : > { %1536 = vmatmul.mubr.bf16.vlgmr.msra.gmra.mrb[0].mxu1 %v7572_v47  ;;  %v6906_v47 = vld [vmem:[%s7533_s21 + $0x134] ss:$8 sps:$4 sm:$0xff]  }
 0x11e   : > { %3580 = vmatmul.mubr.bf16.gmra.mrb[36].mxu0 %v3342_v33  ;;  %1874 = vmatpush1.bf16.msra.mxu1 %v6879_v32  ;;  %v7936_v32 = vld [vmem:[%s7562_s26 + $0x18] sm:$0xff]  }
 0x11f   : > { %1545 = vmatprep.mubr.bf16.mxu1 %v7140_v16  ;;  %3589 = vmatprep.mubr.bf16.mxu0 %v7140_v16  ;;  %v3890_v33 = vrot.slane %v7936_v32, 2 }
 0x120   : > { %1875 = vmatprep.subr.bf16.mxu1 %v6890_v34  ;;  %v6917_v34 = vld [vmem:[%s7533_s21 + $0x380] ss:$8 sps:$4 sm:$0xff]  }
 0x122   : > { %1876 = vmatpush1.bf16.msra.mxu1 %v6888_v38  ;;  %v6927_v38 = vld [vmem:[%s7533_s21 + $0x394] ss:$8 sps:$4 sm:$0xff]  }
 0x123   : > { %1877 = vmatprep.subr.bf16.mxu1 %v6898_v41  ;;  %v6925_v41 = vld [vmem:[%s7533_s21 + $0x390] ss:$8 sps:$4 sm:$0xff]  }
 0x125   : > { %1546 = vmatmul.mubr.bf16.gmra.mrb[4].mxu1 %v7870_v46 }
 0x126   : > { %3590 = vmatmul.mubr.bf16.gmra.mrb[40].mxu0 %v3344_v37  ;;  %1555 = vmatprep.mubr.bf16.mxu1 %v7140_v16  ;;  %v6935_v37 = vld [vmem:[%s7533_s21 + $0x3a4] ss:$8 sps:$4 sm:$0xff]  }
 0x127   : > { %3599 = vmatprep.mubr.bf16.mxu0 %v7140_v16  ;;  %1878 = vmatpush1.bf16.msra.mxu1 %v6896_v43  ;;  %v7957_v43 = vld [vmem:[%s7562_s26 + $0x28] sm:$0xff]  }
 0x128   : > { %1879 = vmatprep.subr.bf16.mxu1 %v6906_v47  ;;  %v6943_v47 = vld [vmem:[%s7533_s21 + $0x3b4] ss:$8 sps:$4 sm:$0xff]   ;;  %v3894_v48 = vrot.slane %v7957_v43, 2 }
 0x12b   : > { %1880 = vmatpush1.bf16.msra.mxu1 %v6904_v49  ;;  %v6941_v49 = vld [vmem:[%s7533_s21 + $0x3b0] ss:$8 sps:$4 sm:$0xff]  }
 0x12c   : > { %1881 = vmatprep.subr.bf16.mxu1 %v6914_v50  ;;  %v6953_v50 = vld [vmem:[%s7533_s21 + $0x3c4] ss:$8 sps:$4 sm:$0xff]  }
 0x12d   : > { %1556 = vmatmul.mubr.bf16.gmra.mrb[8].mxu1 %v7882_v56 }
 0x12e   : > { %3600 = vmatmul.mubr.bf16.gmra.mrb[44].mxu0 %v3346_v51  ;;  %1565 = vmatprep.mubr.bf16.mxu1 %v7140_v16 }
 0x12f   : > { %3609 = vmatprep.mubr.bf16.mxu0 %v7140_v16  ;;  %1882 = vmatpush1.bf16.msra.mxu1 %v6912_v55  ;;  %v6961_v55 = vld [vmem:[%s7533_s21 + $0x3d4] ss:$8 sps:$4 sm:$0xff]  }
 0x130   : > { %1883 = vmatprep.subr.bf16.mxu1 %v6924_v57  ;;  %v3896_v57 = vrot.slane %v7969_v52, 2 }
 0x133   : > { %1884 = vmatpush1.bf16.msra.mxu1 %v6922_v58  ;;  %v6969_v58 = vld [vmem:[%s7533_s21 + $0x3e4] ss:$8 sps:$4 sm:$0xff]  }
 0x134   : > { %1885 = vmatprep.subr.bf16.mxu1 %v6932_v59  ;;  %v3897_v59 = vsel %vm3321_vm2, %v3894_v48, %v3896_v57 }
 0x135   : > { %1566 = vmatmul.mubr.bf16.gmra.mrb[12].mxu1 %v7894_v5 }
 0x136   : > { %3610 = vmatmul.mubr.bf16.gmra.mrb[48].mxu0 %v3348_v1  ;;  %1575 = vmatprep.mubr.bf16.mxu1 %v7140_v16  ;;  %v7981_v1 = vld [vmem:[%s7562_s26 + $0x38] sm:$0xff]  }
 0x137   : > { %3619 = vmatprep.mubr.bf16.mxu0 %v7140_v16  ;;  %1886 = vmatpush1.bf16.msra.mxu1 %v6930_v2  ;;  %v3898_v2 = vrot.slane %v7981_v1, 2 }
 0x138   : > { %1887 = vmatprep.subr.bf16.mxu1 %v6940_v4  ;;  %v6975_v4 = vld [vmem:[%s7533_s21 + $0x3f0] ss:$8 sps:$4 sm:$0xff]  }
 0x13b   : > { %1888 = vmatpush1.bf16.msra.mxu1 %v6938_v22  ;;  %v3899_v22 = vsel %vm3321_vm2, %v3896_v57, %v3898_v2 }
 0x13c   : > { %2440 = vmatprep.subr.bf16.mxu1 %v6949_v8  ;;  %v7993_v8 = vld [vmem:[%s7562_s26 + $0x40] sm:$0xff]  }
 0x13d   : > { %1576 = vmatmul.mubr.bf16.gmra.mrb[16].mxu1 %v7904_v10 }
 0x13e   : > { %3620 = vmatmul.mubr.bf16.gmra.mrb[52].mxu0 %v3350_v9  ;;  %1585 = vmatprep.mubr.bf16.mxu1 %v7140_v16 }
 0x13f   : > { %3629 = vmatprep.mubr.bf16.mxu0 %v7140_v16 }
 0x145   : > { %1586 = vmatmul.mubr.bf16.gmra.mrb[20].mxu1 %v7912_v17 }
 0x146   : > { %3630 = vmatmul.mubr.bf16.gmra.mrb[56].mxu0 %v3352_v14  ;;  %1595 = vmatprep.mubr.bf16.mxu1 %v7140_v16  ;;  %v8009_v14 = vld [vmem:[%s7562_s26 + $0x50] sm:$0xff]  }
 0x147   : > { %3639 = vmatprep.mubr.bf16.mxu0 %v7140_v16 }
 0x14d   : > { %1596 = vmatmul.mubr.bf16.gmra.mrb[24].mxu1 %v7674_v27  ;;  %v3357_v27 = vrot.slane %v6911_v25, 2 }
 0x14e   : > { %3640 = vmatmul.mubr.bf16.gmra.mrb[60].mxu0 %v3354_v21  ;;  %1605 = vmatprep.mubr.bf16.mxu1 %v7140_v16  ;;  %v3906_v21 = vrot.slane %v8017_v19, 2 }
 0x14f   : > { %3649 = vmatprep.mubr.bf16.mxu0 %v7140_v16  ;;  %v3358_v29 = vsel %vm3321_vm2, %v3355_v63, %v3357_v27  ;;  %v8027_v27 = vld [vmem:[%s7562_s26 + $0x60] sm:$0xff]  }
 0x155   : > { %1606 = vmatmul.mubr.bf16.gmra.mrb[28].mxu1 %v7693_v44  ;;  %v3889_v44 = vrot.slane %v7933_v30, 2 }
 0x156   : > { %3650 = vmatmul.mubr.bf16.gmra.mrb[64].mxu0 %v3356_v24  ;;  %1615 = vmatprep.mubr.bf16.mxu1 %v7140_v16  ;;  %v7024_v24 = vld [vmem:[%s7562_s26 + $0x4] sm:$0xf] }
 0x157   : > { %3659 = vmatprep.mubr.bf16.mxu0 %v7140_v16  ;;  %v3891_v18 = vsel %vm3321_vm2, %v3889_v44, %v3890_v33  ;;  %v5815_v25 = vcombine.low %v1716_v23, %v7024_v24  ;;  %v3908_v44 = vrot.slane %v8027_v27, 2  ;;  %v8088_v23 = vld [vmem:[%s7562_s26 + $0x88] sm:$0xff]  }
 0x159   : > { %v1738_v26 = vrot.slane %v5815_v25, 1  ;;  %v3918_v25 = vrot.slane %v8088_v23, 2 }
 0x15d   : > { %1616 = vmatmul.mubr.bf16.gmra.mrb[32].mxu1 %v7711_v3  ;;  %v3892_v3 = vrot.slane %v7946_v36, 2 }
 0x15e   : > { %3660 = vmatmul.mubr.bf16.gmra.mrb[68].mxu0 %v3358_v29  ;;  %1625 = vmatprep.mubr.bf16.mxu1 %v7140_v16  ;;  %v1739_v29 = vrot.slane %v7870_v46, 1  ;;  %v1741_v46 = vrot.slane %v7882_v56, 1  ;;  %v6974_v56 = vld [vmem:[%s7533_s21 + $0x1b4] ss:$8 sps:$4 sm:$0xff]  }
 0x15f   : > { %4056 = vmatprep.mubr.bf16.mxu0 %v7140_v16  ;;  %v3893_v42 = vsel %vm3321_vm2, %v3890_v33, %v3892_v3  ;;  %v3895_v51 = vsel %vm3321_vm2, %v3892_v3, %v3894_v48  ;;  %v6958_v3 = vld [vmem:[%s7533_s21 + $0x194] ss:$8 sps:$4 sm:$0xff]  }
 0x160   : > { %v1740_v33 = vsel %vm1737_vm3, %v1738_v26, %v1739_v29  ;;  %v8050_v48 = vld [vmem:[%s7562_s26 + $0x70] sm:$0xff]  }
 0x165   : > { %1626 = vmatmul.mubr.bf16.gmra.mrb[36].mxu1 %v7727_v20  ;;  %v6933_v20 = vld [vmem:[%s7533_s21 + $0x3a0] ss:$8 sps:$4 sm:$0xff]  }
 0x166   : > { %4057 = vmatmul.mubr.bf16.vlgmr.msra.gmra.mrb[0].mxu0 %v3891_v18  ;;  %1635 = vmatprep.mubr.bf16.mxu1 %v7140_v16  ;;  %v6947_v18 = vld [vmem:[%s7533_s21 + $0x180] ss:$8 sps:$4 sm:$0xff]  }
 0x167   : > { %4600 = vmatpush1.bf16.msra.mxu0 %v6917_v34  ;;  %4066 = vmatprep.mubr.bf16.mxu0 %v7140_v16  ;;  %v3909_v34 = vsel %vm3321_vm2, %v3906_v21, %v3908_v44 }
 0x168   : > { %4601 = vmatprep.subr.bf16.mxu0 %v6927_v38  ;;  %v8038_v38 = vld [vmem:[%s7562_s26 + $0x68] sm:$0xff]  }
 0x16b   : > { %4602 = vmatpush1.bf16.msra.mxu0 %v6925_v41  ;;  %v3910_v41 = vrot.slane %v8038_v38, 2 }
 0x16c   : > { %4603 = vmatprep.subr.bf16.mxu0 %v6935_v37  ;;  %v6956_v37 = vld [vmem:[%s7533_s21 + $0x190] ss:$8 sps:$4 sm:$0xff]  }
 0x16d   : > { %1636 = vmatmul.mubr.bf16.gmra.mrb[40].mxu1 %v7743_v40  ;;  %v6951_v40 = vld [vmem:[%s7533_s21 + $0x3c0] ss:$8 sps:$4 sm:$0xff]  }
 0x16e   : > { %4067 = vmatmul.mubr.bf16.gmra.mrb[4].mxu0 %v3893_v42  ;;  %1645 = vmatprep.mubr.bf16.mxu1 %v7140_v16  ;;  %v6966_v42 = vld [vmem:[%s7533_s21 + $0x1a4] ss:$8 sps:$4 sm:$0xff]  }
 0x16f   : > { %4076 = vmatprep.mubr.bf16.mxu0 %v7140_v16  ;;  %4604 = vmatpush1.bf16.msra.mxu0 %v6933_v20  ;;  %v1742_v20 = vsel %vm1737_vm3, %v1739_v29, %v1741_v46 }
 0x170   : > { %4605 = vmatprep.subr.bf16.mxu0 %v6943_v47  ;;  %v3911_v47 = vsel %vm3321_vm2, %v3908_v44, %v3910_v41  ;;  %v8098_v44 = vld [vmem:[%s7562_s26 + $0x90] sm:$0xff]  }
 0x173   : > { %4606 = vmatpush1.bf16.msra.mxu0 %v6941_v49  ;;  %v6964_v49 = vld [vmem:[%s7533_s21 + $0x1a0] ss:$8 sps:$4 sm:$0xff]  }
 0x174   : > { %4607 = vmatprep.subr.bf16.mxu0 %v6953_v50  ;;  %v1743_v50 = vrot.slane %v7894_v5, 1  ;;  %v6988_v5 = vld [vmem:[%s7533_s21 + $0x1d4] ss:$8 sps:$4 sm:$0xff]  }
 0x175   : > { %1646 = vmatmul.mubr.bf16.gmra.mrb[44].mxu1 %v7756_v53  ;;  %v6967_v53 = vld [vmem:[%s7533_s21 + $0x3e0] ss:$8 sps:$4 sm:$0xff]  }
 0x176   : > { %4077 = vmatmul.mubr.bf16.gmra.mrb[8].mxu0 %v3895_v51  ;;  %1655 = vmatprep.mubr.bf16.mxu1 %v7140_v16  ;;  %v3912_v51 = vrot.slane %v8050_v48, 2  ;;  %v1744_v57 = vsel %vm1737_vm3, %v1741_v46, %v1743_v50 }
 0x177   : > { %4086 = vmatprep.mubr.bf16.mxu0 %v7140_v16  ;;  %4608 = vmatpush1.bf16.msra.mxu0 %v6951_v40  ;;  %v6972_v40 = vld [vmem:[%s7533_s21 + $0x1b0] ss:$8 sps:$4 sm:$0xff]  }
 0x178   : > { %4609 = vmatprep.subr.bf16.mxu0 %v6961_v55  ;;  %v6982_v55 = vld [vmem:[%s7533_s21 + $0x1c4] ss:$8 sps:$4 sm:$0xff]  }
 0x17b   : > { %4610 = vmatpush1.bf16.msra.mxu0 %v6959_v61  ;;  %v3913_v61 = vsel %vm3321_vm2, %v3910_v41, %v3912_v51  ;;  %v8107_v41 = vld [vmem:[%s7562_s26 + $0x98] sm:$0xff]  }
 0x17c   : > { %4611 = vmatprep.subr.bf16.mxu0 %v6969_v58  ;;  %v8063_v58 = vld [vmem:[%s7562_s26 + $0x78] sm:$0xff]  }
 0x17d   : > { %1656 = vmatmul.mubr.bf16.gmra.mrb[48].mxu1 %v7765_v0  ;;  %v3900_v0 = vrot.slane %v7993_v8, 2 }
 0x17e   : > { %4087 = vmatmul.mubr.bf16.gmra.mrb[12].mxu0 %v3897_v59  ;;  %1665 = vmatprep.mubr.bf16.mxu1 %v7140_v16  ;;  %v6980_v59 = vld [vmem:[%s7533_s21 + $0x1c0] ss:$8 sps:$4 sm:$0xff]  }
 0x17f   : > { %4096 = vmatprep.mubr.bf16.mxu0 %v7140_v16  ;;  %4612 = vmatpush1.bf16.msra.mxu0 %v6967_v53  ;;  %v3901_v9 = vsel %vm3321_vm2, %v3898_v2, %v3900_v0  ;;  %v1745_v53 = vrot.slane %v7904_v10, 1  ;;  %v6986_v2 = vld [vmem:[%s7533_s21 + $0x1d0] ss:$8 sps:$4 sm:$0xff]   ;;  %v1747_v10 = vrot.slane %v7912_v17, 1 }
 0x180   : > { %4613 = vmatprep.subr.bf16.mxu0 %v6977_v54  ;;  %v3914_v54 = vrot.slane %v8063_v58, 2  ;;  %v7026_v17 = vld [vmem:[%s7562_s26 + $0x30] sm:$0xff]  }
 0x181   : > { %v1749_v24 = vrot.slane %v7026_v17, 1 }
 0x183   : > { %4614 = vmatpush1.bf16.msra.mxu0 %v6975_v4  ;;  %v6994_v4 = vld [vmem:[%s7533_s21 + $0x1e4] ss:$8 sps:$4 sm:$0xff]   ;;  %v1750_v26 = vsel %vm1737_vm3, %v1747_v10, %v1749_v24 }
 0x184   : > { %5041 = vmatprep.subr.bf16.mxu0 %v6985_v6  ;;  %v1746_v6 = vsel %vm1737_vm3, %v1743_v50, %v1745_v53  ;;  %v7029_v50 = vld [vmem:[%s7562_s26 + $0x48] sm:$0xff]  }
 0x185   : > { %1666 = vmatmul.mubr.bf16.gmra.mrb[52].mxu1 %v7779_v12  ;;  %v3902_v12 = vrot.slane %v8001_v11, 2 }
 0x186   : > { %4097 = vmatmul.mubr.bf16.gmra.mrb[16].mxu0 %v3899_v22  ;;  %1675 = vmatprep.mubr.bf16.mxu1 %v7140_v16  ;;  %v3915_v22 = vsel %vm3321_vm2, %v3912_v51, %v3914_v54  ;;  %v1755_v51 = vrot.slane %v7029_v50, 1 }
 0x187   : > { %4106 = vmatprep.mubr.bf16.mxu0 %v7140_v16  ;;  %v3903_v13 = vsel %vm3321_vm2, %v3900_v0, %v3902_v12  ;;  %v8076_v0 = vld [vmem:[%s7562_s26 + $0x80] sm:$0xff]  }
 0x18d   : > { %1676 = vmatmul.mubr.bf16.gmra.mrb[56].mxu1 %v7794_v31  ;;  %v3904_v31 = vrot.slane %v8009_v14, 2 }
 0x18e   : > { %4107 = vmatmul.mubr.bf16.gmra.mrb[20].mxu0 %v3901_v9  ;;  %1685 = vmatprep.mubr.bf16.mxu1 %v7140_v16  ;;  %v6992_v9 = vld [vmem:[%s7533_s21 + $0x1e0] ss:$8 sps:$4 sm:$0xff]  }
 0x18f   : > { %4116 = vmatprep.mubr.bf16.mxu0 %v7140_v16  ;;  %v3905_v35 = vsel %vm3321_vm2, %v3902_v12, %v3904_v31  ;;  %v3907_v63 = vsel %vm3321_vm2, %v3904_v31, %v3906_v21  ;;  %v7000_v12 = vld [vmem:[%s7533_s21 + $0x1f4] ss:$8 sps:$4 sm:$0xff]   ;;  %v6998_v31 = vld [vmem:[%s7533_s21 + $0x1f0] ss:$8 sps:$4 sm:$0xff]  }
 0x195   : > { %1686 = vmatmul.mubr.bf16.gmra.mrb[60].mxu1 %v7807_v45 }
 0x196   : > { %4117 = vmatmul.mubr.bf16.gmra.mrb[24].mxu0 %v3903_v13  ;;  %1695 = vmatprep.mubr.bf16.mxu1 %v7140_v16  ;;  %v3916_v13 = vrot.slane %v8076_v0, 2 }
 0x197   : > { %4126 = vmatprep.mubr.bf16.mxu0 %v7140_v16 }
 0x198   : > { %v3917_v21 = vsel %vm3321_vm2, %v3914_v54, %v3916_v13  ;;  %v3919_v29 = vsel %vm3321_vm2, %v3916_v13, %v3918_v25  ;;  %v4352_v13 = vshll.u32 %v7946_v36, 16 }
 0x19a   : > { %v4354_v17 = vrot.slane %v4352_v13, 3  ;;  %v7012_v13 = vld [vmem:[%s7533_s21 + $0x464] ss:$8 sps:$4 sm:$0xff]  }
 0x19d   : > { %1696 = vmatmul.mubr.bf16.gmra.mrb[64].mxu1 %v7822_v62 }
 0x19e   : > { %4127 = vmatmul.mubr.bf16.gmra.mrb[28].mxu0 %v3905_v35  ;;  %1705 = vmatprep.mubr.bf16.mxu1 %v7140_v16  ;;  %v1748_v35 = vsel %vm1737_vm3, %v1745_v53, %v1747_v10  ;;  %v4349_v10 = vshrl.u32 %v7946_v36, 16 }
 0x19f   : > { %4136 = vmatprep.mubr.bf16.mxu0 %v7140_v16 }
 0x1a5   : > { %1706 = vmatmul.mubr.bf16.gmra.mrb[68].mxu1 %v7832_v7 }
 0x1a6   : > { %4137 = vmatmul.mubr.bf16.gmra.mrb[32].mxu0 %v3907_v63  ;;  %1905 = vmatprep.mubr.bf16.mxu1 %v7140_v16  ;;  %v7025_v63 = vld [vmem:[%s7533_s21 + $0x204] ss:$8 sps:$4 sm:$0xff]  }
 0x1a7   : > { %4146 = vmatprep.mubr.bf16.mxu0 %v7140_v16 }
 0x1ad   : > { %1906 = vmatmul.mubr.bf16.vlgmr.msra.gmra.mrb[0].mxu1 %v1740_v33  ;;  %v7027_v33 = vld [vmem:[%s7562_s26 + $0x38] sm:$0xff]  }
 0x1ae   : > { %4147 = vmatmul.mubr.bf16.gmra.mrb[36].mxu0 %v3909_v34  ;;  %2441 = vmatpush1.bf16.msra.mxu1 %v6947_v18  ;;  %v1751_v18 = vrot.slane %v7027_v33, 1  ;;  %v3920_v34 = vrot.slane %v8098_v44, 2  ;;  %v4358_v33 = vshrl.u32 %v7957_v43, 16 }
 0x1af   : > { %1915 = vmatprep.mubr.bf16.mxu1 %v7140_v16  ;;  %4156 = vmatprep.mubr.bf16.mxu0 %v7140_v16 }
 0x1b0   : > { %2442 = vmatprep.subr.bf16.mxu1 %v6958_v3  ;;  %v1752_v3 = vsel %vm1737_vm3, %v1749_v24, %v1751_v18  ;;  %v3921_v46 = vsel %vm3321_vm2, %v3918_v25, %v3920_v34  ;;  %v6991_v24 = vld [vmem:[%s7533_s21 + $0x414] ss:$8 sps:$4 sm:$0xff]  }
 0x1b1   : > { %v7031_v25 = vld [vmem:[%s7562_s26 + $0x58] sm:$0xff]  }
 0x1b2   : > { %2443 = vmatpush1.bf16.msra.mxu1 %v6956_v37  ;;  %v7028_v37 = vld [vmem:[%s7562_s26 + $0x40] sm:$0xff]  }
 0x1b3   : > { %2444 = vmatprep.subr.bf16.mxu1 %v6966_v42  ;;  %v1753_v42 = vrot.slane %v7028_v37, 1 }
 0x1b5   : > { %1916 = vmatmul.mubr.bf16.gmra.mrb[4].mxu1 %v1742_v20  ;;  %v3922_v20 = vrot.slane %v8107_v41, 2 }
 0x1b6   : > { %4157 = vmatmul.mubr.bf16.gmra.mrb[40].mxu0 %v3911_v47  ;;  %1925 = vmatprep.mubr.bf16.mxu1 %v7140_v16  ;;  %v6979_v47 = vld [vmem:[%s7562_s26 + $0xa0] ss:$0 sps:$4 sm:$0x33]  }
 0x1b7   : > { %4166 = vmatprep.mubr.bf16.mxu0 %v7140_v16  ;;  %2445 = vmatpush1.bf16.msra.mxu1 %v6964_v49  ;;  %v1754_v49 = vsel %vm1737_vm3, %v1751_v18, %v1753_v42  ;;  %v4361_v18 = vshll.u32 %v7957_v43, 16 }
 0x1b8   : > { %2446 = vmatprep.subr.bf16.mxu1 %v6974_v56  ;;  %v3923_v56 = vsel %vm3321_vm2, %v3920_v34, %v3922_v20  ;;  %v6989_v34 = vld [vmem:[%s7533_s21 + $0x410] ss:$8 sps:$4 sm:$0xff]  }
 0x1bb   : > { %2447 = vmatpush1.bf16.msra.mxu1 %v6972_v40  ;;  %v3924_v40 = vrot.slane %v6979_v47, 2  ;;  %v6995_v47 = vld [vmem:[%s7533_s21 + $0x420] ss:$8 sps:$4 sm:$0xff]  }
 0x1bc   : > { %2448 = vmatprep.subr.bf16.mxu1 %v6982_v55  ;;  %v4332_v55 = vshrl.u32 %v7933_v30, 16 }
 0x1bd   : > { %1926 = vmatmul.mubr.bf16.gmra.mrb[8].mxu1 %v1744_v57  ;;  %v4335_v57 = vshll.u32 %v7933_v30, 16  ;;  %v3925_v53 = vsel %vm3321_vm2, %v3922_v20, %v3924_v40  ;;  %v4363_v20 = vrot.slane %v4361_v18, 3  ;;  %v4367_v40 = vshrl.u32 %v7969_v52, 16 }
 0x1be   : > { %4167 = vmatmul.mubr.bf16.gmra.mrb[44].mxu0 %v3913_v61  ;;  %1935 = vmatprep.mubr.bf16.mxu1 %v7140_v16  ;;  %v4340_v61 = vshrl.u32 %v7936_v32, 16  ;;  %v4334_v54 = vrot.slane %v4332_v55, 2  ;;  %v4370_v55 = vshll.u32 %v7969_v52, 16  ;;  %v4388_v18 = vshll.u32 %v7993_v8, 16 }
 0x1bf   : > { %4176 = vmatprep.mubr.bf16.mxu0 %v7140_v16  ;;  %2449 = vmatpush1.bf16.msra.mxu1 %v6980_v59  ;;  %v4343_v59 = vshll.u32 %v7936_v32, 16 }
 0x1c0   : > { %2450 = vmatprep.subr.bf16.mxu1 %v6988_v5  ;;  %v1756_v5 = vsel %vm1737_vm3, %v1753_v42, %v1755_v51  ;;  %v4360_v42 = vrot.slane %v4358_v33, 2  ;;  %v4385_v33 = vshrl.u32 %v7993_v8, 16 }
 0x1c3   : > { %2451 = vmatpush1.bf16.msra.mxu1 %v6986_v2  ;;  %v4337_v2 = vrot.slane %v4335_v57, 3  ;;  %v7001_v57 = vld [vmem:[%s7533_s21 + $0x430] ss:$8 sps:$4 sm:$0xff]  }
 0x1c4   : > { %2452 = vmatprep.subr.bf16.mxu1 %v6994_v4  ;;  %v4342_v4 = vrot.slane %v4340_v61, 2  ;;  %v7006_v61 = vld [vmem:[%s7533_s21 + $0x444] ss:$8 sps:$4 sm:$0xff]  }
 0x1c5   : > { %1936 = vmatmul.mubr.bf16.gmra.mrb[12].mxu1 %v1746_v6  ;;  %v4345_v6 = vrot.slane %v4343_v59, 3  ;;  %v4338_v30 = vor.u32 %v4337_v2, %v4334_v54  ;;  %v4372_v54 = vrot.slane %v4370_v55, 3  ;;  %v7004_v2 = vld [vmem:[%s7533_s21 + $0x440] ss:$8 sps:$4 sm:$0xff]  }
 0x1c6   : > { %4177 = vmatmul.mubr.bf16.gmra.mrb[48].mxu0 %v3915_v22  ;;  %1945 = vmatprep.mubr.bf16.mxu1 %v7140_v16  ;;  %v7030_v22 = vld [vmem:[%s7562_s26 + $0x50] sm:$0xff]  }
 0x1c7   : > { %4186 = vmatprep.mubr.bf16.mxu0 %v7140_v16  ;;  %2453 = vmatpush1.bf16.msra.mxu1 %v6992_v9  ;;  %v1757_v9 = vrot.slane %v7030_v22, 1 }
 0x1c8   : > { %2454 = vmatprep.subr.bf16.mxu1 %v7000_v12  ;;  %v4346_v12 = vor.u32 %v4345_v6, %v4342_v4  ;;  %v7009_v4 = vld [vmem:[%s7533_s21 + $0x454] ss:$8 sps:$4 sm:$0xff]   ;;  %v7033_v6 = vld [vmem:[%s7562_s26 + $0x68] sm:$0xff]  }
 0x1c9   : > { %v1763_v22 = vrot.slane %v7033_v6, 1  ;;  %v4412_v6 = vshrl.u32 %v8017_v19, 16 }
 0x1cb   : > { %2455 = vmatpush1.bf16.msra.mxu1 %v6998_v31  ;;  %v1758_v31 = vsel %vm1737_vm3, %v1755_v51, %v1757_v9  ;;  %v4364_v51 = vor.u32 %v4363_v20, %v4360_v42  ;;  %v4390_v42 = vrot.slane %v4388_v18, 3  ;;  %v1767_v20 = vrot.slane %v7807_v45, 1 }
 0x1cc   : > { %6071 = vmatprep.subr.bf16.mxu1 %v7025_v63  ;;  %v4351_v63 = vrot.slane %v4349_v10, 2  ;;  %v7007_v10 = vld [vmem:[%s7533_s21 + $0x450] ss:$8 sps:$4 sm:$0xff]   ;;  %v4433_v18 = vshll.u32 %v8038_v38, 16 }
 0x1cd   : > { %1946 = vmatmul.mubr.bf16.gmra.mrb[16].mxu1 %v1748_v35  ;;  %v4347_v35 = vsel %vm4330_vm4, %v4338_v30, %v4346_v12  ;;  %v4376_v30 = vshrl.u32 %v7981_v1, 16 }
 0x1ce   : > { %4187 = vmatmul.mubr.bf16.gmra.mrb[52].mxu0 %v3917_v21  ;;  %1955 = vmatprep.mubr.bf16.mxu1 %v7140_v16  ;;  %v6983_v21 = vld [vmem:[%s7533_s21 + $0x400] ss:$8 sps:$4 sm:$0xff]  }
 0x1cf   : > { %4196 = vmatprep.mubr.bf16.mxu0 %v7140_v16 }
 0x1d5   : > { %1956 = vmatmul.mubr.bf16.gmra.mrb[20].mxu1 %v1750_v26  ;;  %v1759_v26 = vrot.slane %v7031_v25, 1  ;;  %v7034_v25 = vld [vmem:[%s7562_s26 + $0x70] sm:$0xff]  }
 0x1d6   : > { %4197 = vmatmul.mubr.bf16.gmra.mrb[56].mxu0 %v3919_v29  ;;  %1965 = vmatprep.mubr.bf16.mxu1 %v7140_v16  ;;  %v4355_v29 = vor.u32 %v4354_v17, %v4351_v63  ;;  %v7010_v17 = vld [vmem:[%s7533_s21 + $0x460] ss:$8 sps:$4 sm:$0xff]  }
 0x1d7   : > { %4206 = vmatprep.mubr.bf16.mxu0 %v7140_v16 }
 0x1d8   : > { %v4356_v37 = vsel %vm4330_vm4, %v4346_v12, %v4355_v29  ;;  %v4379_v12 = vshll.u32 %v7981_v1, 16 }
 0x1da   : > { %v4381_v63 = vrot.slane %v4379_v12, 3  ;;  %v4414_v12 = vrot.slane %v4412_v6, 2 }
 0x1dd   : > { %1966 = vmatmul.mubr.bf16.gmra.mrb[24].mxu1 %v1752_v3  ;;  %v6997_v3 = vld [vmem:[%s7533_s21 + $0x424] ss:$8 sps:$4 sm:$0xff]  }
 0x1de   : > { %4207 = vmatmul.mubr.bf16.gmra.mrb[60].mxu0 %v3921_v46  ;;  %1975 = vmatprep.mubr.bf16.mxu1 %v7140_v16  ;;  %v1760_v46 = vsel %vm1737_vm3, %v1757_v9, %v1759_v26 }
 0x1df   : > { %4216 = vmatprep.mubr.bf16.mxu0 %v7140_v16 }
 0x1e5   : > { %1976 = vmatmul.mubr.bf16.gmra.mrb[28].mxu1 %v1754_v49  ;;  %v7003_v49 = vld [vmem:[%s7533_s21 + $0x434] ss:$8 sps:$4 sm:$0xff]  }
 0x1e6   : > { %4217 = vmatmul.mubr.bf16.gmra.mrb[64].mxu0 %v3923_v56  ;;  %1985 = vmatprep.mubr.bf16.mxu1 %v7140_v16  ;;  %v7032_v56 = vld [vmem:[%s7562_s26 + $0x60] sm:$0xff]  }
 0x1e7   : > { %4226 = vmatprep.mubr.bf16.mxu0 %v7140_v16  ;;  %v1761_v50 = vrot.slane %v7032_v56, 1  ;;  %v4397_v56 = vshll.u32 %v8001_v11, 16 }
 0x1e9   : > { %v1762_v59 = vsel %vm1737_vm3, %v1759_v26, %v1761_v50  ;;  %v1765_v26 = vrot.slane %v7034_v25, 1  ;;  %v4399_v55 = vrot.slane %v4397_v56, 3  ;;  %v2305_v25 = vrot.slane %v7592_v60, 1  ;;  %v7036_v60 = vld [vmem:[%s7533_s21 + $0x200] ss:$8 sps:$4 sm:$0xff]  }
 0x1ea   : > { %v4442_v56 = vshll.u32 %v8050_v48, 16 }
 0x1ed   : > { %1986 = vmatmul.mubr.bf16.gmra.mrb[32].mxu1 %v1756_v5  ;;  %v4365_v5 = vsel %vm4330_vm4, %v4355_v29, %v4364_v51 }
 0x1ee   : > { %4227 = vmatmul.mubr.bf16.gmra.mrb[68].mxu0 %v3925_v53  ;;  %1995 = vmatprep.mubr.bf16.mxu1 %v7140_v16  ;;  %v4369_v53 = vrot.slane %v4367_v40, 2 }
 0x1ef   : > { %4631 = vmatprep.mubr.bf16.mxu0 %v7140_v16 }
 0x1f0   : > { %v4373_v9 = vor.u32 %v4372_v54, %v4369_v53 }
 0x1f5   : > { %1996 = vmatmul.mubr.bf16.gmra.mrb[36].mxu1 %v1758_v31  ;;  %v1764_v31 = vsel %vm1737_vm3, %v1761_v50, %v1763_v22  ;;  %v1768_v50 = vsel %vm1737_vm3, %v1765_v26, %v1767_v20 }
 0x1f6   : > { %4632 = vmatmul.mubr.bf16.vlgmr.msra.gmra.mrb[0].mxu0 %v4347_v35  ;;  %2005 = vmatprep.mubr.bf16.mxu1 %v7140_v16  ;;  %v4374_v35 = vsel %vm4330_vm4, %v4364_v51, %v4373_v9 }
 0x1f7   : > { %5042 = vmatpush1.bf16.msra.mxu0 %v6983_v21  ;;  %4641 = vmatprep.mubr.bf16.mxu0 %v7140_v16  ;;  %v4378_v21 = vrot.slane %v4376_v30, 2 }
 0x1f8   : > { %5043 = vmatprep.subr.bf16.mxu0 %v6991_v24  ;;  %v7015_v24 = vld [vmem:[%s7533_s21 + $0x474] ss:$8 sps:$4 sm:$0xff]  }
 0x1f9   : > { %v4382_v29 = vor.u32 %v4381_v63, %v4378_v21 }
 0x1fb   : > { %5044 = vmatpush1.bf16.msra.mxu0 %v6989_v34  ;;  %v7013_v34 = vld [vmem:[%s7533_s21 + $0x470] ss:$8 sps:$4 sm:$0xff]  }
 0x1fc   : > { %5045 = vmatprep.subr.bf16.mxu0 %v6997_v3  ;;  %v1766_v3 = vsel %vm1737_vm3, %v1763_v22, %v1765_v26  ;;  %v4415_v22 = vshll.u32 %v8017_v19, 16 }
 0x1fd   : > { %2006 = vmatmul.mubr.bf16.gmra.mrb[40].mxu1 %v1760_v46  ;;  %v4383_v46 = vsel %vm4330_vm4, %v4373_v9, %v4382_v29 }
 0x1fe   : > { %4642 = vmatmul.mubr.bf16.gmra.mrb[4].mxu0 %v4356_v37  ;;  %2015 = vmatprep.mubr.bf16.mxu1 %v7140_v16  ;;  %v4387_v37 = vrot.slane %v4385_v33, 2  ;;  %v4430_v33 = vshrl.u32 %v8038_v38, 16 }
 0x1ff   : > { %4651 = vmatprep.mubr.bf16.mxu0 %v7140_v16  ;;  %5046 = vmatpush1.bf16.msra.mxu0 %v6995_v47 }
 0x200   : > { %5047 = vmatprep.subr.bf16.mxu0 %v7003_v49  ;;  %v4391_v47 = vor.u32 %v4390_v42, %v4387_v37  ;;  %v4394_v49 = vshrl.u32 %v8001_v11, 16  ;;  %v4435_v37 = vrot.slane %v4433_v18, 3  ;;  %v7037_v42 = vld [vmem:[%s7562_s26 + $0x18] sm:$0xff]   ;;  %v7051_v18 = vld [vmem:[%s7562_s26 + $0x30] sm:$0xff]  }
 0x202   : > { %v4392_v51 = vsel %vm4330_vm4, %v4382_v29, %v4391_v47  ;;  %v4396_v40 = vrot.slane %v4394_v49, 2  ;;  %v4439_v49 = vshrl.u32 %v8050_v48, 16 }
 0x203   : > { %5048 = vmatpush1.bf16.msra.mxu0 %v7001_v57  ;;  %v1769_v57 = vrot.slane %v7822_v62, 1 }
 0x204   : > { %5049 = vmatprep.subr.bf16.mxu0 %v7006_v61  ;;  %v4400_v45 = vor.u32 %v4399_v55, %v4396_v40  ;;  %v4403_v61 = vshrl.u32 %v8009_v14, 16  ;;  %v4441_v55 = vrot.slane %v4439_v49, 2 }
 0x205   : > { %2016 = vmatmul.mubr.bf16.gmra.mrb[44].mxu1 %v1762_v59  ;;  %v4406_v59 = vshll.u32 %v8009_v14, 16 }
 0x206   : > { %4652 = vmatmul.mubr.bf16.gmra.mrb[8].mxu0 %v4365_v5  ;;  %2025 = vmatprep.mubr.bf16.mxu1 %v7140_v16  ;;  %v1770_v5 = vsel %vm1737_vm3, %v1767_v20, %v1769_v57  ;;  %v4401_v53 = vsel %vm4330_vm4, %v4391_v47, %v4400_v45  ;;  %v4405_v54 = vrot.slane %v4403_v61, 2  ;;  %v2308_v20 = vrot.slane %v7037_v42, 1  ;;  %v7040_v61 = vld [vmem:[%s7533_s21 + $0x224] ss:$8 sps:$4 sm:$0xff]   ;;  %v7053_v42 = vld [vmem:[%s7533_s21 + $0x274] ss:$8 sps:$4 sm:$0xff]  }
 0x207   : > { %4661 = vmatprep.mubr.bf16.mxu0 %v7140_v16  ;;  %5050 = vmatpush1.bf16.msra.mxu0 %v7004_v2  ;;  %v4408_v2 = vrot.slane %v4406_v59, 3  ;;  %v7041_v59 = vld [vmem:[%s7562_s26 + $0x20] sm:$0xff]  }
 0x208   : > { %5051 = vmatprep.subr.bf16.mxu0 %v7009_v4  ;;  %v1771_v4 = vrot.slane %v7832_v7, 1  ;;  %v1773_v7 = vrot.slane %v7842_v15, 1  ;;  %v7035_v15 = vld [vmem:[%s7562_s26 + $0x10] sm:$0xff]  }
 0x209   : > { %v4409_v62 = vor.u32 %v4408_v2, %v4405_v54  ;;  %v2306_v26 = vrot.slane %v7035_v15, 1  ;;  %v4448_v54 = vshrl.u32 %v8063_v58, 16  ;;  %v4451_v2 = vshll.u32 %v8063_v58, 16 }
 0x20a   : > { %v1772_v9 = vsel %vm1737_vm3, %v1769_v57, %v1771_v4  ;;  %v1774_v21 = vsel %vm1737_vm3, %v1771_v4, %v1773_v7  ;;  %v4444_v57 = vrot.slane %v4442_v56, 3  ;;  %v7042_v4 = vld [vmem:[%s7533_s21 + $0x220] ss:$8 sps:$4 sm:$0xff]  }
 0x20b   : > { %5052 = vmatpush1.bf16.msra.mxu0 %v7007_v10  ;;  %v4410_v30 = vsel %vm4330_vm4, %v4400_v45, %v4409_v62  ;;  %v4417_v10 = vrot.slane %v4415_v22, 3  ;;  %v7039_v45 = vld [vmem:[%s7533_s21 + $0x210] ss:$8 sps:$4 sm:$0xff]   ;;  %v7046_v7 = vld [vmem:[%s7562_s26 + $0x28] sm:$0xff]  }
 0x20c   : > { %5053 = vmatprep.subr.bf16.mxu0 %v7012_v13 }
 0x20d   : > { %2026 = vmatmul.mubr.bf16.gmra.mrb[48].mxu1 %v1764_v31  ;;  %v4418_v13 = vor.u32 %v4417_v10, %v4414_v12  ;;  %v4421_v31 = vshrl.u32 %v8027_v27, 16  ;;  %v7044_v12 = vld [vmem:[%s7533_s21 + $0x230] ss:$8 sps:$4 sm:$0xff]   ;;  %v7045_v10 = vld [vmem:[%s7533_s21 + $0x244] ss:$8 sps:$4 sm:$0xff]  }
 0x20e   : > { %4662 = vmatmul.mubr.bf16.gmra.mrb[12].mxu0 %v4374_v35  ;;  %2035 = vmatprep.mubr.bf16.mxu1 %v7140_v16  ;;  %v4424_v35 = vshll.u32 %v8027_v27, 16 }
 0x20f   : > { %4671 = vmatprep.mubr.bf16.mxu0 %v7140_v16  ;;  %5054 = vmatpush1.bf16.msra.mxu0 %v7010_v17  ;;  %v4419_v63 = vsel %vm4330_vm4, %v4409_v62, %v4418_v13  ;;  %v4423_v17 = vrot.slane %v4421_v31, 2  ;;  %v7043_v62 = vld [vmem:[%s7533_s21 + $0x234] ss:$8 sps:$4 sm:$0xff]  }
 0x210   : > { %5055 = vmatprep.subr.bf16.mxu0 %v7015_v24  ;;  %v4426_v24 = vrot.slane %v4424_v35, 3  ;;  %v4457_v35 = vshrl.u32 %v8076_v0, 16 }
 0x212   : > { %v4427_v29 = vor.u32 %v4426_v24, %v4423_v17  ;;  %v7048_v17 = vld [vmem:[%s7533_s21 + $0x254] ss:$8 sps:$4 sm:$0xff]   ;;  %v4459_v15 = vrot.slane %v4457_v35, 2 }
 0x213   : > { %5056 = vmatpush1.bf16.msra.mxu0 %v7013_v34  ;;  %v2307_v34 = vsel %vm1737_vm3, %v2305_v25, %v2306_v26 }
 0x215   : > { %2036 = vmatmul.mubr.bf16.gmra.mrb[52].mxu1 %v1766_v3  ;;  %v4428_v3 = vsel %vm4330_vm4, %v4418_v13, %v4427_v29  ;;  %v2312_v13 = vrot.slane %v7046_v7, 1  ;;  %v7057_v7 = vld [vmem:[%s7562_s26 + $0x48] sm:$0xff]  }
 0x216   : > { %4672 = vmatmul.mubr.bf16.gmra.mrb[16].mxu0 %v4383_v46  ;;  %2045 = vmatprep.mubr.bf16.mxu1 %v7140_v16  ;;  %v4432_v46 = vrot.slane %v4430_v33, 2  ;;  %v7050_v33 = vld [vmem:[%s7533_s21 + $0x264] ss:$8 sps:$4 sm:$0xff]  }
 0x217   : > { %4681 = vmatprep.mubr.bf16.mxu0 %v7140_v16 }
 0x218   : > { %v4436_v47 = vor.u32 %v4435_v37, %v4432_v46  ;;  %v4466_v46 = vshrl.u32 %v8088_v23, 16  ;;  %v4469_v37 = vshll.u32 %v8088_v23, 16 }
 0x21a   : > { %v4437_v40 = vsel %vm4330_vm4, %v4427_v29, %v4436_v47  ;;  %v7049_v29 = vld [vmem:[%s7533_s21 + $0x250] ss:$8 sps:$4 sm:$0xff]   ;;  %v4468_v49 = vrot.slane %v4466_v46, 2  ;;  %v4471_v56 = vrot.slane %v4469_v37, 3 }
 0x21b   : > { %v8288_v46 = vld [vmem:[%s7562_s26 + $0x58] sm:$0xff]  }
 0x21c   : > { %v2324_v37 = vrot.slane %v8288_v46, 1 }
 0x21d   : > { %2046 = vmatmul.mubr.bf16.gmra.mrb[56].mxu1 %v1768_v50  ;;  %v7038_v50 = vld [vmem:[%s7533_s21 + $0x214] ss:$8 sps:$4 sm:$0xff]  }
 0x21e   : > { %4682 = vmatmul.mubr.bf16.gmra.mrb[20].mxu0 %v4392_v51  ;;  %2055 = vmatprep.mubr.bf16.mxu1 %v7140_v16  ;;  %v2309_v51 = vsel %vm1737_vm3, %v2306_v26, %v2308_v20 }
 0x21f   : > { %4691 = vmatprep.mubr.bf16.mxu0 %v7140_v16 }
 0x225   : > { %2056 = vmatmul.mubr.bf16.gmra.mrb[60].mxu1 %v1770_v5  ;;  %v2310_v5 = vrot.slane %v7041_v59, 1 }
 0x226   : > { %4692 = vmatmul.mubr.bf16.gmra.mrb[24].mxu0 %v4401_v53  ;;  %2065 = vmatprep.mubr.bf16.mxu1 %v7140_v16  ;;  %v4445_v53 = vor.u32 %v4444_v57, %v4441_v55  ;;  %v4472_v55 = vor.u32 %v4471_v56, %v4468_v49  ;;  %v4475_v57 = vshrl.u32 %v8098_v44, 16  ;;  %v4909_v56 = vrot.slane %v7946_v36, 3 }
 0x227   : > { %4701 = vmatprep.mubr.bf16.mxu0 %v7140_v16  ;;  %v2311_v6 = vsel %vm1737_vm3, %v2308_v20, %v2310_v5  ;;  %v2313_v24 = vsel %vm1737_vm3, %v2310_v5, %v2312_v13 }
 0x228   : > { %v4446_v22 = vsel %vm4330_vm4, %v4436_v47, %v4445_v53  ;;  %v4477_v5 = vrot.slane %v4475_v57, 2 }
 0x22d   : > { %2066 = vmatmul.mubr.bf16.gmra.mrb[64].mxu1 %v1772_v9  ;;  %v4450_v9 = vrot.slane %v4448_v54, 2  ;;  %v7056_v54 = vld [vmem:[%s7562_s26 + $0x40] sm:$0xff]  }
 0x22e   : > { %4702 = vmatmul.mubr.bf16.gmra.mrb[28].mxu0 %v4410_v30  ;;  %2075 = vmatprep.mubr.bf16.mxu1 %v7140_v16  ;;  %v4453_v30 = vrot.slane %v4451_v2, 3  ;;  %v2318_v2 = vrot.slane %v7056_v54, 1 }
 0x22f   : > { %4711 = vmatprep.mubr.bf16.mxu0 %v7140_v16 }
 0x230   : > { %v4454_v31 = vor.u32 %v4453_v30, %v4450_v9 }
 0x232   : > { %v4455_v25 = vsel %vm4330_vm4, %v4445_v53, %v4454_v31 }
 0x235   : > { %2076 = vmatmul.mubr.bf16.gmra.mrb[68].mxu1 %v1774_v21  ;;  %v4460_v21 = vshll.u32 %v8076_v0, 16 }
 0x236   : > { %4712 = vmatmul.mubr.bf16.gmra.mrb[32].mxu0 %v4419_v63  ;;  %2472 = vmatprep.mubr.bf16.mxu1 %v7140_v16  ;;  %v7047_v63 = vld [vmem:[%s7533_s21 + $0x240] ss:$8 sps:$4 sm:$0xff]  }
 0x237   : > { %4721 = vmatprep.mubr.bf16.mxu0 %v7140_v16  ;;  %v4462_v26 = vrot.slane %v4460_v21, 3 }
 0x23d   : > { %2473 = vmatmul.mubr.bf16.vlgmr.msra.gmra.mrb[0].mxu1 %v2307_v34  ;;  %v2314_v34 = vrot.slane %v7051_v18, 1 }
 0x23e   : > { %4722 = vmatmul.mubr.bf16.gmra.mrb[36].mxu0 %v4428_v3  ;;  %6079 = vmatpush1.bf16.msra.mxu1 %v7036_v60  ;;  %v4463_v3 = vor.u32 %v4462_v26, %v4459_v15  ;;  %v7052_v60 = vld [vmem:[%s7533_s21 + $0x260] ss:$8 sps:$4 sm:$0xff]   ;;  %v7058_v15 = vld [vmem:[%s7562_s26 + $0x50] sm:$0xff]  }
 0x23f   : > { %2482 = vmatprep.mubr.bf16.mxu1 %v7140_v16  ;;  %4731 = vmatprep.mubr.bf16.mxu0 %v7140_v16  ;;  %v2315_v20 = vsel %vm1737_vm3, %v2312_v13, %v2314_v34  ;;  %v2320_v13 = vrot.slane %v7057_v7, 1  ;;  %v2322_v26 = vrot.slane %v7058_v15, 1  ;;  %v4919_v7 = vrot.slane %v8001_v11, 3 }
 0x240   : > { %6072 = vmatprep.subr.bf16.mxu1 %v7038_v50  ;;  %v4464_v47 = vsel %vm4330_vm4, %v4454_v31, %v4463_v3  ;;  %v7054_v50 = vld [vmem:[%s7533_s21 + $0x270] ss:$8 sps:$4 sm:$0xff]   ;;  %v4473_v59 = vsel %vm4330_vm4, %v4463_v3, %v4472_v55  ;;  %v2837_v15 = vshrl.u32 %v8288_v46, 16 }
 0x241   : > { %v2323_v18 = vsel %vm1737_vm3, %v2320_v13, %v2322_v26 }
 0x242   : > { %6080 = vmatpush1.bf16.msra.mxu1 %v7039_v45  ;;  %v4478_v45 = vshll.u32 %v8098_v44, 16 }
 0x243   : > { %6073 = vmatprep.subr.bf16.mxu1 %v7040_v61 }
 0x244   : > { %v4480_v53 = vrot.slane %v4478_v45, 3  ;;  %v8315_v45 = vld [vmem:[%s7562_s26 + $0x70] sm:$0xff]  }
 0x245   : > { %2483 = vmatmul.mubr.bf16.gmra.mrb[4].mxu1 %v2309_v51  ;;  %v7055_v51 = vld [vmem:[%s7562_s26 + $0x38] sm:$0xff]  }
 0x246   : > { %4732 = vmatmul.mubr.bf16.gmra.mrb[40].mxu0 %v4437_v40  ;;  %2492 = vmatprep.mubr.bf16.mxu1 %v7140_v16  ;;  %v2316_v40 = vrot.slane %v7055_v51, 1  ;;  %v8306_v51 = vld [vmem:[%s7562_s26 + $0x68] sm:$0xff]  }
 0x247   : > { %4741 = vmatprep.mubr.bf16.mxu0 %v7140_v16  ;;  %6081 = vmatpush1.bf16.msra.mxu1 %v7042_v4  ;;  %v4481_v4 = vor.u32 %v4480_v53, %v4477_v5  ;;  %v8324_v53 = vld [vmem:[%s7562_s26 + $0x78] sm:$0xff]  }
 0x248   : > { %6074 = vmatprep.subr.bf16.mxu1 %v7043_v62  ;;  %v2317_v61 = vsel %vm1737_vm3, %v2314_v34, %v2316_v40  ;;  %v4484_v62 = vshrl.u32 %v8107_v41, 16  ;;  %v2332_v54 = vrot.slane %v8324_v53, 1 }
 0x249   : > { %v4482_v9 = vsel %vm4330_vm4, %v4472_v55, %v4481_v4  ;;  %v4911_v55 = vrot.slane %v7957_v43, 3 }
 0x24a   : > { %v4486_v30 = vrot.slane %v4484_v62, 2  ;;  %v8333_v62 = vld [vmem:[%s7562_s26 + $0x80] sm:$0xff]  }
 0x24b   : > { %6082 = vmatpush1.bf16.msra.mxu1 %v7044_v12  ;;  %v4912_v57 = vsel %vm4905_vm5, %v4909_v56, %v4911_v55 }
 0x24c   : > { %6075 = vmatprep.subr.bf16.mxu1 %v7045_v10  ;;  %v8269_v10 = vld [vmem:[%s7562_s26 + $0xa0] ss:$0 sps:$4 sm:$0x77]  }
 0x24d   : > { %2493 = vmatmul.mubr.bf16.gmra.mrb[8].mxu1 %v2311_v6  ;;  %v4487_v6 = vshll.u32 %v8107_v41, 16  ;;  %v4493_v35 = vshrl.u32 %v8269_v10, 16  ;;  %v4496_v21 = vshll.u32 %v8269_v10, 16 }
 0x24e   : > { %4742 = vmatmul.mubr.bf16.gmra.mrb[44].mxu0 %v4446_v22  ;;  %2502 = vmatprep.mubr.bf16.mxu1 %v7140_v16  ;;  %v2319_v22 = vsel %vm1737_vm3, %v2316_v40, %v2318_v2  ;;  %v2328_v40 = vrot.slane %v8306_v51, 1 }
 0x24f   : > { %4751 = vmatprep.mubr.bf16.mxu0 %v7140_v16  ;;  %6083 = vmatpush1.bf16.msra.mxu1 %v7047_v63  ;;  %v4489_v12 = vrot.slane %v4487_v6, 3  ;;  %v2321_v63 = vsel %vm1737_vm3, %v2318_v2, %v2320_v13  ;;  %v4915_v2 = vrot.slane %v7981_v1, 3  ;;  %v2334_v6 = vrot.slane %v8333_v62, 1 }
 0x250   : > { %6076 = vmatprep.subr.bf16.mxu1 %v7048_v17 }
 0x251   : > { %v4490_v31 = vor.u32 %v4489_v12, %v4486_v30  ;;  %v2335_v1 = vsel %vm1737_vm3, %v2332_v54, %v2334_v6  ;;  %v8342_v30 = vld [vmem:[%s7562_s26 + $0x88] sm:$0xff]  }
 0x252   : > { %v2336_v12 = vrot.slane %v8342_v30, 1 }
 0x253   : > { %6084 = vmatpush1.bf16.msra.mxu1 %v7049_v29  ;;  %v4491_v17 = vsel %vm4330_vm4, %v4481_v4, %v4490_v31 }
 0x254   : > { %6077 = vmatprep.subr.bf16.mxu1 %v7050_v33  ;;  %v4884_v33 = vld [vmem:[%s7562_s26 + $0x10] sm:$0x8] }
 0x255   : > { %2503 = vmatmul.mubr.bf16.gmra.mrb[12].mxu1 %v2313_v24  ;;  %v4495_v24 = vrot.slane %v4493_v35, 2  ;;  %v6049_v3 = vcombine.low %v4884_v33, %v7929_v28  ;;  %v2839_v33 = vrot.slane %v2837_v15, 1 }
 0x256   : > { %4752 = vmatmul.mubr.bf16.gmra.mrb[48].mxu0 %v4455_v25  ;;  %2512 = vmatprep.mubr.bf16.mxu1 %v7140_v16  ;;  %v4498_v25 = vrot.slane %v4496_v21, 3  ;;  %v4921_v21 = vrot.slane %v8009_v14, 3 }
 0x257   : > { %4761 = vmatprep.mubr.bf16.mxu0 %v7140_v16  ;;  %6085 = vmatpush1.bf16.msra.mxu1 %v7052_v60  ;;  %v4906_v60 = vrot.slane %v6049_v3, 3  ;;  %v4925_v3 = vrot.slane %v8027_v27, 3  ;;  %v4927_v27 = vrot.slane %v8038_v38, 3  ;;  %v2864_v38 = vshrl.u32 %v8315_v45, 16 }
 0x258   : > { %6078 = vmatprep.subr.bf16.mxu1 %v7053_v42  ;;  %v4499_v29 = vor.u32 %v4498_v25, %v4495_v24  ;;  %v4907_v42 = vrot.slane %v7936_v32, 3  ;;  %v4922_v11 = vsel %vm4905_vm5, %v4919_v7, %v4921_v21  ;;  %v4923_v25 = vrot.slane %v8017_v19, 3 }
 0x25a   : > { %v4500_v34 = vsel %vm4330_vm4, %v4490_v31, %v4499_v29  ;;  %v4908_v28 = vsel %vm4905_vm5, %v4906_v60, %v4907_v42  ;;  %v8351_v31 = vld [vmem:[%s7562_s26 + $0x90] sm:$0xff]   ;;  %v4924_v29 = vsel %vm4905_vm5, %v4921_v21, %v4923_v25  ;;  %v4926_v60 = vsel %vm4905_vm5, %v4923_v25, %v4925_v3 }
 0x25b   : > { %6086 = vmatpush1.bf16.msra.mxu1 %v7054_v50  ;;  %v4910_v50 = vsel %vm4905_vm5, %v4907_v42, %v4909_v56  ;;  %v2338_v35 = vrot.slane %v8351_v31, 1 }
 0x25d   : > { %2513 = vmatmul.mubr.bf16.gmra.mrb[16].mxu1 %v2315_v20  ;;  %v2325_v20 = vsel %vm1737_vm3, %v2322_v26, %v2324_v37  ;;  %v2840_v26 = vshll.u32 %v8288_v46, 16 }
 0x25e   : > { %4762 = vmatmul.mubr.bf16.gmra.mrb[52].mxu0 %v4464_v47  ;;  %2522 = vmatprep.mubr.bf16.mxu1 %v7140_v16  ;;  %v8297_v47 = vld [vmem:[%s7562_s26 + $0x60] sm:$0xff]  }
 0x25f   : > { %4771 = vmatprep.mubr.bf16.mxu0 %v7140_v16  ;;  %v2326_v49 = vrot.slane %v8297_v47, 1  ;;  %v2846_v19 = vshrl.u32 %v8297_v47, 16 }
 0x261   : > { %v2327_v32 = vsel %vm1737_vm3, %v2324_v37, %v2326_v49  ;;  %v2329_v36 = vsel %vm1737_vm3, %v2326_v49, %v2328_v40  ;;  %v2849_v37 = vshll.u32 %v8297_v47, 16  ;;  %v2848_v42 = vrot.slane %v2846_v19, 1 }
 0x262   : > { %v2855_v49 = vshrl.u32 %v8306_v51, 16  ;;  %v2858_v47 = vshll.u32 %v8306_v51, 16 }
 0x265   : > { %2523 = vmatmul.mubr.bf16.gmra.mrb[20].mxu1 %v2317_v61  ;;  %v2330_v61 = vrot.slane %v8315_v45, 1 }
 0x266   : > { %4772 = vmatmul.mubr.bf16.gmra.mrb[56].mxu0 %v4473_v59  ;;  %2532 = vmatprep.mubr.bf16.mxu1 %v7140_v16  ;;  %v4913_v59 = vrot.slane %v7969_v52, 3 }
 0x267   : > { %4781 = vmatprep.mubr.bf16.mxu0 %v7140_v16  ;;  %v2331_v43 = vsel %vm1737_vm3, %v2328_v40, %v2330_v61  ;;  %v2333_v52 = vsel %vm1737_vm3, %v2330_v61, %v2332_v54  ;;  %v2866_v61 = vrot.slane %v2864_v38, 1  ;;  %v2876_v54 = vshll.u32 %v8324_v53, 16 }
 0x268   : > { %v4914_v5 = vsel %vm4905_vm5, %v4911_v55, %v4913_v59  ;;  %v4916_v4 = vsel %vm4905_vm5, %v4913_v59, %v4915_v2  ;;  %v4929_v55 = vrot.slane %v8050_v48, 3  ;;  %v2873_v48 = vshrl.u32 %v8324_v53, 16 }
 0x26d   : > { %2533 = vmatmul.mubr.bf16.gmra.mrb[24].mxu1 %v2319_v22  ;;  %v4917_v22 = vrot.slane %v7993_v8, 3  ;;  %v2337_v8 = vsel %vm1737_vm3, %v2334_v6, %v2336_v12 }
 0x26e   : > { %4782 = vmatmul.mubr.bf16.gmra.mrb[60].mxu0 %v4482_v9  ;;  %2542 = vmatprep.mubr.bf16.mxu1 %v7140_v16 }
 0x26f   : > { %4791 = vmatprep.mubr.bf16.mxu0 %v7140_v16  ;;  %v4918_v9 = vsel %vm4905_vm5, %v4915_v2, %v4917_v22  ;;  %v4920_v13 = vsel %vm4905_vm5, %v4917_v22, %v4919_v7  ;;  %v4933_v22 = vrot.slane %v8076_v0, 3  ;;  %v2891_v0 = vshrl.u32 %v8342_v30, 16 }
 0x275   : > { %2543 = vmatmul.mubr.bf16.gmra.mrb[28].mxu1 %v2321_v63  ;;  %v2339_v63 = vsel %vm1737_vm3, %v2336_v12, %v2338_v35 }
 0x276   : > { %4792 = vmatmul.mubr.bf16.gmra.mrb[64].mxu0 %v4491_v17  ;;  %2552 = vmatprep.mubr.bf16.mxu1 %v7140_v16  ;;  %v7018_v17 = vld [vmem:[%s7562_s26 + $0x98] ss:$0 sps:$4 sm:$0x11]  }
 0x277   : > { %4801 = vmatprep.mubr.bf16.mxu0 %v7140_v16  ;;  %v2340_v24 = vrot.slane %v7018_v17, 1 }
 0x279   : > { %v2341_v14 = vsel %vm1737_vm3, %v2338_v35, %v2340_v24  ;;  %v2894_v35 = vshll.u32 %v8342_v30, 16  ;;  %v2900_v24 = vshrl.u32 %v8351_v31, 16  ;;  %v2903_v30 = vshll.u32 %v8351_v31, 16 }
 0x27d   : > { %2553 = vmatmul.mubr.bf16.gmra.mrb[32].mxu1 %v2323_v18  ;;  %v2842_v18 = vrot.slane %v2840_v26, 2  ;;  %v2902_v26 = vrot.slane %v2900_v24, 1 }
 0x27e   : > { %4802 = vmatmul.mubr.bf16.gmra.mrb[68].mxu0 %v4500_v34  ;;  %2562 = vmatprep.mubr.bf16.mxu1 %v7140_v16 }
 0x27f   : > { %5073 = vmatprep.mubr.bf16.mxu0 %v7140_v16  ;;  %v2843_v34 = vor.u32 %v2842_v18, %v2839_v33  ;;  %v4939_v33 = vrot.slane %v8107_v41, 3 }
 0x281   : > { %v2844_v46 = vsel %vm2746_vm1, %v7740_v39, %v2843_v34  ;;  %v4928_v39 = vsel %vm4905_vm5, %v4925_v3, %v4927_v27 }
 0x285   : > { %2563 = vmatmul.mubr.bf16.gmra.mrb[36].mxu1 %v2325_v20  ;;  %v2851_v20 = vrot.slane %v2849_v37, 2 }
 0x286   : > { %5074 = vmatmul.mubr.bf16.vlgmr.msra.gmra.mrb[0].mxu0 %v4908_v28  ;;  %2572 = vmatprep.mubr.bf16.mxu1 %v7140_v16 }
 0x287   : > { %5083 = vmatprep.mubr.bf16.mxu0 %v7140_v16  ;;  %v2852_v28 = vor.u32 %v2851_v20, %v2848_v42 }
 0x289   : > { %v2853_v56 = vsel %vm2746_vm1, %v2843_v34, %v2852_v28 }
 0x28d   : > { %2573 = vmatmul.mubr.bf16.gmra.mrb[40].mxu1 %v2327_v32  ;;  %v2857_v32 = vrot.slane %v2855_v49, 1 }
 0x28e   : > { %5084 = vmatmul.mubr.bf16.gmra.mrb[4].mxu0 %v4910_v50  ;;  %2582 = vmatprep.mubr.bf16.mxu1 %v7140_v16  ;;  %v2860_v50 = vrot.slane %v2858_v47, 2 }
 0x28f   : > { %5093 = vmatprep.mubr.bf16.mxu0 %v7140_v16 }
 0x290   : > { %v2861_v40 = vor.u32 %v2860_v50, %v2857_v32 }
 0x292   : > { %v2862_v51 = vsel %vm2746_vm1, %v2852_v28, %v2861_v40 }
 0x295   : > { %2583 = vmatmul.mubr.bf16.gmra.mrb[44].mxu1 %v2329_v36  ;;  %v2867_v36 = vshll.u32 %v8315_v45, 16 }
 0x296   : > { %5094 = vmatmul.mubr.bf16.gmra.mrb[8].mxu0 %v4912_v57  ;;  %2592 = vmatprep.mubr.bf16.mxu1 %v7140_v16  ;;  %v4930_v57 = vsel %vm4905_vm5, %v4927_v27, %v4929_v55 }
 0x297   : > { %5103 = vmatprep.mubr.bf16.mxu0 %v7140_v16  ;;  %v2869_v59 = vrot.slane %v2867_v36, 2 }
 0x29d   : > { %2593 = vmatmul.mubr.bf16.gmra.mrb[48].mxu1 %v2331_v43  ;;  %v2870_v43 = vor.u32 %v2869_v59, %v2866_v61 }
 0x29e   : > { %5104 = vmatmul.mubr.bf16.gmra.mrb[12].mxu0 %v4914_v5  ;;  %2602 = vmatprep.mubr.bf16.mxu1 %v7140_v16  ;;  %v4931_v5 = vrot.slane %v8063_v58, 3  ;;  %v2882_v58 = vshrl.u32 %v8333_v62, 16 }
 0x29f   : > { %5113 = vmatprep.mubr.bf16.mxu0 %v7140_v16  ;;  %v2871_v45 = vsel %vm2746_vm1, %v2861_v40, %v2870_v43 }
 0x2a0   : > { %v4932_v2 = vsel %vm4905_vm5, %v4929_v55, %v4931_v5  ;;  %v2884_v12 = vrot.slane %v2882_v58, 1 }
 0x2a5   : > { %2603 = vmatmul.mubr.bf16.gmra.mrb[52].mxu1 %v2333_v52  ;;  %v2875_v52 = vrot.slane %v2873_v48, 1 }
 0x2a6   : > { %5114 = vmatmul.mubr.bf16.gmra.mrb[16].mxu0 %v4916_v4  ;;  %2612 = vmatprep.mubr.bf16.mxu1 %v7140_v16  ;;  %v2878_v4 = vrot.slane %v2876_v54, 2 }
 0x2a7   : > { %5123 = vmatprep.mubr.bf16.mxu0 %v7140_v16 }
 0x2a8   : > { %v2879_v6 = vor.u32 %v2878_v4, %v2875_v52 }
 0x2aa   : > { %v2880_v53 = vsel %vm2746_vm1, %v2870_v43, %v2879_v6 }
 0x2ad   : > { %2613 = vmatmul.mubr.bf16.gmra.mrb[56].mxu1 %v2335_v1  ;;  %v2885_v1 = vshll.u32 %v8333_v62, 16 }
 0x2ae   : > { %5124 = vmatmul.mubr.bf16.gmra.mrb[20].mxu0 %v4918_v9  ;;  %2622 = vmatprep.mubr.bf16.mxu1 %v7140_v16  ;;  %v4934_v9 = vsel %vm4905_vm5, %v4931_v5, %v4933_v22 }
 0x2af   : > { %5133 = vmatprep.mubr.bf16.mxu0 %v7140_v16  ;;  %v2887_v7 = vrot.slane %v2885_v1, 2 }
 0x2b5   : > { %2623 = vmatmul.mubr.bf16.gmra.mrb[60].mxu1 %v2337_v8  ;;  %v2888_v8 = vor.u32 %v2887_v7, %v2884_v12 }
 0x2b6   : > { %5134 = vmatmul.mubr.bf16.gmra.mrb[24].mxu0 %v4920_v13  ;;  %2632 = vmatprep.mubr.bf16.mxu1 %v7140_v16  ;;  %v4935_v13 = vrot.slane %v8088_v23, 3  ;;  %v4937_v23 = vrot.slane %v8098_v44, 3  ;;  %v7067_v44 = vld [vmem:[%s7562_s26 + $0x98] ss:$0 sps:$4 sm:$0x33]  }
 0x2b7   : > { %5143 = vmatprep.mubr.bf16.mxu0 %v7140_v16  ;;  %v2889_v62 = vsel %vm2746_vm1, %v2879_v6, %v2888_v8  ;;  %v2909_v18 = vshrl.u32 %v7067_v44, 16  ;;  %v2912_v34 = vshll.u32 %v7067_v44, 16 }
 0x2b8   : > { %v4936_v21 = vsel %vm4905_vm5, %v4933_v22, %v4935_v13  ;;  %v4938_v15 = vsel %vm4905_vm5, %v4935_v13, %v4937_v23  ;;  %v4940_v3 = vsel %vm4905_vm5, %v4937_v23, %v4939_v33 }
 0x2b9   : > { %v2911_v19 = vrot.slane %v2909_v18, 1  ;;  %v2914_v37 = vrot.slane %v2912_v34, 2 }
 0x2bd   : > { %2633 = vmatmul.mubr.bf16.gmra.mrb[64].mxu1 %v2339_v63  ;;  %v2893_v63 = vrot.slane %v2891_v0, 1 }
 0x2be   : > { %5144 = vmatmul.mubr.bf16.gmra.mrb[28].mxu0 %v4922_v11  ;;  %2642 = vmatprep.mubr.bf16.mxu1 %v7140_v16  ;;  %v2896_v11 = vrot.slane %v2894_v35, 2 }
 0x2bf   : > { %5153 = vmatprep.mubr.bf16.mxu0 %v7140_v16 }
 0x2c0   : > { %v2897_v17 = vor.u32 %v2896_v11, %v2893_v63 }
 0x2c2   : > { %v2898_v25 = vsel %vm2746_vm1, %v2888_v8, %v2897_v17 }
 0x2c5   : > { %2643 = vmatmul.mubr.bf16.gmra.mrb[68].mxu1 %v2341_v14  ;;  %v2905_v14 = vrot.slane %v2903_v30, 2 }
 0x2c6   : > { %5154 = vmatmul.mubr.bf16.gmra.mrb[32].mxu0 %v4924_v29  ;;  %3137 = vmatprep.mubr.bf16.mxu1 %v7140_v16 }
 0x2c7   : > { %5163 = vmatprep.mubr.bf16.mxu0 %v7140_v16  ;;  %v2906_v29 = vor.u32 %v2905_v14, %v2902_v26 }
 0x2c9   : > { %v2907_v31 = vsel %vm2746_vm1, %v2897_v17, %v2906_v29 }
 0x2cd   : > { %3138 = vmatmul.mubr.bf16.vlgmr.msra.gmra.mrb[36].mxu1 %v2844_v46  ;;  %v2915_v46 = vor.u32 %v2914_v37, %v2911_v19 }
 0x2ce   : > { %5164 = vmatmul.mubr.bf16.gmra.mrb[36].mxu0 %v4926_v60  ;;  %3147 = vmatprep.mubr.bf16.mxu1 %v7140_v16  ;;  %v4941_v60 = vrot.slane %v8269_v10, 3 }
 0x2cf   : > { %5173 = vmatprep.mubr.bf16.mxu0 %v7140_v16  ;;  %v2916_v41 = vsel %vm2746_vm1, %v2906_v29, %v2915_v46 }
 0x2d0   : > { %v4942_v42 = vsel %vm4905_vm5, %v4939_v33, %v4941_v60 }
 0x2d5   : > { %3148 = vmatmul.mubr.bf16.gmra.mrb[40].mxu1 %v2853_v56 }
 0x2d6   : > { %5174 = vmatmul.mubr.bf16.gmra.mrb[40].mxu0 %v4928_v39  ;;  %3157 = vmatprep.mubr.bf16.mxu1 %v7140_v16 }
 0x2d7   : > { %5183 = vmatprep.mubr.bf16.mxu0 %v7140_v16 }
 0x2dd   : > { %3158 = vmatmul.mubr.bf16.gmra.mrb[44].mxu1 %v2862_v51 }
 0x2de   : > { %5184 = vmatmul.mubr.bf16.gmra.mrb[44].mxu0 %v4930_v57  ;;  %3167 = vmatprep.mubr.bf16.mxu1 %v7140_v16 }
 0x2df   : > { %5193 = vmatprep.mubr.bf16.mxu0 %v7140_v16 }
 0x2e5   : > { %3168 = vmatmul.mubr.bf16.gmra.mrb[48].mxu1 %v2871_v45 }
 0x2e6   : > { %5194 = vmatmul.mubr.bf16.gmra.mrb[48].mxu0 %v4932_v2  ;;  %3177 = vmatprep.mubr.bf16.mxu1 %v7140_v16 }
 0x2e7   : > { %5203 = vmatprep.mubr.bf16.mxu0 %v7140_v16 }
 0x2ed   : > { %3178 = vmatmul.mubr.bf16.gmra.mrb[52].mxu1 %v2880_v53 }
 0x2ee   : > { %5204 = vmatmul.mubr.bf16.gmra.mrb[52].mxu0 %v4934_v9  ;;  %3187 = vmatprep.mubr.bf16.mxu1 %v7140_v16 }
 0x2ef   : > { %5213 = vmatprep.mubr.bf16.mxu0 %v7140_v16 }
 0x2f5   : > { %3188 = vmatmul.mubr.bf16.gmra.mrb[56].mxu1 %v2889_v62 }
 0x2f6   : > { %5214 = vmatmul.mubr.bf16.gmra.mrb[56].mxu0 %v4936_v21  ;;  %3197 = vmatprep.mubr.bf16.mxu1 %v7140_v16 }
 0x2f7   : > { %5223 = vmatprep.mubr.bf16.mxu0 %v7140_v16 }
 0x2fd   : > { %3198 = vmatmul.mubr.bf16.gmra.mrb[60].mxu1 %v2898_v25 }
 0x2fe   : > { %5224 = vmatmul.mubr.bf16.gmra.mrb[60].mxu0 %v4938_v15  ;;  %3207 = vmatprep.mubr.bf16.mxu1 %v7140_v16 }
 0x2ff   : > { %5233 = vmatprep.mubr.bf16.mxu0 %v7140_v16 }
 0x305   : > { %3208 = vmatmul.mubr.bf16.gmra.mrb[64].mxu1 %v2907_v31 }
 0x306   : > { %5234 = vmatmul.mubr.bf16.gmra.mrb[64].mxu0 %v4940_v3  ;;  %3217 = vmatprep.mubr.bf16.mxu1 %v7140_v16 }
 0x307   : > { %5243 = vmatprep.mubr.bf16.mxu0 %v7140_v16 }
 0x30d   : > { %3218 = vmatmul.mubr.bf16.gmra.mrb[68].mxu1 %v2916_v41 }
 0x30e   : > { %5244 = vmatmul.mubr.bf16.gmra.mrb[68].mxu0 %v4942_v42 }
 0x310   : > { %v2474_v20 = vpop.f32.mrb[0].mxu1 }
 0x311   : > { %v2476_v28 = vpop.f32.mrb[1].mxu1 }
 0x312   : > { %v2478_v27 = vpop.f32.mrb[2].mxu1 }
 0x313   : > { %v2480_v49 = vpop.f32.mrb[3].mxu1 }
 0x318   : > { %v2484_v47 = vpop.f32.mrb[4].mxu1 }
 0x319   : > { %v2486_v56 = vpop.f32.mrb[5].mxu1 }
 0x31a   : > { %v2488_v39 = vpop.f32.mrb[6].mxu1 }
 0x31b   : > { %v2490_v32 = vpop.f32.mrb[7].mxu1 }
 0x320   : > { %v8426_v50 = vpop.f32.mrb[8].mxu1 }
 0x321   : > { %v8428_v16 = vpop.f32.mrb[9].mxu1 }
 0x322   : > { %v8430_v40 = vpop.f32.mrb[10].mxu1 }
 0x323   : > { %v8432_v10 = vpop.f32.mrb[11].mxu1 }
 0x328   : > { %v8434_v55 = vpop.f32.mrb[12].mxu1 }
 0x329   : > { %v8436_v38 = vpop.f32.mrb[13].mxu1 }
 0x32a   : > { %v8438_v36 = vpop.f32.mrb[14].mxu1 }
 0x32b   : > { %v8440_v51 = vpop.f32.mrb[15].mxu1 }
 0x330   : > { %v8442_v57 = vpop.f32.mrb[16].mxu1 }
 0x331   : > { %v8444_v61 = vpop.f32.mrb[17].mxu1 }
 0x332   : > { %v8446_v59 = vpop.f32.mrb[18].mxu1 }
 0x333   : > { %v8448_v43 = vpop.f32.mrb[19].mxu1 }
 0x338   : > { %v8450_v5 = vpop.f32.mrb[20].mxu1 }
 0x339   : > { %v8452_v48 = vpop.f32.mrb[21].mxu1 }
 0x33a   : > { %v8454_v54 = vpop.f32.mrb[22].mxu1 }
 0x33b   : > { %v8456_v45 = vpop.f32.mrb[23].mxu1 }
 0x340   : > { %v8458_v2 = vpop.f32.mrb[24].mxu1 }
 0x341   : > { %v8460_v52 = vpop.f32.mrb[25].mxu1 }
 0x342   : > { %v8462_v4 = vpop.f32.mrb[26].mxu1 }
 0x343   : > { %v8464_v6 = vpop.f32.mrb[27].mxu1 }
 0x348   : > { %v8466_v22 = vpop.f32.mrb[28].mxu1 }
 0x349   : > { %v8468_v58 = vpop.f32.mrb[29].mxu1 }
 0x34a   : > { %v8470_v1 = vpop.f32.mrb[30].mxu1 }
 0x34b   : > { %v8472_v53 = vpop.f32.mrb[31].mxu1 }
 0x350   : > { %v8474_v9 = vpop.f32.mrb[32].mxu1 }
 0x351   : > { %v8476_v12 = vpop.f32.mrb[33].mxu1 }
 0x352   : > { %v8478_v7 = vpop.f32.mrb[34].mxu1 }
 0x353   : > { %v8480_v8 = vpop.f32.mrb[35].mxu1 }
 0x359   : > { %v5075_v13 = vpop.f32.mrb[0].mxu0 }
 0x35a   : > { %v6087_v0 = vadd.f32 %v5075_v13, %v2474_v20  ;;  %v5077_v35 = vpop.f32.mrb[1].mxu0 }
 0x35b   : > { %v6088_v62 = vadd.f32 %v5077_v35, %v2476_v28  ;;  %v5079_v21 = vpop.f32.mrb[2].mxu0 }
 0x35c   : > { %v5326_v63 = vmax.f32 %v6087_v0, 0.0  ;;  %v6089_v11 = vadd.f32 %v5079_v21, %v2478_v27  ;;  %v5081_v17 = vpop.f32.mrb[3].mxu0 }
 0x35d   : > { %v5327_v23 = vmax.f32 %v6088_v62, 0.0  ;;  %v6090_v24 = vadd.f32 %v5081_v17, %v2480_v49 }
 0x35e   : > { %5398 = vst [vmem:[%s8483_s3] sm:$0xff] %v5326_v63  ;;  %v5328_v30 = vmax.f32 %v6089_v11, 0.0 }
 0x35f   : > { %5399 = vst [vmem:[%s8483_s3 + $0x8] sm:$0xff] %v5327_v23  ;;  %v5329_v25 = vmax.f32 %v6090_v24, 0.0 }
 0x360   : > { %5400 = vst [vmem:[%s8483_s3 + $0x10] sm:$0xff] %v5328_v30 }
 0x361   : > { %5401 = vst [vmem:[%s8483_s3 + $0x18] sm:$0xff] %v5329_v25  ;;  %v5085_v15 = vpop.f32.mrb[4].mxu0 }
 0x362   : > { %v6091_v26 = vadd.f32 %v5085_v15, %v2484_v47  ;;  %v5087_v14 = vpop.f32.mrb[5].mxu0 }
 0x363   : > { %v6092_v29 = vadd.f32 %v5087_v14, %v2486_v56  ;;  %v5089_v33 = vpop.f32.mrb[6].mxu0 }
 0x364   : > { %v5330_v44 = vmax.f32 %v6091_v26, 0.0  ;;  %v6093_v18 = vadd.f32 %v5089_v33, %v2488_v39  ;;  %v5091_v34 = vpop.f32.mrb[7].mxu0 }
 0x365   : > { %v5331_v31 = vmax.f32 %v6092_v29, 0.0  ;;  %v6094_v3 = vadd.f32 %v5091_v34, %v2490_v32 }
 0x366   : > { %5402 = vst [vmem:[%s8483_s3 + $0x20] sm:$0xff] %v5330_v44  ;;  %v5332_v19 = vmax.f32 %v6093_v18, 0.0 }
 0x367   : > { %5403 = vst [vmem:[%s8483_s3 + $0x28] sm:$0xff] %v5331_v31  ;;  %v5333_v37 = vmax.f32 %v6094_v3, 0.0 }
 0x368   : > { %5404 = vst [vmem:[%s8483_s3 + $0x30] sm:$0xff] %v5332_v19 }
 0x369   : > { %5405 = vst [vmem:[%s8483_s3 + $0x38] sm:$0xff] %v5333_v37  ;;  %v5095_v46 = vpop.f32.mrb[8].mxu0 }
 0x36a   : > { %v6095_v60 = vadd.f32 %v5095_v46, %v8426_v50  ;;  %v5097_v41 = vpop.f32.mrb[9].mxu0 }
 0x36b   : > { %v6096_v42 = vadd.f32 %v5097_v41, %v8428_v16  ;;  %v5099_v20 = vpop.f32.mrb[10].mxu0 }
 0x36c   : > { %v5334_v28 = vmax.f32 %v6095_v60, 0.0  ;;  %v6097_v27 = vadd.f32 %v5099_v20, %v8430_v40  ;;  %v5101_v49 = vpop.f32.mrb[11].mxu0 }
 0x36d   : > { %v5335_v47 = vmax.f32 %v6096_v42, 0.0  ;;  %v6098_v56 = vadd.f32 %v5101_v49, %v8432_v10 }
 0x36e   : > { %5406 = vst [vmem:[%s8483_s3 + $0x40] sm:$0xff] %v5334_v28  ;;  %v5336_v39 = vmax.f32 %v6097_v27, 0.0 }
 0x36f   : > { %5407 = vst [vmem:[%s8483_s3 + $0x48] sm:$0xff] %v5335_v47  ;;  %v5337_v32 = vmax.f32 %v6098_v56, 0.0 }
 0x370   : > { %5408 = vst [vmem:[%s8483_s3 + $0x50] sm:$0xff] %v5336_v39 }
 0x371   : > { %5409 = vst [vmem:[%s8483_s3 + $0x58] sm:$0xff] %v5337_v32  ;;  %v5105_v50 = vpop.f32.mrb[12].mxu0 }
 0x372   : > { %v6099_v16 = vadd.f32 %v5105_v50, %v8434_v55  ;;  %v5107_v13 = vpop.f32.mrb[13].mxu0 }
 0x373   : > { %v6100_v40 = vadd.f32 %v5107_v13, %v8436_v38  ;;  %v5109_v0 = vpop.f32.mrb[14].mxu0 }
 0x374   : > { %v5338_v35 = vmax.f32 %v6099_v16, 0.0  ;;  %v6101_v10 = vadd.f32 %v5109_v0, %v8438_v36  ;;  %v5111_v62 = vpop.f32.mrb[15].mxu0 }
 0x375   : > { %v5339_v21 = vmax.f32 %v6100_v40, 0.0  ;;  %v6102_v63 = vadd.f32 %v5111_v62, %v8440_v51 }
 0x376   : > { %5410 = vst [vmem:[%s8483_s3 + $0x60] sm:$0xff] %v5338_v35  ;;  %v5340_v11 = vmax.f32 %v6101_v10, 0.0 }
 0x377   : > { %5411 = vst [vmem:[%s8483_s3 + $0x68] sm:$0xff] %v5339_v21  ;;  %v5341_v17 = vmax.f32 %v6102_v63, 0.0 }
 0x378   : > { %5412 = vst [vmem:[%s8483_s3 + $0x70] sm:$0xff] %v5340_v11 }
 0x379   : > { %5413 = vst [vmem:[%s8483_s3 + $0x78] sm:$0xff] %v5341_v17  ;;  %v5115_v55 = vpop.f32.mrb[16].mxu0 }
 0x37a   : > { %v6103_v38 = vadd.f32 %v5115_v55, %v8442_v57  ;;  %v5117_v23 = vpop.f32.mrb[17].mxu0 }
 0x37b   : > { %v6104_v36 = vadd.f32 %v5117_v23, %v8444_v61  ;;  %v5119_v24 = vpop.f32.mrb[18].mxu0 }
 0x37c   : > { %v5342_v30 = vmax.f32 %v6103_v38, 0.0  ;;  %v6105_v51 = vadd.f32 %v5119_v24, %v8446_v59  ;;  %v5121_v25 = vpop.f32.mrb[19].mxu0 }
 0x37d   : > { %v5343_v15 = vmax.f32 %v6104_v36, 0.0  ;;  %v6106_v26 = vadd.f32 %v5121_v25, %v8448_v43 }
 0x37e   : > { %5414 = vst [vmem:[%s8483_s3 + $0x80] sm:$0xff] %v5342_v30  ;;  %v5344_v14 = vmax.f32 %v6105_v51, 0.0 }
 0x37f   : > { %5415 = vst [vmem:[%s8483_s3 + $0x88] sm:$0xff] %v5343_v15  ;;  %v5345_v29 = vmax.f32 %v6106_v26, 0.0 }
 0x380   : > { %5416 = vst [vmem:[%s8483_s3 + $0x90] sm:$0xff] %v5344_v14 }
 0x381   : > { %5417 = vst [vmem:[%s8483_s3 + $0x98] sm:$0xff] %v5345_v29  ;;  %v5125_v57 = vpop.f32.mrb[20].mxu0 }
 0x382   : > { %v6107_v61 = vadd.f32 %v5125_v57, %v8450_v5  ;;  %v5127_v33 = vpop.f32.mrb[21].mxu0 }
 0x383   : > { %v6108_v59 = vadd.f32 %v5127_v33, %v8452_v48  ;;  %v5129_v44 = vpop.f32.mrb[22].mxu0 }
 0x384   : > { %v5346_v18 = vmax.f32 %v6107_v61, 0.0  ;;  %v6109_v43 = vadd.f32 %v5129_v44, %v8454_v54  ;;  %v5131_v34 = vpop.f32.mrb[23].mxu0 }
 0x385   : > { %v5347_v31 = vmax.f32 %v6108_v59, 0.0  ;;  %v6110_v3 = vadd.f32 %v5131_v34, %v8456_v45 }
 0x386   : > { %5418 = vst [vmem:[%s8483_s3 + $0xa0] sm:$0xff] %v5346_v18  ;;  %v5348_v19 = vmax.f32 %v6109_v43, 0.0 }
 0x387   : > { %5419 = vst [vmem:[%s8483_s3 + $0xa8] sm:$0xff] %v5347_v31  ;;  %v5349_v37 = vmax.f32 %v6110_v3, 0.0 }
 0x388   : > { %5420 = vst [vmem:[%s8483_s3 + $0xb0] sm:$0xff] %v5348_v19 }
 0x389   : > { %5421 = vst [vmem:[%s8483_s3 + $0xb8] sm:$0xff] %v5349_v37  ;;  %v5135_v5 = vpop.f32.mrb[24].mxu0 }
 0x38a   : > { %v6111_v48 = vadd.f32 %v5135_v5, %v8458_v2  ;;  %v5137_v46 = vpop.f32.mrb[25].mxu0 }
 0x38b   : > { %v6112_v54 = vadd.f32 %v5137_v46, %v8460_v52  ;;  %v5139_v60 = vpop.f32.mrb[26].mxu0 }
 0x38c   : > { %v5350_v41 = vmax.f32 %v6111_v48, 0.0  ;;  %v6113_v45 = vadd.f32 %v5139_v60, %v8462_v4  ;;  %v5141_v42 = vpop.f32.mrb[27].mxu0 }
 0x38d   : > { %v5351_v20 = vmax.f32 %v6112_v54, 0.0  ;;  %v6114_v28 = vadd.f32 %v5141_v42, %v8464_v6 }
 0x38e   : > { %5422 = vst [vmem:[%s8483_s3 + $0xc0] sm:$0xff] %v5350_v41  ;;  %v5352_v27 = vmax.f32 %v6113_v45, 0.0 }
 0x38f   : > { %5423 = vst [vmem:[%s8483_s3 + $0xc8] sm:$0xff] %v5351_v20  ;;  %v5353_v49 = vmax.f32 %v6114_v28, 0.0 }
 0x390   : > { %5424 = vst [vmem:[%s8483_s3 + $0xd0] sm:$0xff] %v5352_v27 }
 0x391   : > { %5425 = vst [vmem:[%s8483_s3 + $0xd8] sm:$0xff] %v5353_v49  ;;  %v5145_v2 = vpop.f32.mrb[28].mxu0 }
 0x392   : > { %v6115_v52 = vadd.f32 %v5145_v2, %v8466_v22  ;;  %v5147_v47 = vpop.f32.mrb[29].mxu0 }
 0x393   : > { %v6116_v4 = vadd.f32 %v5147_v47, %v8468_v58  ;;  %v5149_v56 = vpop.f32.mrb[30].mxu0 }
 0x394   : > { %v5354_v39 = vmax.f32 %v6115_v52, 0.0  ;;  %v6117_v6 = vadd.f32 %v5149_v56, %v8470_v1  ;;  %v5151_v32 = vpop.f32.mrb[31].mxu0 }
 0x395   : > { %v5355_v50 = vmax.f32 %v6116_v4, 0.0  ;;  %v6118_v16 = vadd.f32 %v5151_v32, %v8472_v53 }
 0x396   : > { %5426 = vst [vmem:[%s8483_s3 + $0xe0] sm:$0xff] %v5354_v39  ;;  %v5356_v13 = vmax.f32 %v6117_v6, 0.0 }
 0x397   : > { %5427 = vst [vmem:[%s8483_s3 + $0xe8] sm:$0xff] %v5355_v50  ;;  %v5357_v40 = vmax.f32 %v6118_v16, 0.0 }
 0x398   : > { %5428 = vst [vmem:[%s8483_s3 + $0xf0] sm:$0xff] %v5356_v13 }
 0x399   : > { %5429 = vst [vmem:[%s8483_s3 + $0xf8] sm:$0xff] %v5357_v40  ;;  %v5155_v22 = vpop.f32.mrb[32].mxu0 }
 0x39a   : > { %v6119_v58 = vadd.f32 %v5155_v22, %v8474_v9  ;;  %v5157_v0 = vpop.f32.mrb[33].mxu0 }
 0x39b   : > { %v6120_v1 = vadd.f32 %v5157_v0, %v8476_v12  ;;  %v5159_v35 = vpop.f32.mrb[34].mxu0 }
 0x39c   : > { %v5358_v10 = vmax.f32 %v6119_v58, 0.0  ;;  %v6121_v53 = vadd.f32 %v5159_v35, %v8478_v7  ;;  %v5161_v62 = vpop.f32.mrb[35].mxu0 }
 0x39d   : > { %v5359_v21 = vmax.f32 %v6120_v1, 0.0  ;;  %v6122_v63 = vadd.f32 %v5161_v62, %v8480_v8 }
 0x39e   : > { %5430 = vst [vmem:[%s8483_s3 + $0x100] sm:$0xff] %v5358_v10  ;;  %v5360_v11 = vmax.f32 %v6121_v53, 0.0 }
 0x39f   : > { %5431 = vst [vmem:[%s8483_s3 + $0x108] sm:$0xff] %v5359_v21  ;;  %v5361_v17 = vmax.f32 %v6122_v63, 0.0 }
 0x3a0   : > { %5432 = vst [vmem:[%s8483_s3 + $0x110] sm:$0xff] %v5360_v11  ;;  %v3139_v55 = vpop.f32.mrb[36].mxu1 }
 0x3a1   : > { %5433 = vst [vmem:[%s8483_s3 + $0x118] sm:$0xff] %v5361_v17  ;;  %v5165_v9 = vpop.f32.mrb[36].mxu0  ;;  %v3141_v12 = vpop.f32.mrb[37].mxu1 }
 0x3a2   : > { %v6123_v38 = vadd.f32 %v5165_v9, %v3139_v55  ;;  %v5167_v23 = vpop.f32.mrb[37].mxu0  ;;  %v3143_v36 = vpop.f32.mrb[38].mxu1 }
 0x3a3   : > { %v6124_v7 = vadd.f32 %v5167_v23, %v3141_v12  ;;  %v5169_v24 = vpop.f32.mrb[38].mxu0  ;;  %v3145_v51 = vpop.f32.mrb[39].mxu1 }
 0x3a4   : > { %v5362_v30 = vmax.f32 %v6123_v38, 0.0  ;;  %v6125_v8 = vadd.f32 %v5169_v24, %v3143_v36  ;;  %v5171_v25 = vpop.f32.mrb[39].mxu0 }
 0x3a5   : > { %v5363_v15 = vmax.f32 %v6124_v7, 0.0  ;;  %v6126_v26 = vadd.f32 %v5171_v25, %v3145_v51 }
 0x3a6   : > { %5434 = vst [vmem:[%s8483_s3 + $0x120] sm:$0xff] %v5362_v30  ;;  %v5364_v14 = vmax.f32 %v6125_v8, 0.0 }
 0x3a7   : > { %5435 = vst [vmem:[%s8483_s3 + $0x128] sm:$0xff] %v5363_v15  ;;  %v5365_v29 = vmax.f32 %v6126_v26, 0.0 }
 0x3a8   : > { %5436 = vst [vmem:[%s8483_s3 + $0x130] sm:$0xff] %v5364_v14  ;;  %v3149_v57 = vpop.f32.mrb[40].mxu1 }
 0x3a9   : > { %5437 = vst [vmem:[%s8483_s3 + $0x138] sm:$0xff] %v5365_v29  ;;  %v5175_v61 = vpop.f32.mrb[40].mxu0  ;;  %v3151_v59 = vpop.f32.mrb[41].mxu1 }
 0x3aa   : > { %v6127_v33 = vadd.f32 %v5175_v61, %v3149_v57  ;;  %v5177_v44 = vpop.f32.mrb[41].mxu0  ;;  %v3153_v43 = vpop.f32.mrb[42].mxu1 }
 0x3ab   : > { %v6128_v18 = vadd.f32 %v5177_v44, %v3151_v59  ;;  %v5179_v34 = vpop.f32.mrb[42].mxu0  ;;  %v3155_v19 = vpop.f32.mrb[43].mxu1 }
 0x3ac   : > { %v5366_v31 = vmax.f32 %v6127_v33, 0.0  ;;  %v6129_v3 = vadd.f32 %v5179_v34, %v3153_v43  ;;  %v5181_v37 = vpop.f32.mrb[43].mxu0 }
 0x3ad   : > { %v5367_v5 = vmax.f32 %v6128_v18, 0.0  ;;  %v6130_v48 = vadd.f32 %v5181_v37, %v3155_v19 }
 0x3ae   : > { %5438 = vst [vmem:[%s8483_s3 + $0x140] sm:$0xff] %v5366_v31  ;;  %v5368_v46 = vmax.f32 %v6129_v3, 0.0 }
 0x3af   : > { %5439 = vst [vmem:[%s8483_s3 + $0x148] sm:$0xff] %v5367_v5  ;;  %v5369_v54 = vmax.f32 %v6130_v48, 0.0 }
 0x3b0   : > { %5440 = vst [vmem:[%s8483_s3 + $0x150] sm:$0xff] %v5368_v46  ;;  %v3159_v60 = vpop.f32.mrb[44].mxu1 }
 0x3b1   : > { %5441 = vst [vmem:[%s8483_s3 + $0x158] sm:$0xff] %v5369_v54  ;;  %v5185_v41 = vpop.f32.mrb[44].mxu0  ;;  %v3161_v42 = vpop.f32.mrb[45].mxu1 }
 0x3b2   : > { %v6131_v45 = vadd.f32 %v5185_v41, %v3159_v60  ;;  %v5187_v20 = vpop.f32.mrb[45].mxu0  ;;  %v3163_v27 = vpop.f32.mrb[46].mxu1 }
 0x3b3   : > { %v6132_v28 = vadd.f32 %v5187_v20, %v3161_v42  ;;  %v5189_v49 = vpop.f32.mrb[46].mxu0  ;;  %v3165_v47 = vpop.f32.mrb[47].mxu1 }
 0x3b4   : > { %v5370_v2 = vmax.f32 %v6131_v45, 0.0  ;;  %v6133_v52 = vadd.f32 %v5189_v49, %v3163_v27  ;;  %v5191_v4 = vpop.f32.mrb[47].mxu0 }
 0x3b5   : > { %v5371_v56 = vmax.f32 %v6132_v28, 0.0  ;;  %v6134_v39 = vadd.f32 %v5191_v4, %v3165_v47 }
 0x3b6   : > { %5442 = vst [vmem:[%s8483_s3 + $0x160] sm:$0xff] %v5370_v2  ;;  %v5372_v6 = vmax.f32 %v6133_v52, 0.0 }
 0x3b7   : > { %5443 = vst [vmem:[%s8483_s3 + $0x168] sm:$0xff] %v5371_v56  ;;  %v5373_v32 = vmax.f32 %v6134_v39, 0.0 }
 0x3b8   : > { %5444 = vst [vmem:[%s8483_s3 + $0x170] sm:$0xff] %v5372_v6  ;;  %v3169_v50 = vpop.f32.mrb[48].mxu1 }
 0x3b9   : > { %5445 = vst [vmem:[%s8483_s3 + $0x178] sm:$0xff] %v5373_v32  ;;  %v5195_v16 = vpop.f32.mrb[48].mxu0  ;;  %v3171_v40 = vpop.f32.mrb[49].mxu1 }
 0x3ba   : > { %v6135_v13 = vadd.f32 %v5195_v16, %v3169_v50  ;;  %v5197_v22 = vpop.f32.mrb[49].mxu0  ;;  %v3173_v0 = vpop.f32.mrb[50].mxu1 }
 0x3bb   : > { %v6136_v58 = vadd.f32 %v5197_v22, %v3171_v40  ;;  %v5199_v1 = vpop.f32.mrb[50].mxu0  ;;  %v3175_v53 = vpop.f32.mrb[51].mxu1 }
 0x3bc   : > { %v5374_v35 = vmax.f32 %v6135_v13, 0.0  ;;  %v6137_v10 = vadd.f32 %v5199_v1, %v3173_v0  ;;  %v5201_v62 = vpop.f32.mrb[51].mxu0 }
 0x3bd   : > { %v5375_v21 = vmax.f32 %v6136_v58, 0.0  ;;  %v6138_v63 = vadd.f32 %v5201_v62, %v3175_v53 }
 0x3be   : > { %5446 = vst [vmem:[%s8483_s3 + $0x180] sm:$0xff] %v5374_v35  ;;  %v5376_v11 = vmax.f32 %v6137_v10, 0.0 }
 0x3bf   : > { %5447 = vst [vmem:[%s8483_s3 + $0x188] sm:$0xff] %v5375_v21  ;;  %v5377_v17 = vmax.f32 %v6138_v63, 0.0 }
 0x3c0   : > { %5448 = vst [vmem:[%s8483_s3 + $0x190] sm:$0xff] %v5376_v11  ;;  %v3179_v55 = vpop.f32.mrb[52].mxu1 }
 0x3c1   : > { %5449 = vst [vmem:[%s8483_s3 + $0x198] sm:$0xff] %v5377_v17  ;;  %v5205_v9 = vpop.f32.mrb[52].mxu0  ;;  %v3181_v12 = vpop.f32.mrb[53].mxu1 }
 0x3c2   : > { %v6139_v38 = vadd.f32 %v5205_v9, %v3179_v55  ;;  %v5207_v23 = vpop.f32.mrb[53].mxu0  ;;  %v3183_v36 = vpop.f32.mrb[54].mxu1 }
 0x3c3   : > { %v6140_v7 = vadd.f32 %v5207_v23, %v3181_v12  ;;  %v5209_v24 = vpop.f32.mrb[54].mxu0  ;;  %v3185_v51 = vpop.f32.mrb[55].mxu1 }
 0x3c4   : > { %v5378_v30 = vmax.f32 %v6139_v38, 0.0  ;;  %v6141_v8 = vadd.f32 %v5209_v24, %v3183_v36  ;;  %v5211_v25 = vpop.f32.mrb[55].mxu0 }
 0x3c5   : > { %v5379_v15 = vmax.f32 %v6140_v7, 0.0  ;;  %v6142_v26 = vadd.f32 %v5211_v25, %v3185_v51 }
 0x3c6   : > { %5450 = vst [vmem:[%s8483_s3 + $0x1a0] sm:$0xff] %v5378_v30  ;;  %v5380_v14 = vmax.f32 %v6141_v8, 0.0 }
 0x3c7   : > { %5451 = vst [vmem:[%s8483_s3 + $0x1a8] sm:$0xff] %v5379_v15  ;;  %v5381_v29 = vmax.f32 %v6142_v26, 0.0 }
 0x3c8   : > { %5452 = vst [vmem:[%s8483_s3 + $0x1b0] sm:$0xff] %v5380_v14  ;;  %v3189_v57 = vpop.f32.mrb[56].mxu1 }
 0x3c9   : > { %5453 = vst [vmem:[%s8483_s3 + $0x1b8] sm:$0xff] %v5381_v29  ;;  %v5215_v61 = vpop.f32.mrb[56].mxu0  ;;  %v3191_v59 = vpop.f32.mrb[57].mxu1 }
 0x3ca   : > { %v6143_v33 = vadd.f32 %v5215_v61, %v3189_v57  ;;  %v5217_v44 = vpop.f32.mrb[57].mxu0  ;;  %v3193_v43 = vpop.f32.mrb[58].mxu1  ;;  %v5494_v57 = vld [vmem:[%s8483_s3] sm:$0xff] (%p7223_p9)  ;;  %v5496_v61 = vld [vmem:[%s8483_s3 + $0x8] sm:$0xff] (%p7223_p9) }
 0x3cb   : > { %v6144_v18 = vadd.f32 %v5217_v44, %v3191_v59  ;;  %v5219_v34 = vpop.f32.mrb[58].mxu0  ;;  %v3195_v19 = vpop.f32.mrb[59].mxu1  ;;  %v5500_v59 = vld [vmem:[%s8483_s3 + $0x18] sm:$0xff] (%p7223_p9)  ;;  %v5502_v44 = vld [vmem:[%s8483_s3 + $0x20] sm:$0xff] (%p7223_p9)  ;;  %5495 = vst [vmem:[%s8604_s14] sm:$0xff] (%p7223_p9), %v5494_v57  ;;  %5497 = vst [vmem:[%s8604_s14 + $0x8] sm:$0xff] (%p7223_p9), %v5496_v61 }
 0x3cc   : > { %v5382_v31 = vmax.f32 %v6143_v33, 0.0  ;;  %v6145_v3 = vadd.f32 %v5219_v34, %v3193_v43  ;;  %v5221_v37 = vpop.f32.mrb[59].mxu0  ;;  %v5498_v33 = vld [vmem:[%s8483_s3 + $0x10] sm:$0xff] (%p7223_p9)  ;;  %v5508_v34 = vld [vmem:[%s8483_s3 + $0x38] sm:$0xff] (%p7223_p9)  ;;  %5501 = vst [vmem:[%s8604_s14 + $0x28] sm:$0xff] (%p7223_p9), %v5500_v59  ;;  %5503 = vst [vmem:[%s8604_s14 + $0x40] sm:$0xff] (%p7223_p9), %v5502_v44 }
 0x3cd   : > { %v5383_v5 = vmax.f32 %v6144_v18, 0.0  ;;  %v6146_v48 = vadd.f32 %v5221_v37, %v3195_v19  ;;  %v5504_v18 = vld [vmem:[%s8483_s3 + $0x28] sm:$0xff] (%p7223_p9)  ;;  %v5506_v43 = vld [vmem:[%s8483_s3 + $0x30] sm:$0xff] (%p7223_p9)  ;;  %v5516_v37 = vld [vmem:[%s8483_s3 + $0x58] sm:$0xff] (%p7223_p9)  ;;  %5499 = vst [vmem:[%s8604_s14 + $0x20] sm:$0xff] (%p7223_p9), %v5498_v33 }
 0x3ce   : > { %5454 = vst [vmem:[%s8483_s3 + $0x1c0] sm:$0xff] %v5382_v31  ;;  %v5384_v46 = vmax.f32 %v6145_v3, 0.0  ;;  %v5510_v31 = vld [vmem:[%s8483_s3 + $0x40] sm:$0xff] (%p7223_p9)  ;;  %v5512_v3 = vld [vmem:[%s8483_s3 + $0x48] sm:$0xff] (%p7223_p9)  ;;  %v5514_v19 = vld [vmem:[%s8483_s3 + $0x50] sm:$0xff] (%p7223_p9) }
 0x3cf   : > { %5455 = vst [vmem:[%s8483_s3 + $0x1c8] sm:$0xff] %v5383_v5  ;;  %v5385_v54 = vmax.f32 %v6146_v48, 0.0  ;;  %v5518_v5 = vld [vmem:[%s8483_s3 + $0x60] sm:$0xff] (%p7223_p9)  ;;  %v5520_v48 = vld [vmem:[%s8483_s3 + $0x68] sm:$0xff] (%p7223_p9)  ;;  %5505 = vst [vmem:[%s8604_s14 + $0x48] sm:$0xff] (%p7223_p9), %v5504_v18 }
 0x3d0   : > { %5456 = vst [vmem:[%s8483_s3 + $0x1d0] sm:$0xff] %v5384_v46  ;;  %v3199_v60 = vpop.f32.mrb[60].mxu1  ;;  %v5522_v46 = vld [vmem:[%s8483_s3 + $0x70] sm:$0xff] (%p7223_p9)  ;;  %5507 = vst [vmem:[%s8604_s14 + $0x60] sm:$0xff] (%p7223_p9), %v5506_v43 }
 0x3d1   : > { %5457 = vst [vmem:[%s8483_s3 + $0x1d8] sm:$0xff] %v5385_v54  ;;  %v5225_v41 = vpop.f32.mrb[60].mxu0  ;;  %v3201_v42 = vpop.f32.mrb[61].mxu1  ;;  %5509 = vst [vmem:[%s8604_s14 + $0x68] sm:$0xff] (%p7223_p9), %v5508_v34  ;;  %v5524_v54 = vld [vmem:[%s8483_s3 + $0x78] sm:$0xff] (%p7223_p9) }
 0x3d2   : > { %v6147_v45 = vadd.f32 %v5225_v41, %v3199_v60  ;;  %v5227_v20 = vpop.f32.mrb[61].mxu0  ;;  %v3203_v27 = vpop.f32.mrb[62].mxu1  ;;  %5511 = vst [vmem:[%s8604_s14 + $0x80] sm:$0xff] (%p7223_p9), %v5510_v31  ;;  %5513 = vst [vmem:[%s8604_s14 + $0x88] sm:$0xff] (%p7223_p9), %v5512_v3  ;;  %v5526_v60 = vld [vmem:[%s8483_s3 + $0x80] sm:$0xff] (%p7223_p9)  ;;  %v5528_v41 = vld [vmem:[%s8483_s3 + $0x88] sm:$0xff] (%p7223_p9) }
 0x3d3   : > { %v6148_v28 = vadd.f32 %v5227_v20, %v3201_v42  ;;  %v5229_v49 = vpop.f32.mrb[62].mxu0  ;;  %v3205_v47 = vpop.f32.mrb[63].mxu1  ;;  %5515 = vst [vmem:[%s8604_s14 + $0xa0] sm:$0xff] (%p7223_p9), %v5514_v19  ;;  %5517 = vst [vmem:[%s8604_s14 + $0xa8] sm:$0xff] (%p7223_p9), %v5516_v37  ;;  %v5532_v42 = vld [vmem:[%s8483_s3 + $0x98] sm:$0xff] (%p7223_p9)  ;;  %v5534_v20 = vld [vmem:[%s8483_s3 + $0xa0] sm:$0xff] (%p7223_p9) }
 0x3d4   : > { %v5386_v2 = vmax.f32 %v6147_v45, 0.0  ;;  %v6149_v52 = vadd.f32 %v5229_v49, %v3203_v27  ;;  %v5231_v4 = vpop.f32.mrb[63].mxu0  ;;  %5519 = vst [vmem:[%s8604_s14 + $0xc0] sm:$0xff] (%p7223_p9), %v5518_v5  ;;  %5521 = vst [vmem:[%s8604_s14 + $0xc8] sm:$0xff] (%p7223_p9), %v5520_v48  ;;  %v5530_v45 = vld [vmem:[%s8483_s3 + $0x90] sm:$0xff] (%p7223_p9)  ;;  %v5540_v49 = vld [vmem:[%s8483_s3 + $0xb8] sm:$0xff] (%p7223_p9) }
 0x3d5   : > { %v5387_v56 = vmax.f32 %v6148_v28, 0.0  ;;  %v6150_v39 = vadd.f32 %v5231_v4, %v3205_v47  ;;  %5523 = vst [vmem:[%s8604_s14 + $0xe0] sm:$0xff] (%p7223_p9), %v5522_v46  ;;  %5525 = vst [vmem:[%s8604_s14 + $0xe8] sm:$0xff] (%p7223_p9), %v5524_v54  ;;  %v5536_v28 = vld [vmem:[%s8483_s3 + $0xa8] sm:$0xff] (%p7223_p9)  ;;  %v5538_v27 = vld [vmem:[%s8483_s3 + $0xb0] sm:$0xff] (%p7223_p9) }
 0x3d6   : > { %5458 = vst [vmem:[%s8483_s3 + $0x1e0] sm:$0xff] %v5386_v2  ;;  %v5388_v6 = vmax.f32 %v6149_v52, 0.0  ;;  %5527 = vst [vmem:[%s8604_s14 + $0x100] sm:$0xff] (%p7223_p9), %v5526_v60  ;;  %v5542_v2 = vld [vmem:[%s8483_s3 + $0xc0] sm:$0xff] (%p7223_p9)  ;;  %v5544_v52 = vld [vmem:[%s8483_s3 + $0xc8] sm:$0xff] (%p7223_p9) }
 0x3d7   : > { %5459 = vst [vmem:[%s8483_s3 + $0x1e8] sm:$0xff] %v5387_v56  ;;  %v5389_v32 = vmax.f32 %v6150_v39, 0.0  ;;  %5529 = vst [vmem:[%s8604_s14 + $0x108] sm:$0xff] (%p7223_p9), %v5528_v41  ;;  %v5546_v47 = vld [vmem:[%s8483_s3 + $0xd0] sm:$0xff] (%p7223_p9)  ;;  %v5548_v4 = vld [vmem:[%s8483_s3 + $0xd8] sm:$0xff] (%p7223_p9) }
 0x3d8   : > { %5460 = vst [vmem:[%s8483_s3 + $0x1f0] sm:$0xff] %v5388_v6  ;;  %v3209_v50 = vpop.f32.mrb[64].mxu1  ;;  %5531 = vst [vmem:[%s8604_s14 + $0x120] sm:$0xff] (%p7223_p9), %v5530_v45  ;;  %v5550_v56 = vld [vmem:[%s8483_s3 + $0xe0] sm:$0xff] (%p7223_p9)  ;;  %v5552_v39 = vld [vmem:[%s8483_s3 + $0xe8] sm:$0xff] (%p7223_p9) }
 0x3d9   : > { %5461 = vst [vmem:[%s8483_s3 + $0x1f8] sm:$0xff] %v5389_v32  ;;  %v5235_v16 = vpop.f32.mrb[64].mxu0  ;;  %v3211_v40 = vpop.f32.mrb[65].mxu1  ;;  %5533 = vst [vmem:[%s8604_s14 + $0x128] sm:$0xff] (%p7223_p9), %v5532_v42  ;;  %v5554_v6 = vld [vmem:[%s8483_s3 + $0xf0] sm:$0xff] (%p7223_p9)  ;;  %v5556_v32 = vld [vmem:[%s8483_s3 + $0xf8] sm:$0xff] (%p7223_p9) }
 0x3da   : > { %v6151_v13 = vadd.f32 %v5235_v16, %v3209_v50  ;;  %v5237_v22 = vpop.f32.mrb[65].mxu0  ;;  %v3213_v0 = vpop.f32.mrb[66].mxu1  ;;  %5535 = vst [vmem:[%s8604_s14 + $0x140] sm:$0xff] (%p7223_p9), %v5534_v20  ;;  %5537 = vst [vmem:[%s8604_s14 + $0x148] sm:$0xff] (%p7223_p9), %v5536_v28  ;;  %v5558_v50 = vld [vmem:[%s8483_s3 + $0x100] sm:$0xff] (%p7223_p9)  ;;  %v5560_v16 = vld [vmem:[%s8483_s3 + $0x108] sm:$0xff] (%p7223_p9) }
 0x3db   : > { %v6152_v58 = vadd.f32 %v5237_v22, %v3211_v40  ;;  %v5239_v1 = vpop.f32.mrb[66].mxu0  ;;  %v3215_v53 = vpop.f32.mrb[67].mxu1  ;;  %5539 = vst [vmem:[%s8604_s14 + $0x160] sm:$0xff] (%p7223_p9), %v5538_v27  ;;  %5541 = vst [vmem:[%s8604_s14 + $0x168] sm:$0xff] (%p7223_p9), %v5540_v49  ;;  %v5564_v40 = vld [vmem:[%s8483_s3 + $0x118] sm:$0xff] (%p7223_p9)  ;;  %v5566_v22 = vld [vmem:[%s8483_s3 + $0x120] sm:$0xff] (%p7223_p9) }
 0x3dc   : > { %v5390_v35 = vmax.f32 %v6151_v13, 0.0  ;;  %v6153_v10 = vadd.f32 %v5239_v1, %v3213_v0  ;;  %v5241_v62 = vpop.f32.mrb[67].mxu0  ;;  %5543 = vst [vmem:[%s8604_s14 + $0x180] sm:$0xff] (%p7223_p9), %v5542_v2  ;;  %5545 = vst [vmem:[%s8604_s14 + $0x188] sm:$0xff] (%p7223_p9), %v5544_v52  ;;  %v5562_v13 = vld [vmem:[%s8483_s3 + $0x110] sm:$0xff] (%p7223_p9)  ;;  %v5572_v1 = vld [vmem:[%s8483_s3 + $0x138] sm:$0xff] (%p7223_p9) }
 0x3dd   : > { %v5391_v21 = vmax.f32 %v6152_v58, 0.0  ;;  %v6154_v63 = vadd.f32 %v5241_v62, %v3215_v53  ;;  %5547 = vst [vmem:[%s8604_s14 + $0x1a0] sm:$0xff] (%p7223_p9), %v5546_v47  ;;  %5549 = vst [vmem:[%s8604_s14 + $0x1a8] sm:$0xff] (%p7223_p9), %v5548_v4  ;;  %v5568_v58 = vld [vmem:[%s8483_s3 + $0x128] sm:$0xff] (%p7223_p9)  ;;  %v5570_v0 = vld [vmem:[%s8483_s3 + $0x130] sm:$0xff] (%p7223_p9) }
 0x3de   : > { %5462 = vst [vmem:[%s8483_s3 + $0x200] sm:$0xff] %v5390_v35  ;;  %v5392_v11 = vmax.f32 %v6153_v10, 0.0  ;;  %5551 = vst [vmem:[%s8604_s14 + $0x1c0] sm:$0xff] (%p7223_p9), %v5550_v56  ;;  %v5574_v35 = vld [vmem:[%s8483_s3 + $0x140] sm:$0xff] (%p7223_p9)  ;;  %v5576_v10 = vld [vmem:[%s8483_s3 + $0x148] sm:$0xff] (%p7223_p9) }
 0x3df   : > { %5463 = vst [vmem:[%s8483_s3 + $0x208] sm:$0xff] %v5391_v21  ;;  %v5393_v17 = vmax.f32 %v6154_v63, 0.0  ;;  %5553 = vst [vmem:[%s8604_s14 + $0x1c8] sm:$0xff] (%p7223_p9), %v5552_v39  ;;  %v5578_v53 = vld [vmem:[%s8483_s3 + $0x150] sm:$0xff] (%p7223_p9)  ;;  %v5580_v62 = vld [vmem:[%s8483_s3 + $0x158] sm:$0xff] (%p7223_p9) }
 0x3e0   : > { %5464 = vst [vmem:[%s8483_s3 + $0x210] sm:$0xff] %v5392_v11  ;;  %v3219_v55 = vpop.f32.mrb[68].mxu1  ;;  %5555 = vst [vmem:[%s8604_s14 + $0x1e0] sm:$0xff] (%p7223_p9), %v5554_v6  ;;  %v5582_v21 = vld [vmem:[%s8483_s3 + $0x160] sm:$0xff] (%p7223_p9)  ;;  %v5584_v63 = vld [vmem:[%s8483_s3 + $0x168] sm:$0xff] (%p7223_p9) }
 0x3e1   : > { %5465 = vst [vmem:[%s8483_s3 + $0x218] sm:$0xff] %v5393_v17  ;;  %v5245_v9 = vpop.f32.mrb[68].mxu0  ;;  %v3221_v12 = vpop.f32.mrb[69].mxu1  ;;  %5557 = vst [vmem:[%s8604_s14 + $0x1e8] sm:$0xff] (%p7223_p9), %v5556_v32  ;;  %v5586_v11 = vld [vmem:[%s8483_s3 + $0x170] sm:$0xff] (%p7223_p9)  ;;  %v5588_v17 = vld [vmem:[%s8483_s3 + $0x178] sm:$0xff] (%p7223_p9) }
 0x3e2   : > { %v6155_v38 = vadd.f32 %v5245_v9, %v3219_v55  ;;  %v5247_v23 = vpop.f32.mrb[69].mxu0  ;;  %v3223_v36 = vpop.f32.mrb[70].mxu1  ;;  %5559 = vst [vmem:[%s8604_s14 + $0x200] sm:$0xff] (%p7223_p9), %v5558_v50  ;;  %5561 = vst [vmem:[%s8604_s14 + $0x208] sm:$0xff] (%p7223_p9), %v5560_v16  ;;  %v5590_v55 = vld [vmem:[%s8483_s3 + $0x180] sm:$0xff] (%p7223_p9)  ;;  %v5592_v9 = vld [vmem:[%s8483_s3 + $0x188] sm:$0xff] (%p7223_p9) }
 0x3e3   : > { %v6156_v7 = vadd.f32 %v5247_v23, %v3221_v12  ;;  %v5249_v24 = vpop.f32.mrb[70].mxu0  ;;  %v3225_v51 = vpop.f32.mrb[71].mxu1  ;;  %5476 = sbr.rel (!%p7223_p9) target bundleno = 1016 (0x3f8), region = 70  ;;  %5563 = vst [vmem:[%s8604_s14 + $0x220] sm:$0xff] (%p7223_p9), %v5562_v13  ;;  %5565 = vst [vmem:[%s8604_s14 + $0x228] sm:$0xff] (%p7223_p9), %v5564_v40  ;;  %v5596_v12 = vld [vmem:[%s8483_s3 + $0x198] sm:$0xff] (%p7223_p9) }
 0x3e4   : > { %v5394_v30 = vmax.f32 %v6155_v38, 0.0  ;;  %v6157_v8 = vadd.f32 %v5249_v24, %v3223_v36  ;;  %v5251_v25 = vpop.f32.mrb[71].mxu0  ;;  %5567 = vst [vmem:[%s8604_s14 + $0x240] sm:$0xff] (%p7223_p9), %v5566_v22  ;;  %5569 = vst [vmem:[%s8604_s14 + $0x248] sm:$0xff] (%p7223_p9), %v5568_v58  ;;  %v5594_v38 = vld [vmem:[%s8483_s3 + $0x190] sm:$0xff] (%p7223_p9)  ;;  %v5598_v23 = vld [vmem:[%s8483_s3 + $0x1a0] sm:$0xff] (%p7223_p9) }
 0x3e5   : > { %v5395_v15 = vmax.f32 %v6156_v7, 0.0  ;;  %v6158_v26 = vadd.f32 %v5251_v25, %v3225_v51  ;;  %5571 = vst [vmem:[%s8604_s14 + $0x260] sm:$0xff] (%p7223_p9), %v5570_v0  ;;  %5573 = vst [vmem:[%s8604_s14 + $0x268] sm:$0xff] (%p7223_p9), %v5572_v1  ;;  %v5600_v7 = vld [vmem:[%s8483_s3 + $0x1a8] sm:$0xff] (%p7223_p9)  ;;  %v5602_v36 = vld [vmem:[%s8483_s3 + $0x1b0] sm:$0xff] (%p7223_p9) }
 0x3e6   : > { %5466 = vst [vmem:[%s8483_s3 + $0x220] sm:$0xff] %v5394_v30  ;;  %v5396_v14 = vmax.f32 %v6157_v8, 0.0  ;;  %5575 = vst [vmem:[%s8604_s14 + $0x280] sm:$0xff] (%p7223_p9), %v5574_v35  ;;  %v5604_v24 = vld [vmem:[%s8483_s3 + $0x1b8] sm:$0xff] (%p7223_p9)  ;;  %v5606_v30 = vld [vmem:[%s8483_s3 + $0x1c0] sm:$0xff] (%p7223_p9) }
 0x3e7   : > { %5467 = vst [vmem:[%s8483_s3 + $0x228] sm:$0xff] %v5395_v15  ;;  %v5397_v29 = vmax.f32 %v6158_v26, 0.0  ;;  %5577 = vst [vmem:[%s8604_s14 + $0x288] sm:$0xff] (%p7223_p9), %v5576_v10  ;;  %v5608_v8 = vld [vmem:[%s8483_s3 + $0x1c8] sm:$0xff] (%p7223_p9)  ;;  %v5610_v51 = vld [vmem:[%s8483_s3 + $0x1d0] sm:$0xff] (%p7223_p9) }
 0x3e8   : > { %5468 = vst [vmem:[%s8483_s3 + $0x230] sm:$0xff] %v5396_v14  ;;  %5579 = vst [vmem:[%s8604_s14 + $0x2a0] sm:$0xff] (%p7223_p9), %v5578_v53  ;;  %v5612_v25 = vld [vmem:[%s8483_s3 + $0x1d8] sm:$0xff] (%p7223_p9)  ;;  %v5614_v15 = vld [vmem:[%s8483_s3 + $0x1e0] sm:$0xff] (%p7223_p9) }
 0x3e9   : > { %5469 = vst [vmem:[%s8483_s3 + $0x238] sm:$0xff] %v5397_v29  ;;  %5581 = vst [vmem:[%s8604_s14 + $0x2a8] sm:$0xff] (%p7223_p9), %v5580_v62  ;;  %v5616_v26 = vld [vmem:[%s8483_s3 + $0x1e8] sm:$0xff] (%p7223_p9)  ;;  %v5618_v14 = vld [vmem:[%s8483_s3 + $0x1f0] sm:$0xff] (%p7223_p9) }
 0x3ea   : > { %5583 = vst [vmem:[%s8604_s14 + $0x2c0] sm:$0xff] %v5582_v21  ;;  %5585 = vst [vmem:[%s8604_s14 + $0x2c8] sm:$0xff] %v5584_v63  ;;  %v5620_v29 = vld [vmem:[%s8483_s3 + $0x1f8] sm:$0xff]  ;;  %v5622_v57 = vld [vmem:[%s8483_s3 + $0x200] sm:$0xff] }
 0x3eb   : > { %5587 = vst [vmem:[%s8604_s14 + $0x2e0] sm:$0xff] %v5586_v11  ;;  %5589 = vst [vmem:[%s8604_s14 + $0x2e8] sm:$0xff] %v5588_v17  ;;  %v5624_v61 = vld [vmem:[%s8483_s3 + $0x208] sm:$0xff]  ;;  %v5626_v33 = vld [vmem:[%s8483_s3 + $0x210] sm:$0xff] }
 0x3ec   : > { %5591 = vst [vmem:[%s8604_s14 + $0x300] sm:$0xff] %v5590_v55  ;;  %5593 = vst [vmem:[%s8604_s14 + $0x308] sm:$0xff] %v5592_v9  ;;  %v5628_v59 = vld [vmem:[%s8483_s3 + $0x218] sm:$0xff] }
 0x3ed   : > { %5595 = vst [vmem:[%s8604_s14 + $0x320] sm:$0xff] %v5594_v38  ;;  %5597 = vst [vmem:[%s8604_s14 + $0x328] sm:$0xff] %v5596_v12  ;;  %v5630_v44 = vld [vmem:[%s8483_s3 + $0x220] sm:$0xff] }
 0x3ee   : > { %5599 = vst [vmem:[%s8604_s14 + $0x340] sm:$0xff] %v5598_v23  ;;  %5601 = vst [vmem:[%s8604_s14 + $0x348] sm:$0xff] %v5600_v7  ;;  %v5632_v18 = vld [vmem:[%s8483_s3 + $0x228] sm:$0xff] }
 0x3ef   : > { %5603 = vst [vmem:[%s8604_s14 + $0x360] sm:$0xff] %v5602_v36  ;;  %5605 = vst [vmem:[%s8604_s14 + $0x368] sm:$0xff] %v5604_v24  ;;  %v5634_v43 = vld [vmem:[%s8483_s3 + $0x230] sm:$0xff] }
 0x3f0   : > { %5607 = vst [vmem:[%s8604_s14 + $0x380] sm:$0xff] %v5606_v30  ;;  %5609 = vst [vmem:[%s8604_s14 + $0x388] sm:$0xff] %v5608_v8  ;;  %v5636_v34 = vld [vmem:[%s8483_s3 + $0x238] sm:$0xff] }
 0x3f1   : > { %5611 = vst [vmem:[%s8604_s14 + $0x3a0] sm:$0xff] %v5610_v51  ;;  %5613 = vst [vmem:[%s8604_s14 + $0x3a8] sm:$0xff] %v5612_v25 }
 0x3f2   : > { %5615 = vst [vmem:[%s8604_s14 + $0x3c0] sm:$0xff] %v5614_v15  ;;  %5617 = vst [vmem:[%s8604_s14 + $0x3c8] sm:$0xff] %v5616_v26 }
 0x3f3   : > { %5619 = vst [vmem:[%s8604_s14 + $0x3e0] sm:$0xff] %v5618_v14  ;;  %5621 = vst [vmem:[%s8604_s14 + $0x3e8] sm:$0xff] %v5620_v29 }
 0x3f4   : > { %5623 = vst [vmem:[%s8604_s14 + $0x400] sm:$0xff] %v5622_v57  ;;  %5625 = vst [vmem:[%s8604_s14 + $0x408] sm:$0xff] %v5624_v61 }
 0x3f5   : > { %5627 = vst [vmem:[%s8604_s14 + $0x420] sm:$0xff] %v5626_v33  ;;  %5629 = vst [vmem:[%s8604_s14 + $0x428] sm:$0xff] %v5628_v59 }
 0x3f6   : > { %5631 = vst [vmem:[%s8604_s14 + $0x440] sm:$0xff] %v5630_v44  ;;  %5633 = vst [vmem:[%s8604_s14 + $0x448] sm:$0xff] %v5632_v18 }
 0x3f7   : > { %5635 = vst [vmem:[%s8604_s14 + $0x460] sm:$0xff] %v5634_v43  ;;  %5637 = vst [vmem:[%s8604_s14 + $0x468] sm:$0xff] %v5636_v34 }
 0x3f8 PF: > { %s12_s17 = sadd.s32 1, %s7138_s17   ;;  %s8769_s9 = smov %s7110_s10 }
 0x3f9   : > { %p9_p1 = scmp.ge.s32.totalorder %s12_s17, 6   ;;  %s8770_s10 = smov %s7228_s28 }
 0x3fa   : > { %s8771_s11 = smov %s7118_s12  ;;  %s8772_s12 = smov %s7217_s24 }
 0x3fb   : > { %s8773_s13 = smov %s7130_s15  ;;  %s8774_s14 = smov %s7134_s16 }
 0x3fc   : > { %s8775_s15 = smov %s8778_s19  ;;  %s8776_s16 = smov %s8782_s20 }
 0x3fd   :  { %11 = sbr.rel (!%p9_p1) target bundleno = 5 (0x5), region = 135 }

</bundles_post_ra>
